<compile_context>
chip_gen: v5e
topology: v5e:2x2
jax: 0.10.0
libtpu: 0.0.40
codegen_flags: <defaults>
</compile_context>

<pallas_src>
import jax
import jax.numpy as jnp
from jax.experimental import pallas as pl
from jax.experimental.pallas import tpu as pltpu

LEAKY_SLOPE = 0.01   # PyTorch nn.LeakyReLU default negative_slope
NP = 128             # lane-padded channel width used throughout the kernel


def _leaky(x):
    return jnp.where(x >= 0, x, LEAKY_SLOPE * x)


# --------------------------- fused Pallas kernel --------------------------- #
def _make_fused_kernel(c_in, h, w, bt):
    """Build the fused forward kernel for (c_in, h, w) images, BT images/step."""
    assert bt % 8 == 0, "BT must be a multiple of 8 (sublane alignment)"
    assert h % 4 == 0 and w % 4 == 0
    p1h, p1w = h // 4, w // 4          # space-to-depth(4) grid of the raw input
    oh1, ow1 = p1h - 1, p1w - 1        # conv1 output spatial  (== (h-8)//4 + 1)
    assert oh1 % 2 == 0 and ow1 % 2 == 0
    p2h, p2w = oh1 // 2, ow1 // 2      # space-to-depth(2) grid of conv1 output
    oh2, ow2 = p2h - 1, p2w - 1        # conv2 output spatial  (== (oh1-4)//2 + 1)
    assert oh2 == 3 and ow2 == 3       # conv3 (3x3, stride 1) -> 1x1 spatial

    ck = 16 * c_in                     # conv1 GEMM K (s2d(4) channels)
    xcols = 3 * p2w                    # duplicated/permuted columns per s2d(4) row
    xrows = p1h * xcols                # flattened (row, col) extent of kernel input

    def kernel(x_ref, w1_ref, b1_ref, w2_ref, b2_ref, w3_ref, b3_ref,
               wfc_ref, bfc_ref, o_ref, h1s_ref):
        f32 = jnp.float32
        # Hoisted loop-invariant bias loads (weight tiles are intentionally re-read
        # per dot -- see header note on vreg pressure).
        b1, b2, b3, bfc = b1_ref[...], b2_ref[...], b3_ref[...], bfc_ref[...]

        # ---- conv1: 2x2 stride-1 conv over the s2d(4) input ----------------------
        # Input layout (xrows, BT, ck) uses duplicated/permuted columns so every
        # sub-GEMM reads a CONTIGUOUS 2*p2w-row slice and its output rows come out
        # grouped as [even ox (q2=0..p2w-1) | odd ox], batch-minor.
        for oy in range(oh1):
            acc = None
            for i in range(2):
                for j in range(2):
                    start = (oy + i) * xcols + j * p2w
                    xs = x_ref[pl.ds(start, 2 * p2w), :, :]        # (2*p2w, BT, ck)
                    xs = xs.reshape(2 * p2w * bt, ck)
                    t = jnp.dot(xs, w1_ref[i, j], preferred_element_type=f32)
                    acc = t if acc is None else acc + t            # (2*p2w*BT, 128)
            h1row = _leaky(acc + b1)                               # 32 valid ch
            p2, di = oy // 2, oy % 2
            ev = h1row[: p2w * bt].reshape(p2w, bt, NP)            # even ox  (dj=0)
            od = h1row[p2w * bt:].reshape(p2w, bt, NP)             # odd  ox  (dj=1)
            h1s_ref[pl.ds(p2 * p2w, p2w), :,
                    pl.ds((2 * di + 0) * 32, 32)] = ev[:, :, :32]
            h1s_ref[pl.ds(p2 * p2w, p2w), :,
                    pl.ds((2 * di + 1) * 32, 32)] = od[:, :, :32]

        # ---- conv2 (2x2 conv over s2d(2) layout, dense K=128) + conv3 on the fly --
        acc3 = None
        for oy2 in range(oh2):
            acc2 = None
            for i in range(2):
                for j in range(2):
                    hs = h1s_ref[pl.ds((oy2 + i) * p2w + j, ow2), :, :]  # (3, BT, 128)
                    hs = hs.reshape(ow2 * bt, NP)
                    t = jnp.dot(hs, w2_ref[i, j], preferred_element_type=f32)
                    acc2 = t if acc2 is None else acc2 + t               # (3*BT, 128)
            h2row = _leaky(acc2 + b2)                                    # 64 valid ch
            for ox2 in range(ow2):
                slab = h2row[ox2 * bt:(ox2 + 1) * bt, :64]               # (BT, 64)
                t = jnp.dot(slab, w3_ref[oy2, ox2], preferred_element_type=f32)
                acc3 = t if acc3 is None else acc3 + t                   # (BT, 128)
        h3 = _leaky(acc3 + b3)                                           # 64 valid ch

        # ---- fc: lane-dense (BT, 128) output; wrapper slices to output_size -------
        o_ref[...] = jnp.dot(h3[:, :64], wfc_ref[...],
                             preferred_element_type=f32) + bfc

    scratch = pltpu.VMEM((p2h * p2w, bt, NP), jnp.float32)
    dims = dict(p1h=p1h, p1w=p1w, p2w=p2w, ck=ck, xcols=xcols, xrows=xrows)
    return kernel, scratch, dims


def make_forward(c_in, h, w, output_size, bt=32):
    kernel, scratch, d = _make_fused_kernel(c_in, h, w, bt)
    p1h, p1w, p2w = d["p1h"], d["p1w"], d["p2w"]
    ck, xcols, xrows = d["ck"], d["xcols"], d["xrows"]
    # Duplicated/permuted column order: [even cols | odd cols | even cols shifted by 2]
    colmap = ([2 * q for q in range(p2w)]
              + [2 * q + 1 for q in range(p2w)]
              + [2 * q + 2 for q in range(p2w)])
    colmap = jnp.asarray(colmap, jnp.int32)

    @jax.jit
    def forward(x, kp):
        B = x.shape[0]
        b_pad = -(-B // bt) * bt
        # Wrapper-side layout op (fuses under jit; input is tiny -- revisit only if
        # this ever shows up as a separate HBM round trip at large B):
        #   NCHW -> s2d(4) -> duplicated/permuted columns -> pos-major (rows, B, ck).
        xs = x.transpose(0, 2, 3, 1).reshape(B, p1h, 4, p1w, 4, c_in)
        xs = xs.transpose(0, 1, 3, 2, 4, 5).reshape(B, p1h, p1w, ck)
        xp = jnp.take(xs, colmap, axis=2)                     # (B, p1h, xcols, ck)
        xp = xp.reshape(B, xrows, ck).transpose(1, 0, 2)      # (xrows, B, ck)
        if b_pad != B:
            xp = jnp.pad(xp, ((0, 0), (0, b_pad - B), (0, 0)))

        out = pl.pallas_call(
            kernel,
            out_shape=jax.ShapeDtypeStruct((b_pad, NP), jnp.float32),
            grid_spec=pltpu.PrefetchScalarGridSpec(
                num_scalar_prefetch=0,
                grid=(b_pad // bt,),
                in_specs=[
                    pl.BlockSpec((xrows, bt, ck), lambda g: (0, g, 0)),
                    pl.BlockSpec(kp["w1"].shape, lambda g: (0, 0, 0, 0)),
                    pl.BlockSpec(kp["b1"].shape, lambda g: (0, 0)),
                    pl.BlockSpec(kp["w2"].shape, lambda g: (0, 0, 0, 0)),
                    pl.BlockSpec(kp["b2"].shape, lambda g: (0, 0)),
                    pl.BlockSpec(kp["w3"].shape, lambda g: (0, 0, 0, 0)),
                    pl.BlockSpec(kp["b3"].shape, lambda g: (0, 0)),
                    pl.BlockSpec(kp["wfc"].shape, lambda g: (0, 0)),
                    pl.BlockSpec(kp["bfc"].shape, lambda g: (0, 0)),
                ],
                out_specs=pl.BlockSpec((bt, NP), lambda g: (g, 0)),
                scratch_shapes=[scratch],
            ),
            compiler_params=pltpu.CompilerParams(
                dimension_semantics=("parallel",)),
        )(xp, kp["w1"], kp["b1"], kp["w2"], kp["b2"],
          kp["w3"], kp["b3"], kp["wfc"], kp["bfc"])
        return out[:B, :output_size]

    return forward


# ----------------------- init-time weight preparation ---------------------- #
def _pad_last(a, n):
    return jnp.pad(a, [(0, 0)] * (a.ndim - 1) + [(0, n - a.shape[-1])])


def prepare_params(p):
    """Reorder / zero-pad PyTorch-layout params into the kernel's layout (init-time)."""
    # conv1: W1s[i, j, (di4*4+dj4)*C + c, o] = w1[o, c, 4i+di4, 4j+dj4]
    o1, c1, _, _ = p["w1"].shape
    w1 = p["w1"].transpose(2, 3, 1, 0)            # [ky, kx, c, o]
    w1 = w1.reshape(2, 4, 2, 4, c1, o1)           # [i, di4, j, dj4, c, o]
    w1 = w1.transpose(0, 2, 1, 3, 4, 5).reshape(2, 2, 16 * c1, o1)
    w1 = _pad_last(w1, NP)                        # (2, 2, 16c, 128)

    # conv2: W2s[i, j, (di*2+dj)*32 + c, o] = w2[o, c, 2i+di, 2j+dj]
    o2, c2, _, _ = p["w2"].shape
    w2 = p["w2"].transpose(2, 3, 1, 0)            # [ky, kx, c, o]
    w2 = w2.reshape(2, 2, 2, 2, c2, o2)           # [i, di, j, dj, c, o]
    w2 = w2.transpose(0, 2, 1, 3, 4, 5).reshape(2, 2, 4 * c2, o2)
    w2 = _pad_last(w2, NP)                        # (2, 2, 128, 128)

    # conv3: W3p[ky, kx, c, o(pad 128)] = w3[o, c, ky, kx]   (K kept at 64, no pad)
    w3 = _pad_last(p["w3"].transpose(2, 3, 1, 0), NP)        # (3, 3, 64, 128)

    # fc: Wfcp[c, o(pad 128)] = wfc[o, c]                    (K kept at 64, no pad)
    wfc = _pad_last(p["wfc"].T, NP)                          # (64, 128)

    return {
        "w1": w1, "b1": _pad_last(p["b1"].reshape(1, -1), NP),
        "w2": w2, "b2": _pad_last(p["b2"].reshape(1, -1), NP),
        "w3": w3, "b3": _pad_last(p["b3"].reshape(1, -1), NP),
        "wfc": wfc, "bfc": _pad_last(p["bfc"].reshape(1, -1), NP),
    }


# ------------------------- deterministic raw params ------------------------ #
def init_params(key, c, conv_output_size, output_size):
    def uinit(k, shape, fan_in):  # PyTorch default: U(-1/sqrt(fan_in), 1/sqrt(fan_in))
        bound = 1.0 / float(fan_in) ** 0.5
        return jax.random.uniform(k, shape, jnp.float32, -bound, bound)

    ks = jax.random.split(key, 8)
    return {
        "w1": uinit(ks[0], (32, c, 8, 8), c * 8 * 8),
        "b1": uinit(ks[1], (32,), c * 8 * 8),
        "w2": uinit(ks[2], (64, 32, 4, 4), 32 * 4 * 4),
        "b2": uinit(ks[3], (64,), 32 * 4 * 4),
        "w3": uinit(ks[4], (64, 64, 3, 3), 64 * 3 * 3),
        "b3": uinit(ks[5], (64,), 64 * 3 * 3),
        "wfc": uinit(ks[6], (output_size, conv_output_size), conv_output_size),
        "bfc": uinit(ks[7], (output_size,), conv_output_size),
    }


# --------------------------- pure-JAX reference ----------------------------- #
def _ref_forward(x, p):
    def conv(x, w, b, s):
        y = jax.lax.conv_general_dilated(
            x, w, (s, s), "VALID", dimension_numbers=("NCHW", "OIHW", "NCHW"))
        y = y + b[None, :, None, None]
        return jnp.where(y >= 0, y, LEAKY_SLOPE * y)

    x = conv(x, p["w1"], p["b1"], 4)
    x = conv(x, p["w2"], p["b2"], 2)
    x = conv(x, p["w3"], p["b3"], 1)
    x = x.reshape(x.shape[0], -1)
    return x @ p["wfc"].T + p["bfc"]


if __name__ == "__main__":
    B, C, H, W = 2, 4, 36, 36              # -> conv output (64, 1, 1)
    conv_output_size, output_size = 64, 32

    key = jax.random.PRNGKey(0)
    k_x, k_p = jax.random.split(key)
    x = jax.random.normal(k_x, (B, C, H, W), jnp.float32)
    raw_params = init_params(k_p, C, conv_output_size, output_size)
    kernel_params = prepare_params(raw_params)

    # bt=8 for this tiny batch (batch is zero-padded up to bt); use bt=32 for real B.
    forward = make_forward(C, H, W, output_size, bt=8)
    out = jax.block_until_ready(forward(x, kernel_params))
    assert out.shape == (B, output_size), out.shape

    ref = jax.block_until_ready(_ref_forward(x, raw_params))
    max_err = float(jnp.max(jnp.abs(out - ref)))
    assert max_err < 1e-4, f"mismatch vs reference: {max_err}"

    print("KERNEL_OK")
</pallas_src>

<mosaic_0001>
module attributes {stable_mosaic.version = 11 : i64} {
  func.func @kernel(%arg0: i32, %arg1: memref<108x8x64xf32, #tpu.memory_space<vmem>>, %arg2: memref<2x2x64x128xf32, #tpu.memory_space<vmem>>, %arg3: memref<1x128xf32, #tpu.memory_space<vmem>>, %arg4: memref<2x2x128x128xf32, #tpu.memory_space<vmem>>, %arg5: memref<1x128xf32, #tpu.memory_space<vmem>>, %arg6: memref<3x3x64x128xf32, #tpu.memory_space<vmem>>, %arg7: memref<1x128xf32, #tpu.memory_space<vmem>>, %arg8: memref<64x128xf32, #tpu.memory_space<vmem>>, %arg9: memref<1x128xf32, #tpu.memory_space<vmem>>, %arg10: memref<8x128xf32, #tpu.memory_space<vmem>>, %arg11: memref<16x8x128xf32, #tpu.memory_space<vmem>>) attributes {dimension_semantics = [#tpu.dimension_semantics<parallel>], iteration_bounds = array<i64: 1>, scalar_prefetch = 0 : i64, scratch_operands = 1 : i64, tpu.core_type = #tpu.core_type<tc>, window_params = [{transform_indices = @transform_0, window_bounds = array<i64: 108, 8, 64>}, {pipeline_mode = #tpu.pipeline_mode<synchronous>, transform_indices = @transform_1, window_bounds = array<i64: 2, 2, 64, 128>}, {pipeline_mode = #tpu.pipeline_mode<synchronous>, transform_indices = @transform_2, window_bounds = array<i64: 1, 128>}, {pipeline_mode = #tpu.pipeline_mode<synchronous>, transform_indices = @transform_3, window_bounds = array<i64: 2, 2, 128, 128>}, {pipeline_mode = #tpu.pipeline_mode<synchronous>, transform_indices = @transform_4, window_bounds = array<i64: 1, 128>}, {pipeline_mode = #tpu.pipeline_mode<synchronous>, transform_indices = @transform_5, window_bounds = array<i64: 3, 3, 64, 128>}, {pipeline_mode = #tpu.pipeline_mode<synchronous>, transform_indices = @transform_6, window_bounds = array<i64: 1, 128>}, {pipeline_mode = #tpu.pipeline_mode<synchronous>, transform_indices = @transform_7, window_bounds = array<i64: 64, 128>}, {pipeline_mode = #tpu.pipeline_mode<synchronous>, transform_indices = @transform_8, window_bounds = array<i64: 1, 128>}, {transform_indices = @transform_9, window_bounds = array<i64: 8, 128>}]} {
    %c0 = arith.constant 0 : index
    %c0_0 = arith.constant 0 : index
    %0 = vector.load %arg3[%c0, %c0_0] : memref<1x128xf32, #tpu.memory_space<vmem>>, vector<1x128xf32>
    %c0_1 = arith.constant 0 : index
    %c0_2 = arith.constant 0 : index
    %1 = vector.load %arg5[%c0_1, %c0_2] : memref<1x128xf32, #tpu.memory_space<vmem>>, vector<1x128xf32>
    %c0_3 = arith.constant 0 : index
    %c0_4 = arith.constant 0 : index
    %2 = vector.load %arg7[%c0_3, %c0_4] : memref<1x128xf32, #tpu.memory_space<vmem>>, vector<1x128xf32>
    %c0_5 = arith.constant 0 : index
    %c0_6 = arith.constant 0 : index
    %3 = vector.load %arg9[%c0_5, %c0_6] : memref<1x128xf32, #tpu.memory_space<vmem>>, vector<1x128xf32>
    %c0_7 = arith.constant 0 : index
    %c0_8 = arith.constant 0 : index
    %c0_9 = arith.constant 0 : index
    %4 = vector.load %arg1[%c0_7, %c0_8, %c0_9] : memref<108x8x64xf32, #tpu.memory_space<vmem>>, vector<8x8x64xf32>
    %5 = vector.shape_cast %4 : vector<8x8x64xf32> to vector<64x64xf32>
    %c0_10 = arith.constant 0 : index
    %c0_11 = arith.constant 0 : index
    %c0_12 = arith.constant 0 : index
    %c0_13 = arith.constant 0 : index
    %6 = vector.load %arg2[%c0_10, %c0_11, %c0_12, %c0_13] : memref<2x2x64x128xf32, #tpu.memory_space<vmem>>, vector<1x1x64x128xf32>
    %7 = vector.shape_cast %6 : vector<1x1x64x128xf32> to vector<64x128xf32>
    %cst = arith.constant dense<0.000000e+00> : vector<64x128xf32>
    %8 = tpu.matmul %5, %7, %cst {dimension_numbers = #tpu.dot_dimension_numbers<[1], [0], [0], [1], [0, 0, 1, 1], [], []>} : vector<64x64xf32>, vector<64x128xf32>, vector<64x128xf32> -> vector<64x128xf32>
    %c4 = arith.constant 4 : index
    %c0_14 = arith.constant 0 : index
    %c0_15 = arith.constant 0 : index
    %9 = vector.load %arg1[%c4, %c0_14, %c0_15] : memref<108x8x64xf32, #tpu.memory_space<vmem>>, vector<8x8x64xf32>
    %10 = vector.shape_cast %9 : vector<8x8x64xf32> to vector<64x64xf32>
    %c0_16 = arith.constant 0 : index
    %c1 = arith.constant 1 : index
    %c0_17 = arith.constant 0 : index
    %c0_18 = arith.constant 0 : index
    %11 = vector.load %arg2[%c0_16, %c1, %c0_17, %c0_18] : memref<2x2x64x128xf32, #tpu.memory_space<vmem>>, vector<1x1x64x128xf32>
    %12 = vector.shape_cast %11 : vector<1x1x64x128xf32> to vector<64x128xf32>
    %cst_19 = arith.constant dense<0.000000e+00> : vector<64x128xf32>
    %13 = tpu.matmul %10, %12, %cst_19 {dimension_numbers = #tpu.dot_dimension_numbers<[1], [0], [0], [1], [0, 0, 1, 1], [], []>} : vector<64x64xf32>, vector<64x128xf32>, vector<64x128xf32> -> vector<64x128xf32>
    %14 = arith.addf %8, %13 : vector<64x128xf32>
    %c12 = arith.constant 12 : index
    %c0_20 = arith.constant 0 : index
    %c0_21 = arith.constant 0 : index
    %15 = vector.load %arg1[%c12, %c0_20, %c0_21] : memref<108x8x64xf32, #tpu.memory_space<vmem>>, vector<8x8x64xf32>
    %16 = vector.shape_cast %15 : vector<8x8x64xf32> to vector<64x64xf32>
    %c1_22 = arith.constant 1 : index
    %c0_23 = arith.constant 0 : index
    %c0_24 = arith.constant 0 : index
    %c0_25 = arith.constant 0 : index
    %17 = vector.load %arg2[%c1_22, %c0_23, %c0_24, %c0_25] : memref<2x2x64x128xf32, #tpu.memory_space<vmem>>, vector<1x1x64x128xf32>
    %18 = vector.shape_cast %17 : vector<1x1x64x128xf32> to vector<64x128xf32>
    %cst_26 = arith.constant dense<0.000000e+00> : vector<64x128xf32>
    %19 = tpu.matmul %16, %18, %cst_26 {dimension_numbers = #tpu.dot_dimension_numbers<[1], [0], [0], [1], [0, 0, 1, 1], [], []>} : vector<64x64xf32>, vector<64x128xf32>, vector<64x128xf32> -> vector<64x128xf32>
    %20 = arith.addf %14, %19 : vector<64x128xf32>
    %c16 = arith.constant 16 : index
    %c0_27 = arith.constant 0 : index
    %c0_28 = arith.constant 0 : index
    %21 = vector.load %arg1[%c16, %c0_27, %c0_28] : memref<108x8x64xf32, #tpu.memory_space<vmem>>, vector<8x8x64xf32>
    %22 = vector.shape_cast %21 : vector<8x8x64xf32> to vector<64x64xf32>
    %c1_29 = arith.constant 1 : index
    %c1_30 = arith.constant 1 : index
    %c0_31 = arith.constant 0 : index
    %c0_32 = arith.constant 0 : index
    %23 = vector.load %arg2[%c1_29, %c1_30, %c0_31, %c0_32] : memref<2x2x64x128xf32, #tpu.memory_space<vmem>>, vector<1x1x64x128xf32>
    %24 = vector.shape_cast %23 : vector<1x1x64x128xf32> to vector<64x128xf32>
    %cst_33 = arith.constant dense<0.000000e+00> : vector<64x128xf32>
    %25 = tpu.matmul %22, %24, %cst_33 {dimension_numbers = #tpu.dot_dimension_numbers<[1], [0], [0], [1], [0, 0, 1, 1], [], []>} : vector<64x64xf32>, vector<64x128xf32>, vector<64x128xf32> -> vector<64x128xf32>
    %26 = arith.addf %20, %25 : vector<64x128xf32>
    %27 = vector.broadcast %0 : vector<1x128xf32> to vector<64x128xf32>
    %28 = arith.addf %26, %27 : vector<64x128xf32>
    %cst_34 = arith.constant 0.000000e+00 : f32
    %29 = vector.broadcast %cst_34 : f32 to vector<64x128xf32>
    %30 = arith.cmpf oge, %28, %29 : vector<64x128xf32>
    %cst_35 = arith.constant 0.00999999977 : f32
    %31 = vector.broadcast %cst_35 : f32 to vector<64x128xf32>
    %32 = arith.mulf %31, %28 : vector<64x128xf32>
    %33 = arith.select %30, %28, %32 : vector<64x128xi1>, vector<64x128xf32>
    %34 = vector.extract_strided_slice %33 {offsets = [0, 0], sizes = [32, 128], strides = [1, 1]} : vector<64x128xf32> to vector<32x128xf32>
    %35 = vector.shape_cast %34 : vector<32x128xf32> to vector<4x8x128xf32>
    %36 = vector.extract_strided_slice %33 {offsets = [32, 0], sizes = [32, 128], strides = [1, 1]} : vector<64x128xf32> to vector<32x128xf32>
    %37 = vector.shape_cast %36 : vector<32x128xf32> to vector<4x8x128xf32>
    %38 = vector.extract_strided_slice %35 {offsets = [0, 0, 0], sizes = [4, 8, 32], strides = [1, 1, 1]} : vector<4x8x128xf32> to vector<4x8x32xf32>
    %c0_36 = arith.constant 0 : index
    %c0_37 = arith.constant 0 : index
    %c0_38 = arith.constant 0 : index
    %39 = vector.load %arg11[%c0_36, %c0_37, %c0_38] : memref<16x8x128xf32, #tpu.memory_space<vmem>>, vector<4x8x32xf32>
    tpu.vector_store %arg11[%c0_36, %c0_37, %c0_38], %38 {strides = array<i32>} : memref<16x8x128xf32, #tpu.memory_space<vmem>>, vector<4x8x32xf32>,
    %40 = vector.extract_strided_slice %37 {offsets = [0, 0, 0], sizes = [4, 8, 32], strides = [1, 1, 1]} : vector<4x8x128xf32> to vector<4x8x32xf32>
    %c0_39 = arith.constant 0 : index
    %c0_40 = arith.constant 0 : index
    %c32 = arith.constant 32 : index
    %41 = vector.load %arg11[%c0_39, %c0_40, %c32] : memref<16x8x128xf32, #tpu.memory_space<vmem>>, vector<4x8x32xf32>
    tpu.vector_store %arg11[%c0_39, %c0_40, %c32], %40 {strides = array<i32>} : memref<16x8x128xf32, #tpu.memory_space<vmem>>, vector<4x8x32xf32>,
    %c12_41 = arith.constant 12 : index
    %c0_42 = arith.constant 0 : index
    %c0_43 = arith.constant 0 : index
    %42 = vector.load %arg1[%c12_41, %c0_42, %c0_43] : memref<108x8x64xf32, #tpu.memory_space<vmem>>, vector<8x8x64xf32>
    %43 = vector.shape_cast %42 : vector<8x8x64xf32> to vector<64x64xf32>
    %c0_44 = arith.constant 0 : index
    %c0_45 = arith.constant 0 : index
    %c0_46 = arith.constant 0 : index
    %c0_47 = arith.constant 0 : index
    %44 = vector.load %arg2[%c0_44, %c0_45, %c0_46, %c0_47] : memref<2x2x64x128xf32, #tpu.memory_space<vmem>>, vector<1x1x64x128xf32>
    %45 = vector.shape_cast %44 : vector<1x1x64x128xf32> to vector<64x128xf32>
    %cst_48 = arith.constant dense<0.000000e+00> : vector<64x128xf32>
    %46 = tpu.matmul %43, %45, %cst_48 {dimension_numbers = #tpu.dot_dimension_numbers<[1], [0], [0], [1], [0, 0, 1, 1], [], []>} : vector<64x64xf32>, vector<64x128xf32>, vector<64x128xf32> -> vector<64x128xf32>
    %c16_49 = arith.constant 16 : index
    %c0_50 = arith.constant 0 : index
    %c0_51 = arith.constant 0 : index
    %47 = vector.load %arg1[%c16_49, %c0_50, %c0_51] : memref<108x8x64xf32, #tpu.memory_space<vmem>>, vector<8x8x64xf32>
    %48 = vector.shape_cast %47 : vector<8x8x64xf32> to vector<64x64xf32>
    %c0_52 = arith.constant 0 : index
    %c1_53 = arith.constant 1 : index
    %c0_54 = arith.constant 0 : index
    %c0_55 = arith.constant 0 : index
    %49 = vector.load %arg2[%c0_52, %c1_53, %c0_54, %c0_55] : memref<2x2x64x128xf32, #tpu.memory_space<vmem>>, vector<1x1x64x128xf32>
    %50 = vector.shape_cast %49 : vector<1x1x64x128xf32> to vector<64x128xf32>
    %cst_56 = arith.constant dense<0.000000e+00> : vector<64x128xf32>
    %51 = tpu.matmul %48, %50, %cst_56 {dimension_numbers = #tpu.dot_dimension_numbers<[1], [0], [0], [1], [0, 0, 1, 1], [], []>} : vector<64x64xf32>, vector<64x128xf32>, vector<64x128xf32> -> vector<64x128xf32>
    %52 = arith.addf %46, %51 : vector<64x128xf32>
    %c24 = arith.constant 24 : index
    %c0_57 = arith.constant 0 : index
    %c0_58 = arith.constant 0 : index
    %53 = vector.load %arg1[%c24, %c0_57, %c0_58] : memref<108x8x64xf32, #tpu.memory_space<vmem>>, vector<8x8x64xf32>
    %54 = vector.shape_cast %53 : vector<8x8x64xf32> to vector<64x64xf32>
    %c1_59 = arith.constant 1 : index
    %c0_60 = arith.constant 0 : index
    %c0_61 = arith.constant 0 : index
    %c0_62 = arith.constant 0 : index
    %55 = vector.load %arg2[%c1_59, %c0_60, %c0_61, %c0_62] : memref<2x2x64x128xf32, #tpu.memory_space<vmem>>, vector<1x1x64x128xf32>
    %56 = vector.shape_cast %55 : vector<1x1x64x128xf32> to vector<64x128xf32>
    %cst_63 = arith.constant dense<0.000000e+00> : vector<64x128xf32>
    %57 = tpu.matmul %54, %56, %cst_63 {dimension_numbers = #tpu.dot_dimension_numbers<[1], [0], [0], [1], [0, 0, 1, 1], [], []>} : vector<64x64xf32>, vector<64x128xf32>, vector<64x128xf32> -> vector<64x128xf32>
    %58 = arith.addf %52, %57 : vector<64x128xf32>
    %c28 = arith.constant 28 : index
    %c0_64 = arith.constant 0 : index
    %c0_65 = arith.constant 0 : index
    %59 = vector.load %arg1[%c28, %c0_64, %c0_65] : memref<108x8x64xf32, #tpu.memory_space<vmem>>, vector<8x8x64xf32>
    %60 = vector.shape_cast %59 : vector<8x8x64xf32> to vector<64x64xf32>
    %c1_66 = arith.constant 1 : index
    %c1_67 = arith.constant 1 : index
    %c0_68 = arith.constant 0 : index
    %c0_69 = arith.constant 0 : index
    %61 = vector.load %arg2[%c1_66, %c1_67, %c0_68, %c0_69] : memref<2x2x64x128xf32, #tpu.memory_space<vmem>>, vector<1x1x64x128xf32>
    %62 = vector.shape_cast %61 : vector<1x1x64x128xf32> to vector<64x128xf32>
    %cst_70 = arith.constant dense<0.000000e+00> : vector<64x128xf32>
    %63 = tpu.matmul %60, %62, %cst_70 {dimension_numbers = #tpu.dot_dimension_numbers<[1], [0], [0], [1], [0, 0, 1, 1], [], []>} : vector<64x64xf32>, vector<64x128xf32>, vector<64x128xf32> -> vector<64x128xf32>
    %64 = arith.addf %58, %63 : vector<64x128xf32>
    %65 = vector.broadcast %0 : vector<1x128xf32> to vector<64x128xf32>
    %66 = arith.addf %64, %65 : vector<64x128xf32>
    %cst_71 = arith.constant 0.000000e+00 : f32
    %67 = vector.broadcast %cst_71 : f32 to vector<64x128xf32>
    %68 = arith.cmpf oge, %66, %67 : vector<64x128xf32>
    %cst_72 = arith.constant 0.00999999977 : f32
    %69 = vector.broadcast %cst_72 : f32 to vector<64x128xf32>
    %70 = arith.mulf %69, %66 : vector<64x128xf32>
    %71 = arith.select %68, %66, %70 : vector<64x128xi1>, vector<64x128xf32>
    %72 = vector.extract_strided_slice %71 {offsets = [0, 0], sizes = [32, 128], strides = [1, 1]} : vector<64x128xf32> to vector<32x128xf32>
    %73 = vector.shape_cast %72 : vector<32x128xf32> to vector<4x8x128xf32>
    %74 = vector.extract_strided_slice %71 {offsets = [32, 0], sizes = [32, 128], strides = [1, 1]} : vector<64x128xf32> to vector<32x128xf32>
    %75 = vector.shape_cast %74 : vector<32x128xf32> to vector<4x8x128xf32>
    %76 = vector.extract_strided_slice %73 {offsets = [0, 0, 0], sizes = [4, 8, 32], strides = [1, 1, 1]} : vector<4x8x128xf32> to vector<4x8x32xf32>
    %c0_73 = arith.constant 0 : index
    %c0_74 = arith.constant 0 : index
    %c64 = arith.constant 64 : index
    %77 = vector.load %arg11[%c0_73, %c0_74, %c64] : memref<16x8x128xf32, #tpu.memory_space<vmem>>, vector<4x8x32xf32>
    tpu.vector_store %arg11[%c0_73, %c0_74, %c64], %76 {strides = array<i32>} : memref<16x8x128xf32, #tpu.memory_space<vmem>>, vector<4x8x32xf32>,
    %78 = vector.extract_strided_slice %75 {offsets = [0, 0, 0], sizes = [4, 8, 32], strides = [1, 1, 1]} : vector<4x8x128xf32> to vector<4x8x32xf32>
    %c0_75 = arith.constant 0 : index
    %c0_76 = arith.constant 0 : index
    %c96 = arith.constant 96 : index
    %79 = vector.load %arg11[%c0_75, %c0_76, %c96] : memref<16x8x128xf32, #tpu.memory_space<vmem>>, vector<4x8x32xf32>
    tpu.vector_store %arg11[%c0_75, %c0_76, %c96], %78 {strides = array<i32>} : memref<16x8x128xf32, #tpu.memory_space<vmem>>, vector<4x8x32xf32>,
    %c24_77 = arith.constant 24 : index
    %c0_78 = arith.constant 0 : index
    %c0_79 = arith.constant 0 : index
    %80 = vector.load %arg1[%c24_77, %c0_78, %c0_79] : memref<108x8x64xf32, #tpu.memory_space<vmem>>, vector<8x8x64xf32>
    %81 = vector.shape_cast %80 : vector<8x8x64xf32> to vector<64x64xf32>
    %c0_80 = arith.constant 0 : index
    %c0_81 = arith.constant 0 : index
    %c0_82 = arith.constant 0 : index
    %c0_83 = arith.constant 0 : index
    %82 = vector.load %arg2[%c0_80, %c0_81, %c0_82, %c0_83] : memref<2x2x64x128xf32, #tpu.memory_space<vmem>>, vector<1x1x64x128xf32>
    %83 = vector.shape_cast %82 : vector<1x1x64x128xf32> to vector<64x128xf32>
    %cst_84 = arith.constant dense<0.000000e+00> : vector<64x128xf32>
    %84 = tpu.matmul %81, %83, %cst_84 {dimension_numbers = #tpu.dot_dimension_numbers<[1], [0], [0], [1], [0, 0, 1, 1], [], []>} : vector<64x64xf32>, vector<64x128xf32>, vector<64x128xf32> -> vector<64x128xf32>
    %c28_85 = arith.constant 28 : index
    %c0_86 = arith.constant 0 : index
    %c0_87 = arith.constant 0 : index
    %85 = vector.load %arg1[%c28_85, %c0_86, %c0_87] : memref<108x8x64xf32, #tpu.memory_space<vmem>>, vector<8x8x64xf32>
    %86 = vector.shape_cast %85 : vector<8x8x64xf32> to vector<64x64xf32>
    %c0_88 = arith.constant 0 : index
    %c1_89 = arith.constant 1 : index
    %c0_90 = arith.constant 0 : index
    %c0_91 = arith.constant 0 : index
    %87 = vector.load %arg2[%c0_88, %c1_89, %c0_90, %c0_91] : memref<2x2x64x128xf32, #tpu.memory_space<vmem>>, vector<1x1x64x128xf32>
    %88 = vector.shape_cast %87 : vector<1x1x64x128xf32> to vector<64x128xf32>
    %cst_92 = arith.constant dense<0.000000e+00> : vector<64x128xf32>
    %89 = tpu.matmul %86, %88, %cst_92 {dimension_numbers = #tpu.dot_dimension_numbers<[1], [0], [0], [1], [0, 0, 1, 1], [], []>} : vector<64x64xf32>, vector<64x128xf32>, vector<64x128xf32> -> vector<64x128xf32>
    %90 = arith.addf %84, %89 : vector<64x128xf32>
    %c36 = arith.constant 36 : index
    %c0_93 = arith.constant 0 : index
    %c0_94 = arith.constant 0 : index
    %91 = vector.load %arg1[%c36, %c0_93, %c0_94] : memref<108x8x64xf32, #tpu.memory_space<vmem>>, vector<8x8x64xf32>
    %92 = vector.shape_cast %91 : vector<8x8x64xf32> to vector<64x64xf32>
    %c1_95 = arith.constant 1 : index
    %c0_96 = arith.constant 0 : index
    %c0_97 = arith.constant 0 : index
    %c0_98 = arith.constant 0 : index
    %93 = vector.load %arg2[%c1_95, %c0_96, %c0_97, %c0_98] : memref<2x2x64x128xf32, #tpu.memory_space<vmem>>, vector<1x1x64x128xf32>
    %94 = vector.shape_cast %93 : vector<1x1x64x128xf32> to vector<64x128xf32>
    %cst_99 = arith.constant dense<0.000000e+00> : vector<64x128xf32>
    %95 = tpu.matmul %92, %94, %cst_99 {dimension_numbers = #tpu.dot_dimension_numbers<[1], [0], [0], [1], [0, 0, 1, 1], [], []>} : vector<64x64xf32>, vector<64x128xf32>, vector<64x128xf32> -> vector<64x128xf32>
    %96 = arith.addf %90, %95 : vector<64x128xf32>
    %c40 = arith.constant 40 : index
    %c0_100 = arith.constant 0 : index
    %c0_101 = arith.constant 0 : index
    %97 = vector.load %arg1[%c40, %c0_100, %c0_101] : memref<108x8x64xf32, #tpu.memory_space<vmem>>, vector<8x8x64xf32>
    %98 = vector.shape_cast %97 : vector<8x8x64xf32> to vector<64x64xf32>
    %c1_102 = arith.constant 1 : index
    %c1_103 = arith.constant 1 : index
    %c0_104 = arith.constant 0 : index
    %c0_105 = arith.constant 0 : index
    %99 = vector.load %arg2[%c1_102, %c1_103, %c0_104, %c0_105] : memref<2x2x64x128xf32, #tpu.memory_space<vmem>>, vector<1x1x64x128xf32>
    %100 = vector.shape_cast %99 : vector<1x1x64x128xf32> to vector<64x128xf32>
    %cst_106 = arith.constant dense<0.000000e+00> : vector<64x128xf32>
    %101 = tpu.matmul %98, %100, %cst_106 {dimension_numbers = #tpu.dot_dimension_numbers<[1], [0], [0], [1], [0, 0, 1, 1], [], []>} : vector<64x64xf32>, vector<64x128xf32>, vector<64x128xf32> -> vector<64x128xf32>
    %102 = arith.addf %96, %101 : vector<64x128xf32>
    %103 = vector.broadcast %0 : vector<1x128xf32> to vector<64x128xf32>
    %104 = arith.addf %102, %103 : vector<64x128xf32>
    %cst_107 = arith.constant 0.000000e+00 : f32
    %105 = vector.broadcast %cst_107 : f32 to vector<64x128xf32>
    %106 = arith.cmpf oge, %104, %105 : vector<64x128xf32>
    %cst_108 = arith.constant 0.00999999977 : f32
    %107 = vector.broadcast %cst_108 : f32 to vector<64x128xf32>
    %108 = arith.mulf %107, %104 : vector<64x128xf32>
    %109 = arith.select %106, %104, %108 : vector<64x128xi1>, vector<64x128xf32>
    %110 = vector.extract_strided_slice %109 {offsets = [0, 0], sizes = [32, 128], strides = [1, 1]} : vector<64x128xf32> to vector<32x128xf32>
    %111 = vector.shape_cast %110 : vector<32x128xf32> to vector<4x8x128xf32>
    %112 = vector.extract_strided_slice %109 {offsets = [32, 0], sizes = [32, 128], strides = [1, 1]} : vector<64x128xf32> to vector<32x128xf32>
    %113 = vector.shape_cast %112 : vector<32x128xf32> to vector<4x8x128xf32>
    %114 = vector.extract_strided_slice %111 {offsets = [0, 0, 0], sizes = [4, 8, 32], strides = [1, 1, 1]} : vector<4x8x128xf32> to vector<4x8x32xf32>
    %c4_109 = arith.constant 4 : index
    %c0_110 = arith.constant 0 : index
    %c0_111 = arith.constant 0 : index
    %115 = vector.load %arg11[%c4_109, %c0_110, %c0_111] : memref<16x8x128xf32, #tpu.memory_space<vmem>>, vector<4x8x32xf32>
    tpu.vector_store %arg11[%c4_109, %c0_110, %c0_111], %114 {strides = array<i32>} : memref<16x8x128xf32, #tpu.memory_space<vmem>>, vector<4x8x32xf32>,
    %116 = vector.extract_strided_slice %113 {offsets = [0, 0, 0], sizes = [4, 8, 32], strides = [1, 1, 1]} : vector<4x8x128xf32> to vector<4x8x32xf32>
    %c4_112 = arith.constant 4 : index
    %c0_113 = arith.constant 0 : index
    %c32_114 = arith.constant 32 : index
    %117 = vector.load %arg11[%c4_112, %c0_113, %c32_114] : memref<16x8x128xf32, #tpu.memory_space<vmem>>, vector<4x8x32xf32>
    tpu.vector_store %arg11[%c4_112, %c0_113, %c32_114], %116 {strides = array<i32>} : memref<16x8x128xf32, #tpu.memory_space<vmem>>, vector<4x8x32xf32>,
    %c36_115 = arith.constant 36 : index
    %c0_116 = arith.constant 0 : index
    %c0_117 = arith.constant 0 : index
    %118 = vector.load %arg1[%c36_115, %c0_116, %c0_117] : memref<108x8x64xf32, #tpu.memory_space<vmem>>, vector<8x8x64xf32>
    %119 = vector.shape_cast %118 : vector<8x8x64xf32> to vector<64x64xf32>
    %c0_118 = arith.constant 0 : index
    %c0_119 = arith.constant 0 : index
    %c0_120 = arith.constant 0 : index
    %c0_121 = arith.constant 0 : index
    %120 = vector.load %arg2[%c0_118, %c0_119, %c0_120, %c0_121] : memref<2x2x64x128xf32, #tpu.memory_space<vmem>>, vector<1x1x64x128xf32>
    %121 = vector.shape_cast %120 : vector<1x1x64x128xf32> to vector<64x128xf32>
    %cst_122 = arith.constant dense<0.000000e+00> : vector<64x128xf32>
    %122 = tpu.matmul %119, %121, %cst_122 {dimension_numbers = #tpu.dot_dimension_numbers<[1], [0], [0], [1], [0, 0, 1, 1], [], []>} : vector<64x64xf32>, vector<64x128xf32>, vector<64x128xf32> -> vector<64x128xf32>
    %c40_123 = arith.constant 40 : index
    %c0_124 = arith.constant 0 : index
    %c0_125 = arith.constant 0 : index
    %123 = vector.load %arg1[%c40_123, %c0_124, %c0_125] : memref<108x8x64xf32, #tpu.memory_space<vmem>>, vector<8x8x64xf32>
    %124 = vector.shape_cast %123 : vector<8x8x64xf32> to vector<64x64xf32>
    %c0_126 = arith.constant 0 : index
    %c1_127 = arith.constant 1 : index
    %c0_128 = arith.constant 0 : index
    %c0_129 = arith.constant 0 : index
    %125 = vector.load %arg2[%c0_126, %c1_127, %c0_128, %c0_129] : memref<2x2x64x128xf32, #tpu.memory_space<vmem>>, vector<1x1x64x128xf32>
    %126 = vector.shape_cast %125 : vector<1x1x64x128xf32> to vector<64x128xf32>
    %cst_130 = arith.constant dense<0.000000e+00> : vector<64x128xf32>
    %127 = tpu.matmul %124, %126, %cst_130 {dimension_numbers = #tpu.dot_dimension_numbers<[1], [0], [0], [1], [0, 0, 1, 1], [], []>} : vector<64x64xf32>, vector<64x128xf32>, vector<64x128xf32> -> vector<64x128xf32>
    %128 = arith.addf %122, %127 : vector<64x128xf32>
    %c48 = arith.constant 48 : index
    %c0_131 = arith.constant 0 : index
    %c0_132 = arith.constant 0 : index
    %129 = vector.load %arg1[%c48, %c0_131, %c0_132] : memref<108x8x64xf32, #tpu.memory_space<vmem>>, vector<8x8x64xf32>
    %130 = vector.shape_cast %129 : vector<8x8x64xf32> to vector<64x64xf32>
    %c1_133 = arith.constant 1 : index
    %c0_134 = arith.constant 0 : index
    %c0_135 = arith.constant 0 : index
    %c0_136 = arith.constant 0 : index
    %131 = vector.load %arg2[%c1_133, %c0_134, %c0_135, %c0_136] : memref<2x2x64x128xf32, #tpu.memory_space<vmem>>, vector<1x1x64x128xf32>
    %132 = vector.shape_cast %131 : vector<1x1x64x128xf32> to vector<64x128xf32>
    %cst_137 = arith.constant dense<0.000000e+00> : vector<64x128xf32>
    %133 = tpu.matmul %130, %132, %cst_137 {dimension_numbers = #tpu.dot_dimension_numbers<[1], [0], [0], [1], [0, 0, 1, 1], [], []>} : vector<64x64xf32>, vector<64x128xf32>, vector<64x128xf32> -> vector<64x128xf32>
    %134 = arith.addf %128, %133 : vector<64x128xf32>
    %c52 = arith.constant 52 : index
    %c0_138 = arith.constant 0 : index
    %c0_139 = arith.constant 0 : index
    %135 = vector.load %arg1[%c52, %c0_138, %c0_139] : memref<108x8x64xf32, #tpu.memory_space<vmem>>, vector<8x8x64xf32>
    %136 = vector.shape_cast %135 : vector<8x8x64xf32> to vector<64x64xf32>
    %c1_140 = arith.constant 1 : index
    %c1_141 = arith.constant 1 : index
    %c0_142 = arith.constant 0 : index
    %c0_143 = arith.constant 0 : index
    %137 = vector.load %arg2[%c1_140, %c1_141, %c0_142, %c0_143] : memref<2x2x64x128xf32, #tpu.memory_space<vmem>>, vector<1x1x64x128xf32>
    %138 = vector.shape_cast %137 : vector<1x1x64x128xf32> to vector<64x128xf32>
    %cst_144 = arith.constant dense<0.000000e+00> : vector<64x128xf32>
    %139 = tpu.matmul %136, %138, %cst_144 {dimension_numbers = #tpu.dot_dimension_numbers<[1], [0], [0], [1], [0, 0, 1, 1], [], []>} : vector<64x64xf32>, vector<64x128xf32>, vector<64x128xf32> -> vector<64x128xf32>
    %140 = arith.addf %134, %139 : vector<64x128xf32>
    %141 = vector.broadcast %0 : vector<1x128xf32> to vector<64x128xf32>
    %142 = arith.addf %140, %141 : vector<64x128xf32>
    %cst_145 = arith.constant 0.000000e+00 : f32
    %143 = vector.broadcast %cst_145 : f32 to vector<64x128xf32>
    %144 = arith.cmpf oge, %142, %143 : vector<64x128xf32>
    %cst_146 = arith.constant 0.00999999977 : f32
    %145 = vector.broadcast %cst_146 : f32 to vector<64x128xf32>
    %146 = arith.mulf %145, %142 : vector<64x128xf32>
    %147 = arith.select %144, %142, %146 : vector<64x128xi1>, vector<64x128xf32>
    %148 = vector.extract_strided_slice %147 {offsets = [0, 0], sizes = [32, 128], strides = [1, 1]} : vector<64x128xf32> to vector<32x128xf32>
    %149 = vector.shape_cast %148 : vector<32x128xf32> to vector<4x8x128xf32>
    %150 = vector.extract_strided_slice %147 {offsets = [32, 0], sizes = [32, 128], strides = [1, 1]} : vector<64x128xf32> to vector<32x128xf32>
    %151 = vector.shape_cast %150 : vector<32x128xf32> to vector<4x8x128xf32>
    %152 = vector.extract_strided_slice %149 {offsets = [0, 0, 0], sizes = [4, 8, 32], strides = [1, 1, 1]} : vector<4x8x128xf32> to vector<4x8x32xf32>
    %c4_147 = arith.constant 4 : index
    %c0_148 = arith.constant 0 : index
    %c64_149 = arith.constant 64 : index
    %153 = vector.load %arg11[%c4_147, %c0_148, %c64_149] : memref<16x8x128xf32, #tpu.memory_space<vmem>>, vector<4x8x32xf32>
    tpu.vector_store %arg11[%c4_147, %c0_148, %c64_149], %152 {strides = array<i32>} : memref<16x8x128xf32, #tpu.memory_space<vmem>>, vector<4x8x32xf32>,
    %154 = vector.extract_strided_slice %151 {offsets = [0, 0, 0], sizes = [4, 8, 32], strides = [1, 1, 1]} : vector<4x8x128xf32> to vector<4x8x32xf32>
    %c4_150 = arith.constant 4 : index
    %c0_151 = arith.constant 0 : index
    %c96_152 = arith.constant 96 : index
    %155 = vector.load %arg11[%c4_150, %c0_151, %c96_152] : memref<16x8x128xf32, #tpu.memory_space<vmem>>, vector<4x8x32xf32>
    tpu.vector_store %arg11[%c4_150, %c0_151, %c96_152], %154 {strides = array<i32>} : memref<16x8x128xf32, #tpu.memory_space<vmem>>, vector<4x8x32xf32>,
    %c48_153 = arith.constant 48 : index
    %c0_154 = arith.constant 0 : index
    %c0_155 = arith.constant 0 : index
    %156 = vector.load %arg1[%c48_153, %c0_154, %c0_155] : memref<108x8x64xf32, #tpu.memory_space<vmem>>, vector<8x8x64xf32>
    %157 = vector.shape_cast %156 : vector<8x8x64xf32> to vector<64x64xf32>
    %c0_156 = arith.constant 0 : index
    %c0_157 = arith.constant 0 : index
    %c0_158 = arith.constant 0 : index
    %c0_159 = arith.constant 0 : index
    %158 = vector.load %arg2[%c0_156, %c0_157, %c0_158, %c0_159] : memref<2x2x64x128xf32, #tpu.memory_space<vmem>>, vector<1x1x64x128xf32>
    %159 = vector.shape_cast %158 : vector<1x1x64x128xf32> to vector<64x128xf32>
    %cst_160 = arith.constant dense<0.000000e+00> : vector<64x128xf32>
    %160 = tpu.matmul %157, %159, %cst_160 {dimension_numbers = #tpu.dot_dimension_numbers<[1], [0], [0], [1], [0, 0, 1, 1], [], []>} : vector<64x64xf32>, vector<64x128xf32>, vector<64x128xf32> -> vector<64x128xf32>
    %c52_161 = arith.constant 52 : index
    %c0_162 = arith.constant 0 : index
    %c0_163 = arith.constant 0 : index
    %161 = vector.load %arg1[%c52_161, %c0_162, %c0_163] : memref<108x8x64xf32, #tpu.memory_space<vmem>>, vector<8x8x64xf32>
    %162 = vector.shape_cast %161 : vector<8x8x64xf32> to vector<64x64xf32>
    %c0_164 = arith.constant 0 : index
    %c1_165 = arith.constant 1 : index
    %c0_166 = arith.constant 0 : index
    %c0_167 = arith.constant 0 : index
    %163 = vector.load %arg2[%c0_164, %c1_165, %c0_166, %c0_167] : memref<2x2x64x128xf32, #tpu.memory_space<vmem>>, vector<1x1x64x128xf32>
    %164 = vector.shape_cast %163 : vector<1x1x64x128xf32> to vector<64x128xf32>
    %cst_168 = arith.constant dense<0.000000e+00> : vector<64x128xf32>
    %165 = tpu.matmul %162, %164, %cst_168 {dimension_numbers = #tpu.dot_dimension_numbers<[1], [0], [0], [1], [0, 0, 1, 1], [], []>} : vector<64x64xf32>, vector<64x128xf32>, vector<64x128xf32> -> vector<64x128xf32>
    %166 = arith.addf %160, %165 : vector<64x128xf32>
    %c60 = arith.constant 60 : index
    %c0_169 = arith.constant 0 : index
    %c0_170 = arith.constant 0 : index
    %167 = vector.load %arg1[%c60, %c0_169, %c0_170] : memref<108x8x64xf32, #tpu.memory_space<vmem>>, vector<8x8x64xf32>
    %168 = vector.shape_cast %167 : vector<8x8x64xf32> to vector<64x64xf32>
    %c1_171 = arith.constant 1 : index
    %c0_172 = arith.constant 0 : index
    %c0_173 = arith.constant 0 : index
    %c0_174 = arith.constant 0 : index
    %169 = vector.load %arg2[%c1_171, %c0_172, %c0_173, %c0_174] : memref<2x2x64x128xf32, #tpu.memory_space<vmem>>, vector<1x1x64x128xf32>
    %170 = vector.shape_cast %169 : vector<1x1x64x128xf32> to vector<64x128xf32>
    %cst_175 = arith.constant dense<0.000000e+00> : vector<64x128xf32>
    %171 = tpu.matmul %168, %170, %cst_175 {dimension_numbers = #tpu.dot_dimension_numbers<[1], [0], [0], [1], [0, 0, 1, 1], [], []>} : vector<64x64xf32>, vector<64x128xf32>, vector<64x128xf32> -> vector<64x128xf32>
    %172 = arith.addf %166, %171 : vector<64x128xf32>
    %c64_176 = arith.constant 64 : index
    %c0_177 = arith.constant 0 : index
    %c0_178 = arith.constant 0 : index
    %173 = vector.load %arg1[%c64_176, %c0_177, %c0_178] : memref<108x8x64xf32, #tpu.memory_space<vmem>>, vector<8x8x64xf32>
    %174 = vector.shape_cast %173 : vector<8x8x64xf32> to vector<64x64xf32>
    %c1_179 = arith.constant 1 : index
    %c1_180 = arith.constant 1 : index
    %c0_181 = arith.constant 0 : index
    %c0_182 = arith.constant 0 : index
    %175 = vector.load %arg2[%c1_179, %c1_180, %c0_181, %c0_182] : memref<2x2x64x128xf32, #tpu.memory_space<vmem>>, vector<1x1x64x128xf32>
    %176 = vector.shape_cast %175 : vector<1x1x64x128xf32> to vector<64x128xf32>
    %cst_183 = arith.constant dense<0.000000e+00> : vector<64x128xf32>
    %177 = tpu.matmul %174, %176, %cst_183 {dimension_numbers = #tpu.dot_dimension_numbers<[1], [0], [0], [1], [0, 0, 1, 1], [], []>} : vector<64x64xf32>, vector<64x128xf32>, vector<64x128xf32> -> vector<64x128xf32>
    %178 = arith.addf %172, %177 : vector<64x128xf32>
    %179 = vector.broadcast %0 : vector<1x128xf32> to vector<64x128xf32>
    %180 = arith.addf %178, %179 : vector<64x128xf32>
    %cst_184 = arith.constant 0.000000e+00 : f32
    %181 = vector.broadcast %cst_184 : f32 to vector<64x128xf32>
    %182 = arith.cmpf oge, %180, %181 : vector<64x128xf32>
    %cst_185 = arith.constant 0.00999999977 : f32
    %183 = vector.broadcast %cst_185 : f32 to vector<64x128xf32>
    %184 = arith.mulf %183, %180 : vector<64x128xf32>
    %185 = arith.select %182, %180, %184 : vector<64x128xi1>, vector<64x128xf32>
    %186 = vector.extract_strided_slice %185 {offsets = [0, 0], sizes = [32, 128], strides = [1, 1]} : vector<64x128xf32> to vector<32x128xf32>
    %187 = vector.shape_cast %186 : vector<32x128xf32> to vector<4x8x128xf32>
    %188 = vector.extract_strided_slice %185 {offsets = [32, 0], sizes = [32, 128], strides = [1, 1]} : vector<64x128xf32> to vector<32x128xf32>
    %189 = vector.shape_cast %188 : vector<32x128xf32> to vector<4x8x128xf32>
    %190 = vector.extract_strided_slice %187 {offsets = [0, 0, 0], sizes = [4, 8, 32], strides = [1, 1, 1]} : vector<4x8x128xf32> to vector<4x8x32xf32>
    %c8 = arith.constant 8 : index
    %c0_186 = arith.constant 0 : index
    %c0_187 = arith.constant 0 : index
    %191 = vector.load %arg11[%c8, %c0_186, %c0_187] : memref<16x8x128xf32, #tpu.memory_space<vmem>>, vector<4x8x32xf32>
    tpu.vector_store %arg11[%c8, %c0_186, %c0_187], %190 {strides = array<i32>} : memref<16x8x128xf32, #tpu.memory_space<vmem>>, vector<4x8x32xf32>,
    %192 = vector.extract_strided_slice %189 {offsets = [0, 0, 0], sizes = [4, 8, 32], strides = [1, 1, 1]} : vector<4x8x128xf32> to vector<4x8x32xf32>
    %c8_188 = arith.constant 8 : index
    %c0_189 = arith.constant 0 : index
    %c32_190 = arith.constant 32 : index
    %193 = vector.load %arg11[%c8_188, %c0_189, %c32_190] : memref<16x8x128xf32, #tpu.memory_space<vmem>>, vector<4x8x32xf32>
    tpu.vector_store %arg11[%c8_188, %c0_189, %c32_190], %192 {strides = array<i32>} : memref<16x8x128xf32, #tpu.memory_space<vmem>>, vector<4x8x32xf32>,
    %c60_191 = arith.constant 60 : index
    %c0_192 = arith.constant 0 : index
    %c0_193 = arith.constant 0 : index
    %194 = vector.load %arg1[%c60_191, %c0_192, %c0_193] : memref<108x8x64xf32, #tpu.memory_space<vmem>>, vector<8x8x64xf32>
    %195 = vector.shape_cast %194 : vector<8x8x64xf32> to vector<64x64xf32>
    %c0_194 = arith.constant 0 : index
    %c0_195 = arith.constant 0 : index
    %c0_196 = arith.constant 0 : index
    %c0_197 = arith.constant 0 : index
    %196 = vector.load %arg2[%c0_194, %c0_195, %c0_196, %c0_197] : memref<2x2x64x128xf32, #tpu.memory_space<vmem>>, vector<1x1x64x128xf32>
    %197 = vector.shape_cast %196 : vector<1x1x64x128xf32> to vector<64x128xf32>
    %cst_198 = arith.constant dense<0.000000e+00> : vector<64x128xf32>
    %198 = tpu.matmul %195, %197, %cst_198 {dimension_numbers = #tpu.dot_dimension_numbers<[1], [0], [0], [1], [0, 0, 1, 1], [], []>} : vector<64x64xf32>, vector<64x128xf32>, vector<64x128xf32> -> vector<64x128xf32>
    %c64_199 = arith.constant 64 : index
    %c0_200 = arith.constant 0 : index
    %c0_201 = arith.constant 0 : index
    %199 = vector.load %arg1[%c64_199, %c0_200, %c0_201] : memref<108x8x64xf32, #tpu.memory_space<vmem>>, vector<8x8x64xf32>
    %200 = vector.shape_cast %199 : vector<8x8x64xf32> to vector<64x64xf32>
    %c0_202 = arith.constant 0 : index
    %c1_203 = arith.constant 1 : index
    %c0_204 = arith.constant 0 : index
    %c0_205 = arith.constant 0 : index
    %201 = vector.load %arg2[%c0_202, %c1_203, %c0_204, %c0_205] : memref<2x2x64x128xf32, #tpu.memory_space<vmem>>, vector<1x1x64x128xf32>
    %202 = vector.shape_cast %201 : vector<1x1x64x128xf32> to vector<64x128xf32>
    %cst_206 = arith.constant dense<0.000000e+00> : vector<64x128xf32>
    %203 = tpu.matmul %200, %202, %cst_206 {dimension_numbers = #tpu.dot_dimension_numbers<[1], [0], [0], [1], [0, 0, 1, 1], [], []>} : vector<64x64xf32>, vector<64x128xf32>, vector<64x128xf32> -> vector<64x128xf32>
    %204 = arith.addf %198, %203 : vector<64x128xf32>
    %c72 = arith.constant 72 : index
    %c0_207 = arith.constant 0 : index
    %c0_208 = arith.constant 0 : index
    %205 = vector.load %arg1[%c72, %c0_207, %c0_208] : memref<108x8x64xf32, #tpu.memory_space<vmem>>, vector<8x8x64xf32>
    %206 = vector.shape_cast %205 : vector<8x8x64xf32> to vector<64x64xf32>
    %c1_209 = arith.constant 1 : index
    %c0_210 = arith.constant 0 : index
    %c0_211 = arith.constant 0 : index
    %c0_212 = arith.constant 0 : index
    %207 = vector.load %arg2[%c1_209, %c0_210, %c0_211, %c0_212] : memref<2x2x64x128xf32, #tpu.memory_space<vmem>>, vector<1x1x64x128xf32>
    %208 = vector.shape_cast %207 : vector<1x1x64x128xf32> to vector<64x128xf32>
    %cst_213 = arith.constant dense<0.000000e+00> : vector<64x128xf32>
    %209 = tpu.matmul %206, %208, %cst_213 {dimension_numbers = #tpu.dot_dimension_numbers<[1], [0], [0], [1], [0, 0, 1, 1], [], []>} : vector<64x64xf32>, vector<64x128xf32>, vector<64x128xf32> -> vector<64x128xf32>
    %210 = arith.addf %204, %209 : vector<64x128xf32>
    %c76 = arith.constant 76 : index
    %c0_214 = arith.constant 0 : index
    %c0_215 = arith.constant 0 : index
    %211 = vector.load %arg1[%c76, %c0_214, %c0_215] : memref<108x8x64xf32, #tpu.memory_space<vmem>>, vector<8x8x64xf32>
    %212 = vector.shape_cast %211 : vector<8x8x64xf32> to vector<64x64xf32>
    %c1_216 = arith.constant 1 : index
    %c1_217 = arith.constant 1 : index
    %c0_218 = arith.constant 0 : index
    %c0_219 = arith.constant 0 : index
    %213 = vector.load %arg2[%c1_216, %c1_217, %c0_218, %c0_219] : memref<2x2x64x128xf32, #tpu.memory_space<vmem>>, vector<1x1x64x128xf32>
    %214 = vector.shape_cast %213 : vector<1x1x64x128xf32> to vector<64x128xf32>
    %cst_220 = arith.constant dense<0.000000e+00> : vector<64x128xf32>
    %215 = tpu.matmul %212, %214, %cst_220 {dimension_numbers = #tpu.dot_dimension_numbers<[1], [0], [0], [1], [0, 0, 1, 1], [], []>} : vector<64x64xf32>, vector<64x128xf32>, vector<64x128xf32> -> vector<64x128xf32>
    %216 = arith.addf %210, %215 : vector<64x128xf32>
    %217 = vector.broadcast %0 : vector<1x128xf32> to vector<64x128xf32>
    %218 = arith.addf %216, %217 : vector<64x128xf32>
    %cst_221 = arith.constant 0.000000e+00 : f32
    %219 = vector.broadcast %cst_221 : f32 to vector<64x128xf32>
    %220 = arith.cmpf oge, %218, %219 : vector<64x128xf32>
    %cst_222 = arith.constant 0.00999999977 : f32
    %221 = vector.broadcast %cst_222 : f32 to vector<64x128xf32>
    %222 = arith.mulf %221, %218 : vector<64x128xf32>
    %223 = arith.select %220, %218, %222 : vector<64x128xi1>, vector<64x128xf32>
    %224 = vector.extract_strided_slice %223 {offsets = [0, 0], sizes = [32, 128], strides = [1, 1]} : vector<64x128xf32> to vector<32x128xf32>
    %225 = vector.shape_cast %224 : vector<32x128xf32> to vector<4x8x128xf32>
    %226 = vector.extract_strided_slice %223 {offsets = [32, 0], sizes = [32, 128], strides = [1, 1]} : vector<64x128xf32> to vector<32x128xf32>
    %227 = vector.shape_cast %226 : vector<32x128xf32> to vector<4x8x128xf32>
    %228 = vector.extract_strided_slice %225 {offsets = [0, 0, 0], sizes = [4, 8, 32], strides = [1, 1, 1]} : vector<4x8x128xf32> to vector<4x8x32xf32>
    %c8_223 = arith.constant 8 : index
    %c0_224 = arith.constant 0 : index
    %c64_225 = arith.constant 64 : index
    %229 = vector.load %arg11[%c8_223, %c0_224, %c64_225] : memref<16x8x128xf32, #tpu.memory_space<vmem>>, vector<4x8x32xf32>
    tpu.vector_store %arg11[%c8_223, %c0_224, %c64_225], %228 {strides = array<i32>} : memref<16x8x128xf32, #tpu.memory_space<vmem>>, vector<4x8x32xf32>,
    %230 = vector.extract_strided_slice %227 {offsets = [0, 0, 0], sizes = [4, 8, 32], strides = [1, 1, 1]} : vector<4x8x128xf32> to vector<4x8x32xf32>
    %c8_226 = arith.constant 8 : index
    %c0_227 = arith.constant 0 : index
    %c96_228 = arith.constant 96 : index
    %231 = vector.load %arg11[%c8_226, %c0_227, %c96_228] : memref<16x8x128xf32, #tpu.memory_space<vmem>>, vector<4x8x32xf32>
    tpu.vector_store %arg11[%c8_226, %c0_227, %c96_228], %230 {strides = array<i32>} : memref<16x8x128xf32, #tpu.memory_space<vmem>>, vector<4x8x32xf32>,
    %c72_229 = arith.constant 72 : index
    %c0_230 = arith.constant 0 : index
    %c0_231 = arith.constant 0 : index
    %232 = vector.load %arg1[%c72_229, %c0_230, %c0_231] : memref<108x8x64xf32, #tpu.memory_space<vmem>>, vector<8x8x64xf32>
    %233 = vector.shape_cast %232 : vector<8x8x64xf32> to vector<64x64xf32>
    %c0_232 = arith.constant 0 : index
    %c0_233 = arith.constant 0 : index
    %c0_234 = arith.constant 0 : index
    %c0_235 = arith.constant 0 : index
    %234 = vector.load %arg2[%c0_232, %c0_233, %c0_234, %c0_235] : memref<2x2x64x128xf32, #tpu.memory_space<vmem>>, vector<1x1x64x128xf32>
    %235 = vector.shape_cast %234 : vector<1x1x64x128xf32> to vector<64x128xf32>
    %cst_236 = arith.constant dense<0.000000e+00> : vector<64x128xf32>
    %236 = tpu.matmul %233, %235, %cst_236 {dimension_numbers = #tpu.dot_dimension_numbers<[1], [0], [0], [1], [0, 0, 1, 1], [], []>} : vector<64x64xf32>, vector<64x128xf32>, vector<64x128xf32> -> vector<64x128xf32>
    %c76_237 = arith.constant 76 : index
    %c0_238 = arith.constant 0 : index
    %c0_239 = arith.constant 0 : index
    %237 = vector.load %arg1[%c76_237, %c0_238, %c0_239] : memref<108x8x64xf32, #tpu.memory_space<vmem>>, vector<8x8x64xf32>
    %238 = vector.shape_cast %237 : vector<8x8x64xf32> to vector<64x64xf32>
    %c0_240 = arith.constant 0 : index
    %c1_241 = arith.constant 1 : index
    %c0_242 = arith.constant 0 : index
    %c0_243 = arith.constant 0 : index
    %239 = vector.load %arg2[%c0_240, %c1_241, %c0_242, %c0_243] : memref<2x2x64x128xf32, #tpu.memory_space<vmem>>, vector<1x1x64x128xf32>
    %240 = vector.shape_cast %239 : vector<1x1x64x128xf32> to vector<64x128xf32>
    %cst_244 = arith.constant dense<0.000000e+00> : vector<64x128xf32>
    %241 = tpu.matmul %238, %240, %cst_244 {dimension_numbers = #tpu.dot_dimension_numbers<[1], [0], [0], [1], [0, 0, 1, 1], [], []>} : vector<64x64xf32>, vector<64x128xf32>, vector<64x128xf32> -> vector<64x128xf32>
    %242 = arith.addf %236, %241 : vector<64x128xf32>
    %c84 = arith.constant 84 : index
    %c0_245 = arith.constant 0 : index
    %c0_246 = arith.constant 0 : index
    %243 = vector.load %arg1[%c84, %c0_245, %c0_246] : memref<108x8x64xf32, #tpu.memory_space<vmem>>, vector<8x8x64xf32>
    %244 = vector.shape_cast %243 : vector<8x8x64xf32> to vector<64x64xf32>
    %c1_247 = arith.constant 1 : index
    %c0_248 = arith.constant 0 : index
    %c0_249 = arith.constant 0 : index
    %c0_250 = arith.constant 0 : index
    %245 = vector.load %arg2[%c1_247, %c0_248, %c0_249, %c0_250] : memref<2x2x64x128xf32, #tpu.memory_space<vmem>>, vector<1x1x64x128xf32>
    %246 = vector.shape_cast %245 : vector<1x1x64x128xf32> to vector<64x128xf32>
    %cst_251 = arith.constant dense<0.000000e+00> : vector<64x128xf32>
    %247 = tpu.matmul %244, %246, %cst_251 {dimension_numbers = #tpu.dot_dimension_numbers<[1], [0], [0], [1], [0, 0, 1, 1], [], []>} : vector<64x64xf32>, vector<64x128xf32>, vector<64x128xf32> -> vector<64x128xf32>
    %248 = arith.addf %242, %247 : vector<64x128xf32>
    %c88 = arith.constant 88 : index
    %c0_252 = arith.constant 0 : index
    %c0_253 = arith.constant 0 : index
    %249 = vector.load %arg1[%c88, %c0_252, %c0_253] : memref<108x8x64xf32, #tpu.memory_space<vmem>>, vector<8x8x64xf32>
    %250 = vector.shape_cast %249 : vector<8x8x64xf32> to vector<64x64xf32>
    %c1_254 = arith.constant 1 : index
    %c1_255 = arith.constant 1 : index
    %c0_256 = arith.constant 0 : index
    %c0_257 = arith.constant 0 : index
    %251 = vector.load %arg2[%c1_254, %c1_255, %c0_256, %c0_257] : memref<2x2x64x128xf32, #tpu.memory_space<vmem>>, vector<1x1x64x128xf32>
    %252 = vector.shape_cast %251 : vector<1x1x64x128xf32> to vector<64x128xf32>
    %cst_258 = arith.constant dense<0.000000e+00> : vector<64x128xf32>
    %253 = tpu.matmul %250, %252, %cst_258 {dimension_numbers = #tpu.dot_dimension_numbers<[1], [0], [0], [1], [0, 0, 1, 1], [], []>} : vector<64x64xf32>, vector<64x128xf32>, vector<64x128xf32> -> vector<64x128xf32>
    %254 = arith.addf %248, %253 : vector<64x128xf32>
    %255 = vector.broadcast %0 : vector<1x128xf32> to vector<64x128xf32>
    %256 = arith.addf %254, %255 : vector<64x128xf32>
    %cst_259 = arith.constant 0.000000e+00 : f32
    %257 = vector.broadcast %cst_259 : f32 to vector<64x128xf32>
    %258 = arith.cmpf oge, %256, %257 : vector<64x128xf32>
    %cst_260 = arith.constant 0.00999999977 : f32
    %259 = vector.broadcast %cst_260 : f32 to vector<64x128xf32>
    %260 = arith.mulf %259, %256 : vector<64x128xf32>
    %261 = arith.select %258, %256, %260 : vector<64x128xi1>, vector<64x128xf32>
    %262 = vector.extract_strided_slice %261 {offsets = [0, 0], sizes = [32, 128], strides = [1, 1]} : vector<64x128xf32> to vector<32x128xf32>
    %263 = vector.shape_cast %262 : vector<32x128xf32> to vector<4x8x128xf32>
    %264 = vector.extract_strided_slice %261 {offsets = [32, 0], sizes = [32, 128], strides = [1, 1]} : vector<64x128xf32> to vector<32x128xf32>
    %265 = vector.shape_cast %264 : vector<32x128xf32> to vector<4x8x128xf32>
    %266 = vector.extract_strided_slice %263 {offsets = [0, 0, 0], sizes = [4, 8, 32], strides = [1, 1, 1]} : vector<4x8x128xf32> to vector<4x8x32xf32>
    %c12_261 = arith.constant 12 : index
    %c0_262 = arith.constant 0 : index
    %c0_263 = arith.constant 0 : index
    %267 = vector.load %arg11[%c12_261, %c0_262, %c0_263] : memref<16x8x128xf32, #tpu.memory_space<vmem>>, vector<4x8x32xf32>
    tpu.vector_store %arg11[%c12_261, %c0_262, %c0_263], %266 {strides = array<i32>} : memref<16x8x128xf32, #tpu.memory_space<vmem>>, vector<4x8x32xf32>,
    %268 = vector.extract_strided_slice %265 {offsets = [0, 0, 0], sizes = [4, 8, 32], strides = [1, 1, 1]} : vector<4x8x128xf32> to vector<4x8x32xf32>
    %c12_264 = arith.constant 12 : index
    %c0_265 = arith.constant 0 : index
    %c32_266 = arith.constant 32 : index
    %269 = vector.load %arg11[%c12_264, %c0_265, %c32_266] : memref<16x8x128xf32, #tpu.memory_space<vmem>>, vector<4x8x32xf32>
    tpu.vector_store %arg11[%c12_264, %c0_265, %c32_266], %268 {strides = array<i32>} : memref<16x8x128xf32, #tpu.memory_space<vmem>>, vector<4x8x32xf32>,
    %c84_267 = arith.constant 84 : index
    %c0_268 = arith.constant 0 : index
    %c0_269 = arith.constant 0 : index
    %270 = vector.load %arg1[%c84_267, %c0_268, %c0_269] : memref<108x8x64xf32, #tpu.memory_space<vmem>>, vector<8x8x64xf32>
    %271 = vector.shape_cast %270 : vector<8x8x64xf32> to vector<64x64xf32>
    %c0_270 = arith.constant 0 : index
    %c0_271 = arith.constant 0 : index
    %c0_272 = arith.constant 0 : index
    %c0_273 = arith.constant 0 : index
    %272 = vector.load %arg2[%c0_270, %c0_271, %c0_272, %c0_273] : memref<2x2x64x128xf32, #tpu.memory_space<vmem>>, vector<1x1x64x128xf32>
    %273 = vector.shape_cast %272 : vector<1x1x64x128xf32> to vector<64x128xf32>
    %cst_274 = arith.constant dense<0.000000e+00> : vector<64x128xf32>
    %274 = tpu.matmul %271, %273, %cst_274 {dimension_numbers = #tpu.dot_dimension_numbers<[1], [0], [0], [1], [0, 0, 1, 1], [], []>} : vector<64x64xf32>, vector<64x128xf32>, vector<64x128xf32> -> vector<64x128xf32>
    %c88_275 = arith.constant 88 : index
    %c0_276 = arith.constant 0 : index
    %c0_277 = arith.constant 0 : index
    %275 = vector.load %arg1[%c88_275, %c0_276, %c0_277] : memref<108x8x64xf32, #tpu.memory_space<vmem>>, vector<8x8x64xf32>
    %276 = vector.shape_cast %275 : vector<8x8x64xf32> to vector<64x64xf32>
    %c0_278 = arith.constant 0 : index
    %c1_279 = arith.constant 1 : index
    %c0_280 = arith.constant 0 : index
    %c0_281 = arith.constant 0 : index
    %277 = vector.load %arg2[%c0_278, %c1_279, %c0_280, %c0_281] : memref<2x2x64x128xf32, #tpu.memory_space<vmem>>, vector<1x1x64x128xf32>
    %278 = vector.shape_cast %277 : vector<1x1x64x128xf32> to vector<64x128xf32>
    %cst_282 = arith.constant dense<0.000000e+00> : vector<64x128xf32>
    %279 = tpu.matmul %276, %278, %cst_282 {dimension_numbers = #tpu.dot_dimension_numbers<[1], [0], [0], [1], [0, 0, 1, 1], [], []>} : vector<64x64xf32>, vector<64x128xf32>, vector<64x128xf32> -> vector<64x128xf32>
    %280 = arith.addf %274, %279 : vector<64x128xf32>
    %c96_283 = arith.constant 96 : index
    %c0_284 = arith.constant 0 : index
    %c0_285 = arith.constant 0 : index
    %281 = vector.load %arg1[%c96_283, %c0_284, %c0_285] : memref<108x8x64xf32, #tpu.memory_space<vmem>>, vector<8x8x64xf32>
    %282 = vector.shape_cast %281 : vector<8x8x64xf32> to vector<64x64xf32>
    %c1_286 = arith.constant 1 : index
    %c0_287 = arith.constant 0 : index
    %c0_288 = arith.constant 0 : index
    %c0_289 = arith.constant 0 : index
    %283 = vector.load %arg2[%c1_286, %c0_287, %c0_288, %c0_289] : memref<2x2x64x128xf32, #tpu.memory_space<vmem>>, vector<1x1x64x128xf32>
    %284 = vector.shape_cast %283 : vector<1x1x64x128xf32> to vector<64x128xf32>
    %cst_290 = arith.constant dense<0.000000e+00> : vector<64x128xf32>
    %285 = tpu.matmul %282, %284, %cst_290 {dimension_numbers = #tpu.dot_dimension_numbers<[1], [0], [0], [1], [0, 0, 1, 1], [], []>} : vector<64x64xf32>, vector<64x128xf32>, vector<64x128xf32> -> vector<64x128xf32>
    %286 = arith.addf %280, %285 : vector<64x128xf32>
    %c100 = arith.constant 100 : index
    %c0_291 = arith.constant 0 : index
    %c0_292 = arith.constant 0 : index
    %287 = vector.load %arg1[%c100, %c0_291, %c0_292] : memref<108x8x64xf32, #tpu.memory_space<vmem>>, vector<8x8x64xf32>
    %288 = vector.shape_cast %287 : vector<8x8x64xf32> to vector<64x64xf32>
    %c1_293 = arith.constant 1 : index
    %c1_294 = arith.constant 1 : index
    %c0_295 = arith.constant 0 : index
    %c0_296 = arith.constant 0 : index
    %289 = vector.load %arg2[%c1_293, %c1_294, %c0_295, %c0_296] : memref<2x2x64x128xf32, #tpu.memory_space<vmem>>, vector<1x1x64x128xf32>
    %290 = vector.shape_cast %289 : vector<1x1x64x128xf32> to vector<64x128xf32>
    %cst_297 = arith.constant dense<0.000000e+00> : vector<64x128xf32>
    %291 = tpu.matmul %288, %290, %cst_297 {dimension_numbers = #tpu.dot_dimension_numbers<[1], [0], [0], [1], [0, 0, 1, 1], [], []>} : vector<64x64xf32>, vector<64x128xf32>, vector<64x128xf32> -> vector<64x128xf32>
    %292 = arith.addf %286, %291 : vector<64x128xf32>
    %293 = vector.broadcast %0 : vector<1x128xf32> to vector<64x128xf32>
    %294 = arith.addf %292, %293 : vector<64x128xf32>
    %cst_298 = arith.constant 0.000000e+00 : f32
    %295 = vector.broadcast %cst_298 : f32 to vector<64x128xf32>
    %296 = arith.cmpf oge, %294, %295 : vector<64x128xf32>
    %cst_299 = arith.constant 0.00999999977 : f32
    %297 = vector.broadcast %cst_299 : f32 to vector<64x128xf32>
    %298 = arith.mulf %297, %294 : vector<64x128xf32>
    %299 = arith.select %296, %294, %298 : vector<64x128xi1>, vector<64x128xf32>
    %300 = vector.extract_strided_slice %299 {offsets = [0, 0], sizes = [32, 128], strides = [1, 1]} : vector<64x128xf32> to vector<32x128xf32>
    %301 = vector.shape_cast %300 : vector<32x128xf32> to vector<4x8x128xf32>
    %302 = vector.extract_strided_slice %299 {offsets = [32, 0], sizes = [32, 128], strides = [1, 1]} : vector<64x128xf32> to vector<32x128xf32>
    %303 = vector.shape_cast %302 : vector<32x128xf32> to vector<4x8x128xf32>
    %304 = vector.extract_strided_slice %301 {offsets = [0, 0, 0], sizes = [4, 8, 32], strides = [1, 1, 1]} : vector<4x8x128xf32> to vector<4x8x32xf32>
    %c12_300 = arith.constant 12 : index
    %c0_301 = arith.constant 0 : index
    %c64_302 = arith.constant 64 : index
    %305 = vector.load %arg11[%c12_300, %c0_301, %c64_302] : memref<16x8x128xf32, #tpu.memory_space<vmem>>, vector<4x8x32xf32>
    tpu.vector_store %arg11[%c12_300, %c0_301, %c64_302], %304 {strides = array<i32>} : memref<16x8x128xf32, #tpu.memory_space<vmem>>, vector<4x8x32xf32>,
    %306 = vector.extract_strided_slice %303 {offsets = [0, 0, 0], sizes = [4, 8, 32], strides = [1, 1, 1]} : vector<4x8x128xf32> to vector<4x8x32xf32>
    %c12_303 = arith.constant 12 : index
    %c0_304 = arith.constant 0 : index
    %c96_305 = arith.constant 96 : index
    %307 = vector.load %arg11[%c12_303, %c0_304, %c96_305] : memref<16x8x128xf32, #tpu.memory_space<vmem>>, vector<4x8x32xf32>
    tpu.vector_store %arg11[%c12_303, %c0_304, %c96_305], %306 {strides = array<i32>} : memref<16x8x128xf32, #tpu.memory_space<vmem>>, vector<4x8x32xf32>,
    %c0_306 = arith.constant 0 : index
    %c0_307 = arith.constant 0 : index
    %c0_308 = arith.constant 0 : index
    %308 = vector.load %arg11[%c0_306, %c0_307, %c0_308] : memref<16x8x128xf32, #tpu.memory_space<vmem>>, vector<3x8x128xf32>
    %309 = vector.shape_cast %308 : vector<3x8x128xf32> to vector<24x128xf32>
    %c0_309 = arith.constant 0 : index
    %c0_310 = arith.constant 0 : index
    %c0_311 = arith.constant 0 : index
    %c0_312 = arith.constant 0 : index
    %310 = vector.load %arg4[%c0_309, %c0_310, %c0_311, %c0_312] : memref<2x2x128x128xf32, #tpu.memory_space<vmem>>, vector<1x1x128x128xf32>
    %311 = vector.shape_cast %310 : vector<1x1x128x128xf32> to vector<128x128xf32>
    %cst_313 = arith.constant dense<0.000000e+00> : vector<24x128xf32>
    %312 = tpu.matmul %309, %311, %cst_313 {dimension_numbers = #tpu.dot_dimension_numbers<[1], [0], [0], [1], [0, 0, 1, 1], [], []>} : vector<24x128xf32>, vector<128x128xf32>, vector<24x128xf32> -> vector<24x128xf32>
    %c1_314 = arith.constant 1 : index
    %c0_315 = arith.constant 0 : index
    %c0_316 = arith.constant 0 : index
    %313 = vector.load %arg11[%c1_314, %c0_315, %c0_316] : memref<16x8x128xf32, #tpu.memory_space<vmem>>, vector<3x8x128xf32>
    %314 = vector.shape_cast %313 : vector<3x8x128xf32> to vector<24x128xf32>
    %c0_317 = arith.constant 0 : index
    %c1_318 = arith.constant 1 : index
    %c0_319 = arith.constant 0 : index
    %c0_320 = arith.constant 0 : index
    %315 = vector.load %arg4[%c0_317, %c1_318, %c0_319, %c0_320] : memref<2x2x128x128xf32, #tpu.memory_space<vmem>>, vector<1x1x128x128xf32>
    %316 = vector.shape_cast %315 : vector<1x1x128x128xf32> to vector<128x128xf32>
    %cst_321 = arith.constant dense<0.000000e+00> : vector<24x128xf32>
    %317 = tpu.matmul %314, %316, %cst_321 {dimension_numbers = #tpu.dot_dimension_numbers<[1], [0], [0], [1], [0, 0, 1, 1], [], []>} : vector<24x128xf32>, vector<128x128xf32>, vector<24x128xf32> -> vector<24x128xf32>
    %318 = arith.addf %312, %317 : vector<24x128xf32>
    %c4_322 = arith.constant 4 : index
    %c0_323 = arith.constant 0 : index
    %c0_324 = arith.constant 0 : index
    %319 = vector.load %arg11[%c4_322, %c0_323, %c0_324] : memref<16x8x128xf32, #tpu.memory_space<vmem>>, vector<3x8x128xf32>
    %320 = vector.shape_cast %319 : vector<3x8x128xf32> to vector<24x128xf32>
    %c1_325 = arith.constant 1 : index
    %c0_326 = arith.constant 0 : index
    %c0_327 = arith.constant 0 : index
    %c0_328 = arith.constant 0 : index
    %321 = vector.load %arg4[%c1_325, %c0_326, %c0_327, %c0_328] : memref<2x2x128x128xf32, #tpu.memory_space<vmem>>, vector<1x1x128x128xf32>
    %322 = vector.shape_cast %321 : vector<1x1x128x128xf32> to vector<128x128xf32>
    %cst_329 = arith.constant dense<0.000000e+00> : vector<24x128xf32>
    %323 = tpu.matmul %320, %322, %cst_329 {dimension_numbers = #tpu.dot_dimension_numbers<[1], [0], [0], [1], [0, 0, 1, 1], [], []>} : vector<24x128xf32>, vector<128x128xf32>, vector<24x128xf32> -> vector<24x128xf32>
    %324 = arith.addf %318, %323 : vector<24x128xf32>
    %c5 = arith.constant 5 : index
    %c0_330 = arith.constant 0 : index
    %c0_331 = arith.constant 0 : index
    %325 = vector.load %arg11[%c5, %c0_330, %c0_331] : memref<16x8x128xf32, #tpu.memory_space<vmem>>, vector<3x8x128xf32>
    %326 = vector.shape_cast %325 : vector<3x8x128xf32> to vector<24x128xf32>
    %c1_332 = arith.constant 1 : index
    %c1_333 = arith.constant 1 : index
    %c0_334 = arith.constant 0 : index
    %c0_335 = arith.constant 0 : index
    %327 = vector.load %arg4[%c1_332, %c1_333, %c0_334, %c0_335] : memref<2x2x128x128xf32, #tpu.memory_space<vmem>>, vector<1x1x128x128xf32>
    %328 = vector.shape_cast %327 : vector<1x1x128x128xf32> to vector<128x128xf32>
    %cst_336 = arith.constant dense<0.000000e+00> : vector<24x128xf32>
    %329 = tpu.matmul %326, %328, %cst_336 {dimension_numbers = #tpu.dot_dimension_numbers<[1], [0], [0], [1], [0, 0, 1, 1], [], []>} : vector<24x128xf32>, vector<128x128xf32>, vector<24x128xf32> -> vector<24x128xf32>
    %330 = arith.addf %324, %329 : vector<24x128xf32>
    %331 = vector.broadcast %1 : vector<1x128xf32> to vector<24x128xf32>
    %332 = arith.addf %330, %331 : vector<24x128xf32>
    %cst_337 = arith.constant 0.000000e+00 : f32
    %333 = vector.broadcast %cst_337 : f32 to vector<24x128xf32>
    %334 = arith.cmpf oge, %332, %333 : vector<24x128xf32>
    %cst_338 = arith.constant 0.00999999977 : f32
    %335 = vector.broadcast %cst_338 : f32 to vector<24x128xf32>
    %336 = arith.mulf %335, %332 : vector<24x128xf32>
    %337 = arith.select %334, %332, %336 : vector<24x128xi1>, vector<24x128xf32>
    %338 = vector.extract_strided_slice %337 {offsets = [0, 0], sizes = [8, 64], strides = [1, 1]} : vector<24x128xf32> to vector<8x64xf32>
    %c0_339 = arith.constant 0 : index
    %c0_340 = arith.constant 0 : index
    %c0_341 = arith.constant 0 : index
    %c0_342 = arith.constant 0 : index
    %339 = vector.load %arg6[%c0_339, %c0_340, %c0_341, %c0_342] : memref<3x3x64x128xf32, #tpu.memory_space<vmem>>, vector<1x1x64x128xf32>
    %340 = vector.shape_cast %339 : vector<1x1x64x128xf32> to vector<64x128xf32>
    %cst_343 = arith.constant dense<0.000000e+00> : vector<8x128xf32>
    %341 = tpu.matmul %338, %340, %cst_343 {dimension_numbers = #tpu.dot_dimension_numbers<[1], [0], [0], [1], [0, 0, 1, 1], [], []>} : vector<8x64xf32>, vector<64x128xf32>, vector<8x128xf32> -> vector<8x128xf32>
    %342 = vector.extract_strided_slice %337 {offsets = [8, 0], sizes = [8, 64], strides = [1, 1]} : vector<24x128xf32> to vector<8x64xf32>
    %c0_344 = arith.constant 0 : index
    %c1_345 = arith.constant 1 : index
    %c0_346 = arith.constant 0 : index
    %c0_347 = arith.constant 0 : index
    %343 = vector.load %arg6[%c0_344, %c1_345, %c0_346, %c0_347] : memref<3x3x64x128xf32, #tpu.memory_space<vmem>>, vector<1x1x64x128xf32>
    %344 = vector.shape_cast %343 : vector<1x1x64x128xf32> to vector<64x128xf32>
    %cst_348 = arith.constant dense<0.000000e+00> : vector<8x128xf32>
    %345 = tpu.matmul %342, %344, %cst_348 {dimension_numbers = #tpu.dot_dimension_numbers<[1], [0], [0], [1], [0, 0, 1, 1], [], []>} : vector<8x64xf32>, vector<64x128xf32>, vector<8x128xf32> -> vector<8x128xf32>
    %346 = arith.addf %341, %345 : vector<8x128xf32>
    %347 = vector.extract_strided_slice %337 {offsets = [16, 0], sizes = [8, 64], strides = [1, 1]} : vector<24x128xf32> to vector<8x64xf32>
    %c0_349 = arith.constant 0 : index
    %c2 = arith.constant 2 : index
    %c0_350 = arith.constant 0 : index
    %c0_351 = arith.constant 0 : index
    %348 = vector.load %arg6[%c0_349, %c2, %c0_350, %c0_351] : memref<3x3x64x128xf32, #tpu.memory_space<vmem>>, vector<1x1x64x128xf32>
    %349 = vector.shape_cast %348 : vector<1x1x64x128xf32> to vector<64x128xf32>
    %cst_352 = arith.constant dense<0.000000e+00> : vector<8x128xf32>
    %350 = tpu.matmul %347, %349, %cst_352 {dimension_numbers = #tpu.dot_dimension_numbers<[1], [0], [0], [1], [0, 0, 1, 1], [], []>} : vector<8x64xf32>, vector<64x128xf32>, vector<8x128xf32> -> vector<8x128xf32>
    %351 = arith.addf %346, %350 : vector<8x128xf32>
    %c4_353 = arith.constant 4 : index
    %c0_354 = arith.constant 0 : index
    %c0_355 = arith.constant 0 : index
    %352 = vector.load %arg11[%c4_353, %c0_354, %c0_355] : memref<16x8x128xf32, #tpu.memory_space<vmem>>, vector<3x8x128xf32>
    %353 = vector.shape_cast %352 : vector<3x8x128xf32> to vector<24x128xf32>
    %c0_356 = arith.constant 0 : index
    %c0_357 = arith.constant 0 : index
    %c0_358 = arith.constant 0 : index
    %c0_359 = arith.constant 0 : index
    %354 = vector.load %arg4[%c0_356, %c0_357, %c0_358, %c0_359] : memref<2x2x128x128xf32, #tpu.memory_space<vmem>>, vector<1x1x128x128xf32>
    %355 = vector.shape_cast %354 : vector<1x1x128x128xf32> to vector<128x128xf32>
    %cst_360 = arith.constant dense<0.000000e+00> : vector<24x128xf32>
    %356 = tpu.matmul %353, %355, %cst_360 {dimension_numbers = #tpu.dot_dimension_numbers<[1], [0], [0], [1], [0, 0, 1, 1], [], []>} : vector<24x128xf32>, vector<128x128xf32>, vector<24x128xf32> -> vector<24x128xf32>
    %c5_361 = arith.constant 5 : index
    %c0_362 = arith.constant 0 : index
    %c0_363 = arith.constant 0 : index
    %357 = vector.load %arg11[%c5_361, %c0_362, %c0_363] : memref<16x8x128xf32, #tpu.memory_space<vmem>>, vector<3x8x128xf32>
    %358 = vector.shape_cast %357 : vector<3x8x128xf32> to vector<24x128xf32>
    %c0_364 = arith.constant 0 : index
    %c1_365 = arith.constant 1 : index
    %c0_366 = arith.constant 0 : index
    %c0_367 = arith.constant 0 : index
    %359 = vector.load %arg4[%c0_364, %c1_365, %c0_366, %c0_367] : memref<2x2x128x128xf32, #tpu.memory_space<vmem>>, vector<1x1x128x128xf32>
    %360 = vector.shape_cast %359 : vector<1x1x128x128xf32> to vector<128x128xf32>
    %cst_368 = arith.constant dense<0.000000e+00> : vector<24x128xf32>
    %361 = tpu.matmul %358, %360, %cst_368 {dimension_numbers = #tpu.dot_dimension_numbers<[1], [0], [0], [1], [0, 0, 1, 1], [], []>} : vector<24x128xf32>, vector<128x128xf32>, vector<24x128xf32> -> vector<24x128xf32>
    %362 = arith.addf %356, %361 : vector<24x128xf32>
    %c8_369 = arith.constant 8 : index
    %c0_370 = arith.constant 0 : index
    %c0_371 = arith.constant 0 : index
    %363 = vector.load %arg11[%c8_369, %c0_370, %c0_371] : memref<16x8x128xf32, #tpu.memory_space<vmem>>, vector<3x8x128xf32>
    %364 = vector.shape_cast %363 : vector<3x8x128xf32> to vector<24x128xf32>
    %c1_372 = arith.constant 1 : index
    %c0_373 = arith.constant 0 : index
    %c0_374 = arith.constant 0 : index
    %c0_375 = arith.constant 0 : index
    %365 = vector.load %arg4[%c1_372, %c0_373, %c0_374, %c0_375] : memref<2x2x128x128xf32, #tpu.memory_space<vmem>>, vector<1x1x128x128xf32>
    %366 = vector.shape_cast %365 : vector<1x1x128x128xf32> to vector<128x128xf32>
    %cst_376 = arith.constant dense<0.000000e+00> : vector<24x128xf32>
    %367 = tpu.matmul %364, %366, %cst_376 {dimension_numbers = #tpu.dot_dimension_numbers<[1], [0], [0], [1], [0, 0, 1, 1], [], []>} : vector<24x128xf32>, vector<128x128xf32>, vector<24x128xf32> -> vector<24x128xf32>
    %368 = arith.addf %362, %367 : vector<24x128xf32>
    %c9 = arith.constant 9 : index
    %c0_377 = arith.constant 0 : index
    %c0_378 = arith.constant 0 : index
    %369 = vector.load %arg11[%c9, %c0_377, %c0_378] : memref<16x8x128xf32, #tpu.memory_space<vmem>>, vector<3x8x128xf32>
    %370 = vector.shape_cast %369 : vector<3x8x128xf32> to vector<24x128xf32>
    %c1_379 = arith.constant 1 : index
    %c1_380 = arith.constant 1 : index
    %c0_381 = arith.constant 0 : index
    %c0_382 = arith.constant 0 : index
    %371 = vector.load %arg4[%c1_379, %c1_380, %c0_381, %c0_382] : memref<2x2x128x128xf32, #tpu.memory_space<vmem>>, vector<1x1x128x128xf32>
    %372 = vector.shape_cast %371 : vector<1x1x128x128xf32> to vector<128x128xf32>
    %cst_383 = arith.constant dense<0.000000e+00> : vector<24x128xf32>
    %373 = tpu.matmul %370, %372, %cst_383 {dimension_numbers = #tpu.dot_dimension_numbers<[1], [0], [0], [1], [0, 0, 1, 1], [], []>} : vector<24x128xf32>, vector<128x128xf32>, vector<24x128xf32> -> vector<24x128xf32>
    %374 = arith.addf %368, %373 : vector<24x128xf32>
    %375 = vector.broadcast %1 : vector<1x128xf32> to vector<24x128xf32>
    %376 = arith.addf %374, %375 : vector<24x128xf32>
    %cst_384 = arith.constant 0.000000e+00 : f32
    %377 = vector.broadcast %cst_384 : f32 to vector<24x128xf32>
    %378 = arith.cmpf oge, %376, %377 : vector<24x128xf32>
    %cst_385 = arith.constant 0.00999999977 : f32
    %379 = vector.broadcast %cst_385 : f32 to vector<24x128xf32>
    %380 = arith.mulf %379, %376 : vector<24x128xf32>
    %381 = arith.select %378, %376, %380 : vector<24x128xi1>, vector<24x128xf32>
    %382 = vector.extract_strided_slice %381 {offsets = [0, 0], sizes = [8, 64], strides = [1, 1]} : vector<24x128xf32> to vector<8x64xf32>
    %c1_386 = arith.constant 1 : index
    %c0_387 = arith.constant 0 : index
    %c0_388 = arith.constant 0 : index
    %c0_389 = arith.constant 0 : index
    %383 = vector.load %arg6[%c1_386, %c0_387, %c0_388, %c0_389] : memref<3x3x64x128xf32, #tpu.memory_space<vmem>>, vector<1x1x64x128xf32>
    %384 = vector.shape_cast %383 : vector<1x1x64x128xf32> to vector<64x128xf32>
    %cst_390 = arith.constant dense<0.000000e+00> : vector<8x128xf32>
    %385 = tpu.matmul %382, %384, %cst_390 {dimension_numbers = #tpu.dot_dimension_numbers<[1], [0], [0], [1], [0, 0, 1, 1], [], []>} : vector<8x64xf32>, vector<64x128xf32>, vector<8x128xf32> -> vector<8x128xf32>
    %386 = arith.addf %351, %385 : vector<8x128xf32>
    %387 = vector.extract_strided_slice %381 {offsets = [8, 0], sizes = [8, 64], strides = [1, 1]} : vector<24x128xf32> to vector<8x64xf32>
    %c1_391 = arith.constant 1 : index
    %c1_392 = arith.constant 1 : index
    %c0_393 = arith.constant 0 : index
    %c0_394 = arith.constant 0 : index
    %388 = vector.load %arg6[%c1_391, %c1_392, %c0_393, %c0_394] : memref<3x3x64x128xf32, #tpu.memory_space<vmem>>, vector<1x1x64x128xf32>
    %389 = vector.shape_cast %388 : vector<1x1x64x128xf32> to vector<64x128xf32>
    %cst_395 = arith.constant dense<0.000000e+00> : vector<8x128xf32>
    %390 = tpu.matmul %387, %389, %cst_395 {dimension_numbers = #tpu.dot_dimension_numbers<[1], [0], [0], [1], [0, 0, 1, 1], [], []>} : vector<8x64xf32>, vector<64x128xf32>, vector<8x128xf32> -> vector<8x128xf32>
    %391 = arith.addf %386, %390 : vector<8x128xf32>
    %392 = vector.extract_strided_slice %381 {offsets = [16, 0], sizes = [8, 64], strides = [1, 1]} : vector<24x128xf32> to vector<8x64xf32>
    %c1_396 = arith.constant 1 : index
    %c2_397 = arith.constant 2 : index
    %c0_398 = arith.constant 0 : index
    %c0_399 = arith.constant 0 : index
    %393 = vector.load %arg6[%c1_396, %c2_397, %c0_398, %c0_399] : memref<3x3x64x128xf32, #tpu.memory_space<vmem>>, vector<1x1x64x128xf32>
    %394 = vector.shape_cast %393 : vector<1x1x64x128xf32> to vector<64x128xf32>
    %cst_400 = arith.constant dense<0.000000e+00> : vector<8x128xf32>
    %395 = tpu.matmul %392, %394, %cst_400 {dimension_numbers = #tpu.dot_dimension_numbers<[1], [0], [0], [1], [0, 0, 1, 1], [], []>} : vector<8x64xf32>, vector<64x128xf32>, vector<8x128xf32> -> vector<8x128xf32>
    %396 = arith.addf %391, %395 : vector<8x128xf32>
    %c8_401 = arith.constant 8 : index
    %c0_402 = arith.constant 0 : index
    %c0_403 = arith.constant 0 : index
    %397 = vector.load %arg11[%c8_401, %c0_402, %c0_403] : memref<16x8x128xf32, #tpu.memory_space<vmem>>, vector<3x8x128xf32>
    %398 = vector.shape_cast %397 : vector<3x8x128xf32> to vector<24x128xf32>
    %c0_404 = arith.constant 0 : index
    %c0_405 = arith.constant 0 : index
    %c0_406 = arith.constant 0 : index
    %c0_407 = arith.constant 0 : index
    %399 = vector.load %arg4[%c0_404, %c0_405, %c0_406, %c0_407] : memref<2x2x128x128xf32, #tpu.memory_space<vmem>>, vector<1x1x128x128xf32>
    %400 = vector.shape_cast %399 : vector<1x1x128x128xf32> to vector<128x128xf32>
    %cst_408 = arith.constant dense<0.000000e+00> : vector<24x128xf32>
    %401 = tpu.matmul %398, %400, %cst_408 {dimension_numbers = #tpu.dot_dimension_numbers<[1], [0], [0], [1], [0, 0, 1, 1], [], []>} : vector<24x128xf32>, vector<128x128xf32>, vector<24x128xf32> -> vector<24x128xf32>
    %c9_409 = arith.constant 9 : index
    %c0_410 = arith.constant 0 : index
    %c0_411 = arith.constant 0 : index
    %402 = vector.load %arg11[%c9_409, %c0_410, %c0_411] : memref<16x8x128xf32, #tpu.memory_space<vmem>>, vector<3x8x128xf32>
    %403 = vector.shape_cast %402 : vector<3x8x128xf32> to vector<24x128xf32>
    %c0_412 = arith.constant 0 : index
    %c1_413 = arith.constant 1 : index
    %c0_414 = arith.constant 0 : index
    %c0_415 = arith.constant 0 : index
    %404 = vector.load %arg4[%c0_412, %c1_413, %c0_414, %c0_415] : memref<2x2x128x128xf32, #tpu.memory_space<vmem>>, vector<1x1x128x128xf32>
    %405 = vector.shape_cast %404 : vector<1x1x128x128xf32> to vector<128x128xf32>
    %cst_416 = arith.constant dense<0.000000e+00> : vector<24x128xf32>
    %406 = tpu.matmul %403, %405, %cst_416 {dimension_numbers = #tpu.dot_dimension_numbers<[1], [0], [0], [1], [0, 0, 1, 1], [], []>} : vector<24x128xf32>, vector<128x128xf32>, vector<24x128xf32> -> vector<24x128xf32>
    %407 = arith.addf %401, %406 : vector<24x128xf32>
    %c12_417 = arith.constant 12 : index
    %c0_418 = arith.constant 0 : index
    %c0_419 = arith.constant 0 : index
    %408 = vector.load %arg11[%c12_417, %c0_418, %c0_419] : memref<16x8x128xf32, #tpu.memory_space<vmem>>, vector<3x8x128xf32>
    %409 = vector.shape_cast %408 : vector<3x8x128xf32> to vector<24x128xf32>
    %c1_420 = arith.constant 1 : index
    %c0_421 = arith.constant 0 : index
    %c0_422 = arith.constant 0 : index
    %c0_423 = arith.constant 0 : index
    %410 = vector.load %arg4[%c1_420, %c0_421, %c0_422, %c0_423] : memref<2x2x128x128xf32, #tpu.memory_space<vmem>>, vector<1x1x128x128xf32>
    %411 = vector.shape_cast %410 : vector<1x1x128x128xf32> to vector<128x128xf32>
    %cst_424 = arith.constant dense<0.000000e+00> : vector<24x128xf32>
    %412 = tpu.matmul %409, %411, %cst_424 {dimension_numbers = #tpu.dot_dimension_numbers<[1], [0], [0], [1], [0, 0, 1, 1], [], []>} : vector<24x128xf32>, vector<128x128xf32>, vector<24x128xf32> -> vector<24x128xf32>
    %413 = arith.addf %407, %412 : vector<24x128xf32>
    %c13 = arith.constant 13 : index
    %c0_425 = arith.constant 0 : index
    %c0_426 = arith.constant 0 : index
    %414 = vector.load %arg11[%c13, %c0_425, %c0_426] : memref<16x8x128xf32, #tpu.memory_space<vmem>>, vector<3x8x128xf32>
    %415 = vector.shape_cast %414 : vector<3x8x128xf32> to vector<24x128xf32>
    %c1_427 = arith.constant 1 : index
    %c1_428 = arith.constant 1 : index
    %c0_429 = arith.constant 0 : index
    %c0_430 = arith.constant 0 : index
    %416 = vector.load %arg4[%c1_427, %c1_428, %c0_429, %c0_430] : memref<2x2x128x128xf32, #tpu.memory_space<vmem>>, vector<1x1x128x128xf32>
    %417 = vector.shape_cast %416 : vector<1x1x128x128xf32> to vector<128x128xf32>
    %cst_431 = arith.constant dense<0.000000e+00> : vector<24x128xf32>
    %418 = tpu.matmul %415, %417, %cst_431 {dimension_numbers = #tpu.dot_dimension_numbers<[1], [0], [0], [1], [0, 0, 1, 1], [], []>} : vector<24x128xf32>, vector<128x128xf32>, vector<24x128xf32> -> vector<24x128xf32>
    %419 = arith.addf %413, %418 : vector<24x128xf32>
    %420 = vector.broadcast %1 : vector<1x128xf32> to vector<24x128xf32>
    %421 = arith.addf %419, %420 : vector<24x128xf32>
    %cst_432 = arith.constant 0.000000e+00 : f32
    %422 = vector.broadcast %cst_432 : f32 to vector<24x128xf32>
    %423 = arith.cmpf oge, %421, %422 : vector<24x128xf32>
    %cst_433 = arith.constant 0.00999999977 : f32
    %424 = vector.broadcast %cst_433 : f32 to vector<24x128xf32>
    %425 = arith.mulf %424, %421 : vector<24x128xf32>
    %426 = arith.select %423, %421, %425 : vector<24x128xi1>, vector<24x128xf32>
    %427 = vector.extract_strided_slice %426 {offsets = [0, 0], sizes = [8, 64], strides = [1, 1]} : vector<24x128xf32> to vector<8x64xf32>
    %c2_434 = arith.constant 2 : index
    %c0_435 = arith.constant 0 : index
    %c0_436 = arith.constant 0 : index
    %c0_437 = arith.constant 0 : index
    %428 = vector.load %arg6[%c2_434, %c0_435, %c0_436, %c0_437] : memref<3x3x64x128xf32, #tpu.memory_space<vmem>>, vector<1x1x64x128xf32>
    %429 = vector.shape_cast %428 : vector<1x1x64x128xf32> to vector<64x128xf32>
    %cst_438 = arith.constant dense<0.000000e+00> : vector<8x128xf32>
    %430 = tpu.matmul %427, %429, %cst_438 {dimension_numbers = #tpu.dot_dimension_numbers<[1], [0], [0], [1], [0, 0, 1, 1], [], []>} : vector<8x64xf32>, vector<64x128xf32>, vector<8x128xf32> -> vector<8x128xf32>
    %431 = arith.addf %396, %430 : vector<8x128xf32>
    %432 = vector.extract_strided_slice %426 {offsets = [8, 0], sizes = [8, 64], strides = [1, 1]} : vector<24x128xf32> to vector<8x64xf32>
    %c2_439 = arith.constant 2 : index
    %c1_440 = arith.constant 1 : index
    %c0_441 = arith.constant 0 : index
    %c0_442 = arith.constant 0 : index
    %433 = vector.load %arg6[%c2_439, %c1_440, %c0_441, %c0_442] : memref<3x3x64x128xf32, #tpu.memory_space<vmem>>, vector<1x1x64x128xf32>
    %434 = vector.shape_cast %433 : vector<1x1x64x128xf32> to vector<64x128xf32>
    %cst_443 = arith.constant dense<0.000000e+00> : vector<8x128xf32>
    %435 = tpu.matmul %432, %434, %cst_443 {dimension_numbers = #tpu.dot_dimension_numbers<[1], [0], [0], [1], [0, 0, 1, 1], [], []>} : vector<8x64xf32>, vector<64x128xf32>, vector<8x128xf32> -> vector<8x128xf32>
    %436 = arith.addf %431, %435 : vector<8x128xf32>
    %437 = vector.extract_strided_slice %426 {offsets = [16, 0], sizes = [8, 64], strides = [1, 1]} : vector<24x128xf32> to vector<8x64xf32>
    %c2_444 = arith.constant 2 : index
    %c2_445 = arith.constant 2 : index
    %c0_446 = arith.constant 0 : index
    %c0_447 = arith.constant 0 : index
    %438 = vector.load %arg6[%c2_444, %c2_445, %c0_446, %c0_447] : memref<3x3x64x128xf32, #tpu.memory_space<vmem>>, vector<1x1x64x128xf32>
    %439 = vector.shape_cast %438 : vector<1x1x64x128xf32> to vector<64x128xf32>
    %cst_448 = arith.constant dense<0.000000e+00> : vector<8x128xf32>
    %440 = tpu.matmul %437, %439, %cst_448 {dimension_numbers = #tpu.dot_dimension_numbers<[1], [0], [0], [1], [0, 0, 1, 1], [], []>} : vector<8x64xf32>, vector<64x128xf32>, vector<8x128xf32> -> vector<8x128xf32>
    %441 = arith.addf %436, %440 : vector<8x128xf32>
    %442 = vector.broadcast %2 : vector<1x128xf32> to vector<8x128xf32>
    %443 = arith.addf %441, %442 : vector<8x128xf32>
    %cst_449 = arith.constant 0.000000e+00 : f32
    %444 = vector.broadcast %cst_449 : f32 to vector<8x128xf32>
    %445 = arith.cmpf oge, %443, %444 : vector<8x128xf32>
    %cst_450 = arith.constant 0.00999999977 : f32
    %446 = vector.broadcast %cst_450 : f32 to vector<8x128xf32>
    %447 = arith.mulf %446, %443 : vector<8x128xf32>
    %448 = arith.select %445, %443, %447 : vector<8x128xi1>, vector<8x128xf32>
    %449 = vector.extract_strided_slice %448 {offsets = [0, 0], sizes = [8, 64], strides = [1, 1]} : vector<8x128xf32> to vector<8x64xf32>
    %c0_451 = arith.constant 0 : index
    %c0_452 = arith.constant 0 : index
    %450 = vector.load %arg8[%c0_451, %c0_452] : memref<64x128xf32, #tpu.memory_space<vmem>>, vector<64x128xf32>
    %cst_453 = arith.constant dense<0.000000e+00> : vector<8x128xf32>
    %451 = tpu.matmul %449, %450, %cst_453 {dimension_numbers = #tpu.dot_dimension_numbers<[1], [0], [0], [1], [0, 0, 1, 1], [], []>} : vector<8x64xf32>, vector<64x128xf32>, vector<8x128xf32> -> vector<8x128xf32>
    %452 = vector.broadcast %3 : vector<1x128xf32> to vector<8x128xf32>
    %453 = arith.addf %451, %452 : vector<8x128xf32>
    %c0_454 = arith.constant 0 : index
    %c0_455 = arith.constant 0 : index
    %454 = vector.load %arg10[%c0_454, %c0_455] : memref<8x128xf32, #tpu.memory_space<vmem>>, vector<8x128xf32>
    tpu.vector_store %arg10[%c0_454, %c0_455], %453 {strides = array<i32>} : memref<8x128xf32, #tpu.memory_space<vmem>>, vector<8x128xf32>,
    return
  }
  func.func @transform_0(%arg0: i32) -> (i32, i32, i32) {
    %c0_i32 = arith.constant 0 : i32
    %c0_i32_0 = arith.constant 0 : i32
    %c0_i32_1 = arith.constant 0 : i32
    return %c0_i32, %arg0, %c0_i32_0 : i32, i32, i32
  }
  func.func @transform_1(%arg0: i32) -> (i32, i32, i32, i32) {
    %c0_i32 = arith.constant 0 : i32
    %c0_i32_0 = arith.constant 0 : i32
    %c0_i32_1 = arith.constant 0 : i32
    %c0_i32_2 = arith.constant 0 : i32
    %c0_i32_3 = arith.constant 0 : i32
    return %c0_i32, %c0_i32_0, %c0_i32_1, %c0_i32_2 : i32, i32, i32, i32
  }
  func.func @transform_2(%arg0: i32) -> (i32, i32) {
    %c0_i32 = arith.constant 0 : i32
    %c0_i32_0 = arith.constant 0 : i32
    %c0_i32_1 = arith.constant 0 : i32
    return %c0_i32, %c0_i32_0 : i32, i32
  }
  func.func @transform_3(%arg0: i32) -> (i32, i32, i32, i32) {
    %c0_i32 = arith.constant 0 : i32
    %c0_i32_0 = arith.constant 0 : i32
    %c0_i32_1 = arith.constant 0 : i32
    %c0_i32_2 = arith.constant 0 : i32
    %c0_i32_3 = arith.constant 0 : i32
    return %c0_i32, %c0_i32_0, %c0_i32_1, %c0_i32_2 : i32, i32, i32, i32
  }
  func.func @transform_4(%arg0: i32) -> (i32, i32) {
    %c0_i32 = arith.constant 0 : i32
    %c0_i32_0 = arith.constant 0 : i32
    %c0_i32_1 = arith.constant 0 : i32
    return %c0_i32, %c0_i32_0 : i32, i32
  }
  func.func @transform_5(%arg0: i32) -> (i32, i32, i32, i32) {
    %c0_i32 = arith.constant 0 : i32
    %c0_i32_0 = arith.constant 0 : i32
    %c0_i32_1 = arith.constant 0 : i32
    %c0_i32_2 = arith.constant 0 : i32
    %c0_i32_3 = arith.constant 0 : i32
    return %c0_i32, %c0_i32_0, %c0_i32_1, %c0_i32_2 : i32, i32, i32, i32
  }
  func.func @transform_6(%arg0: i32) -> (i32, i32) {
    %c0_i32 = arith.constant 0 : i32
    %c0_i32_0 = arith.constant 0 : i32
    %c0_i32_1 = arith.constant 0 : i32
    return %c0_i32, %c0_i32_0 : i32, i32
  }
  func.func @transform_7(%arg0: i32) -> (i32, i32) {
    %c0_i32 = arith.constant 0 : i32
    %c0_i32_0 = arith.constant 0 : i32
    %c0_i32_1 = arith.constant 0 : i32
    return %c0_i32, %c0_i32_0 : i32, i32
  }
  func.func @transform_8(%arg0: i32) -> (i32, i32) {
    %c0_i32 = arith.constant 0 : i32
    %c0_i32_0 = arith.constant 0 : i32
    %c0_i32_1 = arith.constant 0 : i32
    return %c0_i32, %c0_i32_0 : i32, i32
  }
  func.func @transform_9(%arg0: i32) -> (i32, i32) {
    %c0_i32 = arith.constant 0 : i32
    %c0_i32_0 = arith.constant 0 : i32
    return %arg0, %c0_i32 : i32, i32
  }
}

</mosaic_0001>

<bundles_post_ra>
// kernel: forward.1
= control target key start
LH: loop header
LB: loop body
LE: loop exit
PB: predicated region body
PF: predicated region fallthrough
CT: control target
= control target key end

     0   :  { %vm70_vm0 = vcmask 523264   ;;  %vm418_vm1 = vcmask 261120   ;;  %s4994_s11 = smov 32   ;;  %s4995_s16 = smov 64   ;;  %vm439_vm13 = vcmask 523520   ;;  %s7863_s1 = inlined_call_operand.vmem [shape: f32[2,2,64,128], index: 1, kind: input, shape index: {}]   ;;  %s7864_s0 = inlined_call_operand.vmem [shape: f32[108,8,64], index: 0, kind: input, shape index: {}]   ;;  %s7865_s2 = inlined_call_operand.vmem [shape: f32[1,128], index: 2, kind: input, shape index: {}]   ;;  %s7866_s3 = inlined_call_operand.vmem [shape: f32[2,2,128,128], index: 3, kind: input, shape index: {}]   ;;  %s7867_s4 = inlined_call_operand.vmem [shape: f32[1,128], index: 4, kind: input, shape index: {}]   ;;  %s7868_s5 = inlined_call_operand.vmem [shape: f32[3,3,64,128], index: 5, kind: input, shape index: {}]   ;;  %s7869_s6 = inlined_call_operand.vmem [shape: f32[1,128], index: 6, kind: input, shape index: {}]   ;;  %s7870_s8 = inlined_call_operand.vmem [shape: f32[1,128], index: 8, kind: input, shape index: {}]   ;;  %s7871_s7 = inlined_call_operand.vmem [shape: f32[64,128], index: 7, kind: input, shape index: {}]   ;;  %s7872_s9 = inlined_call_operand.vmem [shape: f32[8,128], index: 9, kind: output, shape index: {}]  }
   0x1   :  { %v5050_v0 = vld [vmem:[%s7863_s1 + $0x78] sm:$0xff]  ;;  %v5072_v4 = vld [vmem:[%s7863_s1 + $0x70] sm:$0xff]  ;;  %v5094_v8 = vld [vmem:[%s7863_s1 + $0x68] sm:$0xff]  ;;  %s4996_s30 = smov 96  }
   0x2   :  { %v5055_v1 = vld [vmem:[%s7863_s1 + $0x38] sm:$0xff]  ;;  %103 = vmatpush.msra.mxu0 %v5050_v0  ;;  %v5077_v5 = vld [vmem:[%s7863_s1 + $0x30] sm:$0xff]  ;;  %v5101_v9 = vld [vmem:[%s7863_s1 + $0x28] sm:$0xff] }
   0x3   :  { %v5060_v2 = vld [vmem:[%s7863_s1 + $0xb8] sm:$0xff]  ;;  %168 = vmatpush.msra.mxu1 %v5055_v1  ;;  %v5084_v6 = vld [vmem:[%s7863_s1 + $0xb0] sm:$0xff]  ;;  %v5106_v10 = vld [vmem:[%s7863_s1 + $0xa8] sm:$0xff] }
   0x4   :  { %v5067_v3 = vld [vmem:[%s7863_s1 + $0xf8] sm:$0xff]  ;;  %251 = vmatpush.msra.mxu2 %v5060_v2  ;;  %v5089_v7 = vld [vmem:[%s7863_s1 + $0xf0] sm:$0xff]  ;;  %104 = vmatpush.msra.mxu0 %v5072_v4  ;;  %v5111_v11 = vld [vmem:[%s7863_s1 + $0xe8] sm:$0xff] }
   0x5   :  { %342 = vmatpush.msra.mxu3 %v5067_v3  ;;  %169 = vmatpush.msra.mxu1 %v5077_v5  ;;  %v5118_v12 = vld [vmem:[%s7863_s1 + $0x60] sm:$0xff]  ;;  %v5142_v16 = vld [vmem:[%s7863_s1 + $0x58] sm:$0xff]  ;;  %v5166_v20 = vld [vmem:[%s7863_s1 + $0x50] sm:$0xff] }
   0x6   :  { %252 = vmatpush.msra.mxu2 %v5084_v6  ;;  %v5123_v13 = vld [vmem:[%s7863_s1 + $0x20] sm:$0xff]  ;;  %105 = vmatpush.msra.mxu0 %v5094_v8  ;;  %v5147_v17 = vld [vmem:[%s7863_s1 + $0x18] sm:$0xff]  ;;  %v5171_v21 = vld [vmem:[%s7863_s1 + $0x10] sm:$0xff] }
   0x7   :  { %343 = vmatpush.msra.mxu3 %v5089_v7  ;;  %170 = vmatpush.msra.mxu1 %v5101_v9  ;;  %v5130_v14 = vld [vmem:[%s7863_s1 + $0xa0] sm:$0xff]  ;;  %v5154_v18 = vld [vmem:[%s7863_s1 + $0x98] sm:$0xff]  ;;  %v5178_v22 = vld [vmem:[%s7863_s1 + $0x90] sm:$0xff] }
   0x8   :  { %v5135_v15 = vld [vmem:[%s7863_s1 + $0xe0] sm:$0xff]  ;;  %253 = vmatpush.msra.mxu2 %v5106_v10  ;;  %106 = vmatpush.msra.mxu0 %v5118_v12  ;;  %v5159_v19 = vld [vmem:[%s7863_s1 + $0xd8] sm:$0xff]  ;;  %v5183_v23 = vld [vmem:[%s7863_s1 + $0xd0] sm:$0xff] }
   0x9   :  { %344 = vmatpush.msra.mxu3 %v5111_v11  ;;  %171 = vmatpush.msra.mxu1 %v5123_v13  ;;  %v5190_v24 = vld [vmem:[%s7863_s1 + $0x48] sm:$0xff]  ;;  %v5214_v28 = vld [vmem:[%s7863_s1 + $0x40] sm:$0xff]  ;;  %v5310_v40 = vld [vmem:[%s7864_s0 + $0x30] sm:$0xff] }
   0xa   :  { %254 = vmatpush.msra.mxu2 %v5130_v14  ;;  %107 = vmatpush.msra.mxu0 %v5142_v16  ;;  %v5195_v25 = vld [vmem:[%s7863_s1 + $0x8] sm:$0xff]  ;;  %v5219_v29 = vld [vmem:[%s7863_s1] sm:$0xff]  ;;  %v38_v41 = vld [vmem:[%s7864_s0 + $0x10] sm:$0xff] }
   0xb   :  { %345 = vmatpush.msra.mxu3 %v5135_v15  ;;  %172 = vmatpush.msra.mxu1 %v5147_v17  ;;  %v5202_v26 = vld [vmem:[%s7863_s1 + $0x88] sm:$0xff]  ;;  %v5226_v30 = vld [vmem:[%s7863_s1 + $0x80] sm:$0xff]  ;;  %v5320_v42 = vld [vmem:[%s7864_s0 + $0x70] sm:$0xff] }
   0xc   :  { %255 = vmatpush.msra.mxu2 %v5154_v18  ;;  %108 = vmatpush.msra.mxu0 %v5166_v20  ;;  %v5207_v27 = vld [vmem:[%s7863_s1 + $0xc8] sm:$0xff]  ;;  %v5231_v31 = vld [vmem:[%s7863_s1 + $0xc0] sm:$0xff]  ;;  %v5325_v43 = vld [vmem:[%s7864_s0 + $0x90] sm:$0xff] }
   0xd   :  { %346 = vmatpush.msra.mxu3 %v5159_v19  ;;  %173 = vmatpush.msra.mxu1 %v5171_v21  ;;  %v5238_v32 = vld [vmem:[%s7864_s0 + $0x20] sm:$0xff]  ;;  %v5273_v36 = vld [vmem:[%s7864_s0 + $0x28] sm:$0xff]  ;;  %v5347_v44 = vld [vmem:[%s7864_s0 + $0x38] sm:$0xff] }
   0xe   :  { %256 = vmatpush.msra.mxu2 %v5178_v22  ;;  %109 = vmatpush.msra.mxu0 %v5190_v24  ;;  %v36_v33 = vld [vmem:[%s7864_s0] sm:$0xff]  ;;  %v37_v37 = vld [vmem:[%s7864_s0 + $0x8] sm:$0xff]  ;;  %v39_v45 = vld [vmem:[%s7864_s0 + $0x18] sm:$0xff] }
   0xf   :  { %347 = vmatpush.msra.mxu3 %v5183_v23  ;;  %174 = vmatpush.msra.mxu1 %v5195_v25  ;;  %v5248_v34 = vld [vmem:[%s7864_s0 + $0x60] sm:$0xff]  ;;  %v5283_v38 = vld [vmem:[%s7864_s0 + $0x68] sm:$0xff]  ;;  %v5357_v46 = vld [vmem:[%s7864_s0 + $0x78] sm:$0xff] }
  0x10   :  { %257 = vmatpush.msra.mxu2 %v5202_v26  ;;  %110 = vmatpush.msra.mxu0 %v5214_v28  ;;  %v5253_v35 = vld [vmem:[%s7864_s0 + $0x80] sm:$0xff]  ;;  %v5288_v39 = vld [vmem:[%s7864_s0 + $0x88] sm:$0xff]  ;;  %v5362_v47 = vld [vmem:[%s7864_s0 + $0x98] sm:$0xff] }
  0x11   :  { %348 = vmatpush.msra.mxu3 %v5207_v27  ;;  %175 = vmatpush.msra.mxu1 %v5219_v29  ;;  %v4107_v48 = vld [vmem:[%s7864_s0 + $0x40] sm:$0xff]  ;;  %v4108_v50 = vld [vmem:[%s7864_s0 + $0x48] sm:$0xff]  ;;  %v4109_v52 = vld [vmem:[%s7864_s0 + $0x50] sm:$0xff] }
  0x12   :  { %258 = vmatpush.msra.mxu2 %v5226_v30  ;;  %4119 = vmatmul.msk.f32.vlgmr.msra.gmra.mxu0 %vm70_vm0, %v5238_v32  ;;  %v5389_v49 = vld [vmem:[%s7864_s0 + $0xa0] sm:$0xff]  ;;  %v5416_v51 = vld [vmem:[%s7864_s0 + $0xa8] sm:$0xff]  ;;  %v5439_v53 = vld [vmem:[%s7864_s0 + $0xb0] sm:$0xff] }
  0x13   :  { %349 = vmatpush.msra.mxu3 %v5231_v31  ;;  %4127 = vmatmul.msk.f32.vlgmr.msra.gmra.mxu1 %vm70_vm0, %v36_v33  ;;  %v4110_v54 = vld [vmem:[%s7864_s0 + $0x58] sm:$0xff]  ;;  %v5466_v56 = vld [vmem:[%s7864_s0 + $0xc0] sm:$0xff]  ;;  %v5492_v58 = vld [vmem:[%s7864_s0 + $0xc8] sm:$0xff] }
  0x14   :  { %4151 = vmatmul.msk.f32.vlgmr.msra.gmra.mxu2 %vm70_vm0, %v5248_v34  ;;  %4175 = vmatmul.msk.f32.vlgmr.msra.gmra.mxu3 %vm70_vm0, %v5253_v35  ;;  %v5454_v55 = vld [vmem:[%s7864_s0 + $0xb8] sm:$0xff]  ;;  %v5471_v57 = vld [vmem:[%s7864_s0 + $0xe0] sm:$0xff]  ;;  %v5497_v59 = vld [vmem:[%s7864_s0 + $0xe8] sm:$0xff] }
  0x15   :  { %655 = vmatpush.msrb.mxu2 %v5060_v2  ;;  %745 = vmatpush.msrb.mxu3 %v5067_v3  ;;  %v5522_v60 = vld [vmem:[%s7864_s0 + $0xd0] sm:$0xff]  ;;  %v5552_v62 = vld [vmem:[%s7864_s0 + $0xd8] sm:$0xff] }
  0x16   :  { %508 = vmatpush.msrb.mxu0 %v5050_v0  ;;  %573 = vmatpush.msrb.mxu1 %v5055_v1  ;;  %v5527_v61 = vld [vmem:[%s7864_s0 + $0xf0] sm:$0xff]  ;;  %v5557_v63 = vld [vmem:[%s7864_s0 + $0xf8] sm:$0xff] }
  0x17   :  { %656 = vmatpush.msrb.mxu2 %v5084_v6  ;;  %746 = vmatpush.msrb.mxu3 %v5089_v7 }
  0x18   :  { %509 = vmatpush.msrb.mxu0 %v5072_v4  ;;  %574 = vmatpush.msrb.mxu1 %v5077_v5 }
  0x19   :  { %657 = vmatpush.msrb.mxu2 %v5106_v10  ;;  %747 = vmatpush.msrb.mxu3 %v5111_v11 }
  0x1a   :  { %510 = vmatpush.msrb.mxu0 %v5094_v8  ;;  %575 = vmatpush.msrb.mxu1 %v5101_v9 }
  0x1b   :  { %4120 = vmatmul.msk.f32.gmra.mxu0 %vm70_vm0, %v5273_v36  ;;  %4128 = vmatmul.msk.f32.gmra.mxu1 %vm70_vm0, %v37_v37 }
  0x1c   :  { %4152 = vmatmul.msk.f32.gmra.mxu2 %vm70_vm0, %v5283_v38  ;;  %4176 = vmatmul.msk.f32.gmra.mxu3 %vm70_vm0, %v5288_v39 }
  0x1d   :  { %658 = vmatpush.msrb.mxu2 %v5130_v14  ;;  %748 = vmatpush.msrb.mxu3 %v5135_v15 }
  0x1e   :  { %511 = vmatpush.msrb.mxu0 %v5118_v12  ;;  %576 = vmatpush.msrb.mxu1 %v5123_v13 }
  0x1f   :  { %659 = vmatpush.msrb.mxu2 %v5154_v18  ;;  %749 = vmatpush.msrb.mxu3 %v5159_v19 }
  0x20   :  { %512 = vmatpush.msrb.mxu0 %v5142_v16  ;;  %577 = vmatpush.msrb.mxu1 %v5147_v17 }
  0x21   :  { %660 = vmatpush.msrb.mxu2 %v5178_v22  ;;  %750 = vmatpush.msrb.mxu3 %v5183_v23 }
  0x22   :  { %513 = vmatpush.msrb.mxu0 %v5166_v20  ;;  %578 = vmatpush.msrb.mxu1 %v5171_v21 }
  0x23   :  { %4121 = vmatmul.msk.f32.gmra.mxu0 %vm70_vm0, %v5310_v40  ;;  %4129 = vmatmul.msk.f32.gmra.mxu1 %vm70_vm0, %v38_v41 }
  0x24   :  { %4153 = vmatmul.msk.f32.gmra.mxu2 %vm70_vm0, %v5320_v42  ;;  %4177 = vmatmul.msk.f32.gmra.mxu3 %vm70_vm0, %v5325_v43 }
  0x25   :  { %661 = vmatpush.msrb.mxu2 %v5202_v26  ;;  %751 = vmatpush.msrb.mxu3 %v5207_v27 }
  0x26   :  { %514 = vmatpush.msrb.mxu0 %v5190_v24  ;;  %579 = vmatpush.msrb.mxu1 %v5195_v25 }
  0x27   :  { %662 = vmatpush.msrb.mxu2 %v5226_v30  ;;  %752 = vmatpush.msrb.mxu3 %v5231_v31 }
  0x28   :  { %515 = vmatpush.msrb.mxu0 %v5214_v28  ;;  %580 = vmatpush.msrb.mxu1 %v5219_v29 }
  0x29   :  { %1071 = vmatpush.msra.mxu2 %v5060_v2  ;;  %1161 = vmatpush.msra.mxu3 %v5067_v3 }
  0x2a   :  { %924 = vmatpush.msra.mxu0 %v5050_v0  ;;  %989 = vmatpush.msra.mxu1 %v5055_v1 }
  0x2b   :  { %4122 = vmatmul.msk.f32.gmra.mxu0 %vm70_vm0, %v5347_v44  ;;  %4130 = vmatmul.msk.f32.gmra.mxu1 %vm70_vm0, %v39_v45 }
  0x2c   :  { %4154 = vmatmul.msk.f32.gmra.mxu2 %vm70_vm0, %v5357_v46  ;;  %4178 = vmatmul.msk.f32.gmra.mxu3 %vm70_vm0, %v5362_v47 }
  0x2d   :  { %1072 = vmatpush.msra.mxu2 %v5084_v6  ;;  %1162 = vmatpush.msra.mxu3 %v5089_v7 }
  0x2e   :  { %925 = vmatpush.msra.mxu0 %v5072_v4  ;;  %990 = vmatpush.msra.mxu1 %v5077_v5 }
  0x2f   :  { %1073 = vmatpush.msra.mxu2 %v5106_v10  ;;  %1163 = vmatpush.msra.mxu3 %v5111_v11 }
  0x30   :  { %926 = vmatpush.msra.mxu0 %v5094_v8  ;;  %991 = vmatpush.msra.mxu1 %v5101_v9 }
  0x31   :  { %1074 = vmatpush.msra.mxu2 %v5130_v14  ;;  %1164 = vmatpush.msra.mxu3 %v5135_v15 }
  0x32   :  { %927 = vmatpush.msra.mxu0 %v5118_v12  ;;  %992 = vmatpush.msra.mxu1 %v5123_v13 }
  0x33   :  { %4123 = vmatmul.msk.f32.gmra.mxu0 %vm70_vm0, %v4107_v48  ;;  %4131 = vmatmul.msk.f32.gmra.mxu1 %vm70_vm0, %v5238_v32 }
  0x34   :  { %4155 = vmatmul.msk.f32.gmra.mxu2 %vm70_vm0, %v5253_v35  ;;  %4179 = vmatmul.msk.f32.gmra.mxu3 %vm70_vm0, %v5389_v49 }
  0x35   :  { %1075 = vmatpush.msra.mxu2 %v5154_v18  ;;  %1165 = vmatpush.msra.mxu3 %v5159_v19 }
  0x36   :  { %928 = vmatpush.msra.mxu0 %v5142_v16  ;;  %993 = vmatpush.msra.mxu1 %v5147_v17 }
  0x37   :  { %1076 = vmatpush.msra.mxu2 %v5178_v22  ;;  %1166 = vmatpush.msra.mxu3 %v5183_v23 }
  0x38   :  { %929 = vmatpush.msra.mxu0 %v5166_v20  ;;  %994 = vmatpush.msra.mxu1 %v5171_v21 }
  0x39   :  { %1077 = vmatpush.msra.mxu2 %v5202_v26  ;;  %1167 = vmatpush.msra.mxu3 %v5207_v27 }
  0x3a   :  { %930 = vmatpush.msra.mxu0 %v5190_v24  ;;  %995 = vmatpush.msra.mxu1 %v5195_v25 }
  0x3b   :  { %4124 = vmatmul.msk.f32.gmra.mxu0 %vm70_vm0, %v4108_v50  ;;  %4132 = vmatmul.msk.f32.gmra.mxu1 %vm70_vm0, %v5273_v36 }
  0x3c   :  { %4156 = vmatmul.msk.f32.gmra.mxu2 %vm70_vm0, %v5288_v39  ;;  %4180 = vmatmul.msk.f32.gmra.mxu3 %vm70_vm0, %v5416_v51 }
  0x3d   :  { %1078 = vmatpush.msra.mxu2 %v5226_v30  ;;  %1168 = vmatpush.msra.mxu3 %v5231_v31 }
  0x3e   :  { %931 = vmatpush.msra.mxu0 %v5214_v28  ;;  %996 = vmatpush.msra.mxu1 %v5219_v29 }
  0x43   :  { %4125 = vmatmul.msk.f32.gmra.mxu0 %vm70_vm0, %v4109_v52  ;;  %4133 = vmatmul.msk.f32.gmra.mxu1 %vm70_vm0, %v5310_v40  ;;  %v5689_v40 = vld [vmem:[%s7864_s0 + $0x158] sm:$0xff] }
  0x44   :  { %4157 = vmatmul.msk.f32.gmra.mxu2 %vm70_vm0, %v5325_v43  ;;  %4181 = vmatmul.msk.f32.gmra.mxu3 %vm70_vm0, %v5439_v53 }
  0x4b   :  { %4126 = vmatmul.msk.f32.gmra.mxu0 %vm70_vm0, %v4110_v54  ;;  %4134 = vmatmul.msk.f32.gmra.mxu1 %vm70_vm0, %v5347_v44 }
  0x4c   :  { %4158 = vmatmul.msk.f32.gmra.mxu2 %vm70_vm0, %v5362_v47  ;;  %4182 = vmatmul.msk.f32.gmra.mxu3 %vm70_vm0, %v5454_v55 }
  0x53   :  { %4207 = vmatmul.msk.f32.vlgmr.msrb.gmra.mxu0 %vm70_vm0, %v5253_v35  ;;  %4215 = vmatmul.msk.f32.vlgmr.msrb.gmra.mxu1 %vm70_vm0, %v5248_v34 }
  0x54   :  { %4239 = vmatmul.msk.f32.vlgmr.msrb.gmra.mxu2 %vm70_vm0, %v5466_v56  ;;  %4263 = vmatmul.msk.f32.vlgmr.msrb.gmra.mxu3 %vm70_vm0, %v5471_v57 }
  0x55   :  { %1470 = vmatpush.msrb.mxu2 %v5060_v2  ;;  %1560 = vmatpush.msrb.mxu3 %v5067_v3  ;;  %v5596_v2 = vld [vmem:[%s7864_s0 + $0x110] sm:$0xff]  ;;  %v5609_v3 = vld [vmem:[%s7864_s0 + $0x118] sm:$0xff] }
  0x56   :  { %1323 = vmatpush.msrb.mxu0 %v5050_v0  ;;  %1388 = vmatpush.msrb.mxu1 %v5055_v1  ;;  %v5570_v0 = vld [vmem:[%s7864_s0 + $0x100] sm:$0xff]  ;;  %v5583_v1 = vld [vmem:[%s7864_s0 + $0x108] sm:$0xff] }
  0x57   :  { %1471 = vmatpush.msrb.mxu2 %v5084_v6  ;;  %1561 = vmatpush.msrb.mxu3 %v5089_v7  ;;  %v5622_v6 = vld [vmem:[%s7864_s0 + $0x120] sm:$0xff] }
  0x58   :  { %1324 = vmatpush.msrb.mxu0 %v5072_v4  ;;  %1389 = vmatpush.msrb.mxu1 %v5077_v5  ;;  %v5627_v7 = vld [vmem:[%s7864_s0 + $0x140] sm:$0xff] }
  0x59   :  { %1472 = vmatpush.msrb.mxu2 %v5106_v10  ;;  %1562 = vmatpush.msrb.mxu3 %v5111_v11 }
  0x5a   :  { %1325 = vmatpush.msrb.mxu0 %v5094_v8  ;;  %1390 = vmatpush.msrb.mxu1 %v5101_v9 }
  0x5b   :  { %4208 = vmatmul.msk.f32.gmra.mxu0 %vm70_vm0, %v5288_v39  ;;  %4216 = vmatmul.msk.f32.gmra.mxu1 %vm70_vm0, %v5283_v38 }
  0x5c   :  { %4240 = vmatmul.msk.f32.gmra.mxu2 %vm70_vm0, %v5492_v58  ;;  %4264 = vmatmul.msk.f32.gmra.mxu3 %vm70_vm0, %v5497_v59 }
  0x5d   :  { %1473 = vmatpush.msrb.mxu2 %v5130_v14  ;;  %1563 = vmatpush.msrb.mxu3 %v5135_v15  ;;  %v5645_v15 = vld [vmem:[%s7864_s0 + $0x128] sm:$0xff] }
  0x5e   :  { %1326 = vmatpush.msrb.mxu0 %v5118_v12  ;;  %1391 = vmatpush.msrb.mxu1 %v5123_v13  ;;  %v5640_v12 = vld [vmem:[%s7865_s2] ss:$0 sm:$0xff] }
  0x5f   :  { %1474 = vmatpush.msrb.mxu2 %v5154_v18  ;;  %1564 = vmatpush.msrb.mxu3 %v5159_v19 }
  0x60   :  { %1327 = vmatpush.msrb.mxu0 %v5142_v16  ;;  %1392 = vmatpush.msrb.mxu1 %v5147_v17  ;;  %v5650_v16 = vld [vmem:[%s7864_s0 + $0x148] sm:$0xff] }
  0x61   :  { %1475 = vmatpush.msrb.mxu2 %v5178_v22  ;;  %1565 = vmatpush.msrb.mxu3 %v5183_v23 }
  0x62   :  { %1328 = vmatpush.msrb.mxu0 %v5166_v20  ;;  %1393 = vmatpush.msrb.mxu1 %v5171_v21 }
  0x63   :  { %4209 = vmatmul.msk.f32.gmra.mxu0 %vm70_vm0, %v5325_v43  ;;  %4217 = vmatmul.msk.f32.gmra.mxu1 %vm70_vm0, %v5320_v42 }
  0x64   :  { %4241 = vmatmul.msk.f32.gmra.mxu2 %vm70_vm0, %v5522_v60  ;;  %4265 = vmatmul.msk.f32.gmra.mxu3 %vm70_vm0, %v5527_v61 }
  0x65   :  { %1476 = vmatpush.msrb.mxu2 %v5202_v26  ;;  %1566 = vmatpush.msrb.mxu3 %v5207_v27  ;;  %v5664_v27 = vld [vmem:[%s7864_s0 + $0x130] sm:$0xff] }
  0x66   :  { %1329 = vmatpush.msrb.mxu0 %v5190_v24  ;;  %1394 = vmatpush.msrb.mxu1 %v5195_v25 }
  0x67   :  { %1477 = vmatpush.msrb.mxu2 %v5226_v30  ;;  %1567 = vmatpush.msrb.mxu3 %v5231_v31 }
  0x68   :  { %1330 = vmatpush.msrb.mxu0 %v5214_v28  ;;  %1395 = vmatpush.msrb.mxu1 %v5219_v29  ;;  %v5669_v28 = vld [vmem:[%s7864_s0 + $0x150] sm:$0xff] }
  0x6b   :  { %4210 = vmatmul.msk.f32.gmra.mxu0 %vm70_vm0, %v5362_v47  ;;  %4218 = vmatmul.msk.f32.gmra.mxu1 %vm70_vm0, %v5357_v46 }
  0x6c   :  { %4242 = vmatmul.msk.f32.gmra.mxu2 %vm70_vm0, %v5552_v62  ;;  %4266 = vmatmul.msk.f32.gmra.mxu3 %vm70_vm0, %v5557_v63 }
  0x73   :  { %4211 = vmatmul.msk.f32.gmra.mxu0 %vm70_vm0, %v5389_v49  ;;  %4219 = vmatmul.msk.f32.gmra.mxu1 %vm70_vm0, %v5253_v35 }
  0x74   :  { %4243 = vmatmul.msk.f32.gmra.mxu2 %vm70_vm0, %v5471_v57  ;;  %4267 = vmatmul.msk.f32.gmra.mxu3 %vm70_vm0, %v5570_v0 }
  0x7b   :  { %4212 = vmatmul.msk.f32.gmra.mxu0 %vm70_vm0, %v5416_v51  ;;  %4220 = vmatmul.msk.f32.gmra.mxu1 %vm70_vm0, %v5288_v39  ;;  %v5684_v39 = vld [vmem:[%s7864_s0 + $0x138] sm:$0xff]  ;;  %v5704_v51 = vld [vmem:[%s7864_s0 + $0x160] sm:$0xff] }
  0x7c   :  { %4244 = vmatmul.msk.f32.gmra.mxu2 %vm70_vm0, %v5497_v59  ;;  %4268 = vmatmul.msk.f32.gmra.mxu3 %vm70_vm0, %v5583_v1 }
  0x83   :  { %4213 = vmatmul.msk.f32.gmra.mxu0 %vm70_vm0, %v5439_v53  ;;  %4221 = vmatmul.msk.f32.gmra.mxu1 %vm70_vm0, %v5325_v43 }
  0x84   :  { %4245 = vmatmul.msk.f32.gmra.mxu2 %vm70_vm0, %v5527_v61  ;;  %4269 = vmatmul.msk.f32.gmra.mxu3 %vm70_vm0, %v5596_v2 }
  0x8b   :  { %4214 = vmatmul.msk.f32.gmra.mxu0 %vm70_vm0, %v5454_v55  ;;  %4222 = vmatmul.msk.f32.gmra.mxu1 %vm70_vm0, %v5362_v47  ;;  %v5719_v55 = vld [vmem:[%s7863_s1 + $0xb8] sm:$0xff] }
  0x8c   :  { %4246 = vmatmul.msk.f32.gmra.mxu2 %vm70_vm0, %v5557_v63  ;;  %4270 = vmatmul.msk.f32.gmra.mxu3 %vm70_vm0, %v5609_v3 }
  0x8f   :  { %v112_v4 = vpop.f32.mrf.mxu0 }
  0x90   :  { %v177_v5 = vpop.f32.mrf.mxu1 }
  0x91   :  { %v178_v8 = vadd.f32 %v177_v5, %v112_v4 }
  0x93   :  { %4295 = vmatmul.msk.f32.vlgmr.msra.gmra.mxu0 %vm70_vm0, %v5471_v57  ;;  %4303 = vmatmul.msk.f32.vlgmr.msra.gmra.mxu1 %vm70_vm0, %v5466_v56  ;;  %v5724_v56 = vld [vmem:[%s7863_s1 + $0xf8] sm:$0xff] }
  0x94   :  { %4327 = vmatmul.msk.f32.vlgmr.msra.gmra.mxu2 %vm70_vm0, %v5622_v6  ;;  %4351 = vmatmul.msk.f32.vlgmr.msra.gmra.mxu3 %vm70_vm0, %v5627_v7 }
  0x95   :  { %1884 = vmatpush.msra.mxu2 %v5719_v55  ;;  %1974 = vmatpush.msra.mxu3 %v5724_v56 }
  0x97   :  { %v260_v9 = vpop.f32.mrf.mxu2  ;;  %v351_v10 = vpop.f32.mrf.mxu3 }
  0x98   :  { %v284_v11 = vadd.f32 %v260_v9, %v178_v8  ;;  %v115_v13 = vpop.f32.mrf.mxu0  ;;  %v180_v14 = vpop.f32.mrf.mxu1  ;;  %v5731_v8 = vld [vmem:[%s7864_s0 + $0x168] sm:$0xff] }
  0x99   :  { %v181_v19 = vadd.f32 %v180_v14, %v115_v13  ;;  %v5746_v13 = vld [vmem:[%s7863_s1 + $0x78] sm:$0xff]  ;;  %v5763_v14 = vld [vmem:[%s7863_s1 + $0xf0] sm:$0xff] }
  0x9a   :  { %v375_v17 = vadd.f32 %v351_v10, %v284_v11  ;;  %1737 = vmatpush.msra.mxu0 %v5746_v13  ;;  %1975 = vmatpush.msra.mxu3 %v5763_v14 }
  0x9b   :  { %4296 = vmatmul.msk.f32.gmra.mxu0 %vm70_vm0, %v5497_v59  ;;  %4304 = vmatmul.msk.f32.gmra.mxu1 %vm70_vm0, %v5492_v58 }
  0x9c   :  { %v386_v18 = vadd.f32 %v5640_v12, %v375_v17  ;;  %4328 = vmatmul.msk.f32.gmra.mxu2 %vm70_vm0, %v5645_v15  ;;  %4352 = vmatmul.msk.f32.gmra.mxu3 %vm70_vm0, %v5650_v16 }
  0x9e   :  { %v402_v20 = vmul.f32 0.01, %v386_v18  ;;  %vm394_vm2 = vcmp.ge.f32.partialorder %v386_v18, 0.0 }
  0x9f   :  { %v263_v21 = vpop.f32.mrf.mxu2  ;;  %v354_v22 = vpop.f32.mrf.mxu3 }
  0xa0   :  { %v285_v23 = vadd.f32 %v263_v21, %v181_v19  ;;  %v118_v24 = vpop.f32.mrf.mxu0  ;;  %v183_v25 = vpop.f32.mrf.mxu1  ;;  %v410_v26 = vsel %vm394_vm2, %v386_v18, %v402_v20 }
  0xa1   :  { %419 = vst.msk [vmem:[#allocation2] sm:$0xff] %vm418_vm1, %v410_v26  ;;  %v184_v31 = vadd.f32 %v183_v25, %v118_v24  ;;  %v5771_v24 = vld [vmem:[%s7864_s0 + $0x170] sm:$0xff] }
  0xa2   :  { %v376_v29 = vadd.f32 %v354_v22, %v285_v23 }
  0xa3   :  { %4297 = vmatmul.msk.f32.gmra.mxu0 %vm70_vm0, %v5527_v61  ;;  %4305 = vmatmul.msk.f32.gmra.mxu1 %vm70_vm0, %v5522_v60 }
  0xa4   :  { %v387_v30 = vadd.f32 %v5640_v12, %v376_v29  ;;  %4329 = vmatmul.msk.f32.gmra.mxu2 %vm70_vm0, %v5664_v27  ;;  %4353 = vmatmul.msk.f32.gmra.mxu3 %vm70_vm0, %v5669_v28 }
  0xa6   :  { %v403_v32 = vmul.f32 0.01, %v387_v30  ;;  %vm395_vm3 = vcmp.ge.f32.partialorder %v387_v30, 0.0 }
  0xa7   :  { %v266_v33 = vpop.f32.mrf.mxu2  ;;  %v357_v34 = vpop.f32.mrf.mxu3 }
  0xa8   :  { %v286_v35 = vadd.f32 %v266_v33, %v184_v31  ;;  %v121_v36 = vpop.f32.mrf.mxu0  ;;  %v186_v37 = vpop.f32.mrf.mxu1  ;;  %v411_v38 = vsel %vm395_vm3, %v387_v30, %v403_v32  ;;  %v5785_v30 = vld [vmem:[%s7863_s1 + $0x70] sm:$0xff]  ;;  %v5802_v31 = vld [vmem:[%s7863_s1 + $0xe8] sm:$0xff] }
  0xa9   :  { %420 = vst.msk [vmem:[#allocation2 + $0x8] sm:$0xff] %vm418_vm1, %v411_v38  ;;  %v187_v43 = vadd.f32 %v186_v37, %v121_v36  ;;  %1738 = vmatpush.msra.mxu0 %v5785_v30  ;;  %1976 = vmatpush.msra.mxu3 %v5802_v31 }
  0xaa   :  { %v377_v41 = vadd.f32 %v357_v34, %v286_v35 }
  0xab   :  { %4298 = vmatmul.msk.f32.gmra.mxu0 %vm70_vm0, %v5557_v63  ;;  %4306 = vmatmul.msk.f32.gmra.mxu1 %vm70_vm0, %v5552_v62 }
  0xac   :  { %v388_v42 = vadd.f32 %v5640_v12, %v377_v41  ;;  %4330 = vmatmul.msk.f32.gmra.mxu2 %vm70_vm0, %v5684_v39  ;;  %4354 = vmatmul.msk.f32.gmra.mxu3 %vm70_vm0, %v5689_v40  ;;  %v5810_v41 = vld [vmem:[%s7864_s0 + $0x178] sm:$0xff] }
  0xae   :  { %v404_v44 = vmul.f32 0.01, %v388_v42  ;;  %vm396_vm4 = vcmp.ge.f32.partialorder %v388_v42, 0.0 }
  0xaf   :  { %v269_v45 = vpop.f32.mrf.mxu2  ;;  %v360_v46 = vpop.f32.mrf.mxu3 }
  0xb0   :  { %v287_v47 = vadd.f32 %v269_v45, %v187_v43  ;;  %v124_v48 = vpop.f32.mrf.mxu0  ;;  %v189_v49 = vpop.f32.mrf.mxu1  ;;  %v412_v50 = vsel %vm396_vm4, %v388_v42, %v404_v44  ;;  %v5824_v45 = vld [vmem:[%s7863_s1 + $0x68] sm:$0xff]  ;;  %vm834_vm4 = vcmask 785920  }
  0xb1   :  { %421 = vst.msk [vmem:[#allocation2 + $0x10] sm:$0xff] %vm418_vm1, %v412_v50  ;;  %v190_v54 = vadd.f32 %v189_v49, %v124_v48  ;;  %1739 = vmatpush.msra.mxu0 %v5824_v45 }
  0xb2   :  { %v378_v52 = vadd.f32 %v360_v46, %v287_v47  ;;  %v5841_v46 = vld [vmem:[%s7863_s1 + $0xe0] sm:$0xff] }
  0xb3   :  { %4299 = vmatmul.msk.f32.gmra.mxu0 %vm70_vm0, %v5570_v0  ;;  %4307 = vmatmul.msk.f32.gmra.mxu1 %vm70_vm0, %v5471_v57 }
  0xb4   :  { %v389_v53 = vadd.f32 %v5640_v12, %v378_v52  ;;  %4331 = vmatmul.msk.f32.gmra.mxu2 %vm70_vm0, %v5627_v7  ;;  %4355 = vmatmul.msk.f32.gmra.mxu3 %vm70_vm0, %v5704_v51 }
  0xb5   :  { %1977 = vmatpush.msra.mxu3 %v5841_v46 }
  0xb6   :  { %v405_v57 = vmul.f32 0.01, %v389_v53  ;;  %vm397_vm5 = vcmp.ge.f32.partialorder %v389_v53, 0.0 }
  0xb7   :  { %v272_v58 = vpop.f32.mrf.mxu2  ;;  %v363_v60 = vpop.f32.mrf.mxu3 }
  0xb8   :  { %v288_v62 = vadd.f32 %v272_v58, %v190_v54  ;;  %v127_v0 = vpop.f32.mrf.mxu0  ;;  %v192_v4 = vpop.f32.mrf.mxu1  ;;  %v413_v5 = vsel %vm397_vm5, %v389_v53, %v405_v57  ;;  %v5849_v57 = vld [vmem:[%s7864_s0 + $0x180] sm:$0xff] }
  0xb9   :  { %422 = vst.msk [vmem:[#allocation2 + $0x18] sm:$0xff] %vm418_vm1, %v413_v5  ;;  %v193_v11 = vadd.f32 %v192_v4, %v127_v0  ;;  %v5854_v58 = vld [vmem:[%s7864_s0 + $0x1a0] sm:$0xff]  ;;  %v5886_v5 = vld [vmem:[%s7863_s1 + $0xd8] sm:$0xff] }
  0xba   :  { %v379_v9 = vadd.f32 %v363_v60, %v288_v62  ;;  %v5869_v0 = vld [vmem:[%s7863_s1 + $0x60] sm:$0xff]  ;;  %1978 = vmatpush.msra.mxu3 %v5886_v5 }
  0xbb   :  { %4300 = vmatmul.msk.f32.gmra.mxu0 %vm70_vm0, %v5583_v1  ;;  %4308 = vmatmul.msk.f32.gmra.mxu1 %vm70_vm0, %v5497_v59  ;;  %v5751_v1 = vld [vmem:[%s7863_s1 + $0x38] sm:$0xff]  ;;  %v5756_v59 = vld [vmem:[%s7863_s1 + $0xb0] sm:$0xff]  ;;  %v5874_v4 = vld [vmem:[%s7863_s1 + $0x20] sm:$0xff] }
  0xbc   :  { %v390_v10 = vadd.f32 %v5640_v12, %v379_v9  ;;  %4332 = vmatmul.msk.f32.gmra.mxu2 %vm70_vm0, %v5650_v16  ;;  %4356 = vmatmul.msk.f32.gmra.mxu3 %vm70_vm0, %v5731_v8 }
  0xbd   :  { %1802 = vmatpush.msra.mxu1 %v5751_v1  ;;  %1885 = vmatpush.msra.mxu2 %v5756_v59 }
  0xbe   :  { %vm398_vm6 = vcmp.ge.f32.partialorder %v390_v10, 0.0  ;;  %v406_v17 = vmul.f32 0.01, %v390_v10  ;;  %1740 = vmatpush.msra.mxu0 %v5869_v0 }
  0xbf   :  { %v275_v18 = vpop.f32.mrf.mxu2  ;;  %v366_v19 = vpop.f32.mrf.mxu3 }
  0xc0   :  { %v289_v20 = vadd.f32 %v275_v18, %v193_v11  ;;  %v130_v21 = vpop.f32.mrf.mxu0  ;;  %v195_v22 = vpop.f32.mrf.mxu1  ;;  %v414_v23 = vsel %vm398_vm6, %v390_v10, %v406_v17 }
  0xc1   :  { %427 = vrot.lane.b32.xlu2 %v414_v23, %s4994_s11  ;;  %v196_v29 = vadd.f32 %v195_v22, %v130_v21 }
  0xc2   :  { %v380_v25 = vadd.f32 %v366_v19, %v289_v20  ;;  %v5893_v19 = vld [vmem:[%s7864_s0 + $0x188] sm:$0xff] }
  0xc3   :  { %4301 = vmatmul.msk.f32.gmra.mxu0 %vm70_vm0, %v5596_v2  ;;  %4309 = vmatmul.msk.f32.gmra.mxu1 %vm70_vm0, %v5527_v61  ;;  %v5790_v2 = vld [vmem:[%s7863_s1 + $0x30] sm:$0xff]  ;;  %v5795_v61 = vld [vmem:[%s7863_s1 + $0xa8] sm:$0xff] }
  0xc4   :  { %v391_v26 = vadd.f32 %v5640_v12, %v380_v25  ;;  %4333 = vmatmul.msk.f32.gmra.mxu2 %vm70_vm0, %v5669_v28  ;;  %4357 = vmatmul.msk.f32.gmra.mxu3 %vm70_vm0, %v5771_v24  ;;  %v5898_v20 = vld [vmem:[%s7864_s0 + $0x1a8] sm:$0xff]  ;;  %v5912_v25 = vld [vmem:[%s7863_s1 + $0x58] sm:$0xff] }
  0xc5   :  { %1803 = vmatpush.msra.mxu1 %v5790_v2  ;;  %1886 = vmatpush.msra.mxu2 %v5795_v61 }
  0xc6   :  { %vm399_vm7 = vcmp.ge.f32.partialorder %v391_v26, 0.0  ;;  %v407_v32 = vmul.f32 0.01, %v391_v26  ;;  %1741 = vmatpush.msra.mxu0 %v5912_v25 }
  0xc7   :  { %v278_v33 = vpop.f32.mrf.mxu2  ;;  %v369_v34 = vpop.f32.mrf.mxu3 }
  0xc8   :  { %v290_v35 = vadd.f32 %v278_v33, %v196_v29  ;;  %v133_v36 = vpop.f32.mrf.mxu0  ;;  %v198_v37 = vpop.f32.mrf.mxu1  ;;  %v415_v38 = vsel %vm399_vm7, %v391_v26, %v407_v32  ;;  %v5917_v26 = vld [vmem:[%s7863_s1 + $0x18] sm:$0xff]  ;;  %v5929_v29 = vld [vmem:[%s7863_s1 + $0xd0] sm:$0xff] }
  0xc9   :  { %429 = vrot.lane.b32.xlu0 %v415_v38, %s4994_s11  ;;  %v199_v44 = vadd.f32 %v198_v37, %v133_v36  ;;  %1979 = vmatpush.msra.mxu3 %v5929_v29 }
  0xca   :  { %v381_v42 = vadd.f32 %v369_v34, %v290_v35 }
  0xcb   :  { %4302 = vmatmul.msk.f32.gmra.mxu0 %vm70_vm0, %v5609_v3  ;;  %4310 = vmatmul.msk.f32.gmra.mxu1 %vm70_vm0, %v5557_v63  ;;  %v5829_v3 = vld [vmem:[%s7863_s1 + $0x28] sm:$0xff]  ;;  %v5834_v63 = vld [vmem:[%s7863_s1 + $0xa0] sm:$0xff] }
  0xcc   :  { %v392_v43 = vadd.f32 %v5640_v12, %v381_v42  ;;  %4334 = vmatmul.msk.f32.gmra.mxu2 %vm70_vm0, %v5689_v40  ;;  %4358 = vmatmul.msk.f32.gmra.mxu3 %vm70_vm0, %v5810_v41  ;;  %v5937_v42 = vld [vmem:[%s7864_s0 + $0x190] sm:$0xff] }
  0xcd   :  { %1804 = vmatpush.msra.mxu1 %v5829_v3  ;;  %1887 = vmatpush.msra.mxu2 %v5834_v63 }
  0xce   :  { %vm400_vm8 = vcmp.ge.f32.partialorder %v392_v43, 0.0  ;;  %v408_v47 = vmul.f32 0.01, %v392_v43 }
  0xcf   :  { %v281_v48 = vpop.f32.mrf.mxu2  ;;  %v372_v49 = vpop.f32.mrf.mxu3  ;;  %1805 = vmatpush.msra.mxu1 %v5874_v4 }
  0xd0   :  { %v291_v50 = vadd.f32 %v281_v48, %v199_v44  ;;  %v517_v52 = vpop.f32.mrf.mxu0  ;;  %v582_v53 = vpop.f32.mrf.mxu1  ;;  %v416_v54 = vsel %vm400_vm8, %v392_v43, %v408_v47  ;;  %v5942_v43 = vld [vmem:[%s7864_s0 + $0x1b0] sm:$0xff] }
  0xd1   :  { %431 = vrot.lane.b32.xlu2 %v416_v54, %s4994_s11  ;;  %v583_v62 = vadd.f32 %v582_v53, %v517_v52  ;;  %1806 = vmatpush.msra.mxu1 %v5917_v26  ;;  %v5973_v52 = vld [vmem:[%s7863_s1 + $0xc8] sm:$0xff] }
  0xd2   :  { %v5856_v60 = vadd.f32 %v372_v49, %v291_v50  ;;  %v5956_v49 = vld [vmem:[%s7863_s1 + $0x50] sm:$0xff]  ;;  %1980 = vmatpush.msra.mxu3 %v5973_v52 }
  0xd3   :  { %4383 = vmatmul.msk.f32.vlgmr.msrb.gmra.mxu0 %vm70_vm0, %v5627_v7  ;;  %4391 = vmatmul.msk.f32.vlgmr.msrb.gmra.mxu1 %vm70_vm0, %v5622_v6  ;;  %v5879_v6 = vld [vmem:[%s7863_s1 + $0x98] sm:$0xff]  ;;  %v5961_v50 = vld [vmem:[%s7863_s1 + $0x10] sm:$0xff] }
  0xd4   :  { %4415 = vmatmul.msk.f32.vlgmr.msrb.gmra.mxu2 %vm70_vm0, %v5849_v57  ;;  %4439 = vmatmul.msk.f32.vlgmr.msrb.gmra.mxu3 %vm70_vm0, %v5854_v58 }
  0xd5   :  { %1888 = vmatpush.msra.mxu2 %v5879_v6  ;;  %1742 = vmatpush.msra.mxu0 %v5956_v49 }
  0xd6   :  { %1807 = vmatpush.msra.mxu1 %v5961_v50 }
  0xd7   :  { %v664_v9 = vpop.f32.mrf.mxu2  ;;  %v754_v10 = vpop.f32.mrf.mxu3 }
  0xd8   :  { %v688_v11 = vadd.f32 %v664_v9, %v583_v62  ;;  %v520_v17 = vpop.f32.mrf.mxu0  ;;  %v585_v18 = vpop.f32.mrf.mxu1 }
  0xd9   :  { %v586_v23 = vadd.f32 %v585_v18, %v520_v17  ;;  %v5981_v18 = vld [vmem:[%s7864_s0 + $0x198] sm:$0xff] }
  0xda   :  { %v778_v21 = vadd.f32 %v754_v10, %v688_v11 }
  0xdb   :  { %4384 = vmatmul.msk.f32.gmra.mxu0 %vm70_vm0, %v5650_v16  ;;  %4392 = vmatmul.msk.f32.gmra.mxu1 %vm70_vm0, %v5645_v15  ;;  %v5922_v15 = vld [vmem:[%s7863_s1 + $0x90] sm:$0xff] }
  0xdc   :  { %v786_v22 = vadd.f32 %v5640_v12, %v778_v21  ;;  %4416 = vmatmul.msk.f32.gmra.mxu2 %vm70_vm0, %v5893_v19  ;;  %4440 = vmatmul.msk.f32.gmra.mxu3 %vm70_vm0, %v5898_v20  ;;  %v5986_v21 = vld [vmem:[%s7864_s0 + $0x1b8] sm:$0xff] }
  0xdd   :  { %1889 = vmatpush.msra.mxu2 %v5922_v15 }
  0xde   :  { %vm794_vm9 = vcmp.ge.f32.partialorder %v786_v22, 0.0  ;;  %v802_v32 = vmul.f32 0.01, %v786_v22 }
  0xdf   :  { %v667_v33 = vpop.f32.mrf.mxu2  ;;  %v757_v34 = vpop.f32.mrf.mxu3 }
  0xe0   :  { %v689_v35 = vadd.f32 %v667_v33, %v586_v23  ;;  %v523_v36 = vpop.f32.mrf.mxu0  ;;  %v588_v37 = vpop.f32.mrf.mxu1  ;;  %v810_v38 = vsel %vm794_vm9, %v786_v22, %v802_v32  ;;  %v6001_v32 = vld [vmem:[%s7863_s1 + $0x48] sm:$0xff]  ;;  %vm855_vm9 = vcmask 1048320  }
  0xe1   :  { %822 = vrot.lane.b32.xlu2 %v810_v38, %s4995_s16  ;;  %v589_v48 = vadd.f32 %v588_v37, %v523_v36  ;;  %v6006_v33 = vld [vmem:[%s7863_s1 + $0x8] sm:$0xff]  ;;  %1743 = vmatpush.msra.mxu0 %v6001_v32 }
  0xe2   :  { %v779_v44 = vadd.f32 %v757_v34, %v689_v35  ;;  %1808 = vmatpush.msra.mxu1 %v6006_v33  ;;  %v6018_v34 = vld [vmem:[%s7863_s1 + $0xc0] sm:$0xff] }
  0xe3   :  { %4385 = vmatmul.msk.f32.gmra.mxu0 %vm70_vm0, %v5669_v28  ;;  %4393 = vmatmul.msk.f32.gmra.mxu1 %vm70_vm0, %v5664_v27  ;;  %v5966_v27 = vld [vmem:[%s7863_s1 + $0x88] sm:$0xff] }
  0xe4   :  { %v787_v47 = vadd.f32 %v5640_v12, %v779_v44  ;;  %4417 = vmatmul.msk.f32.gmra.mxu2 %vm70_vm0, %v5937_v42  ;;  %4441 = vmatmul.msk.f32.gmra.mxu3 %vm70_vm0, %v5942_v43 }
  0xe5   :  { %1890 = vmatpush.msra.mxu2 %v5966_v27  ;;  %1981 = vmatpush.msra.mxu3 %v6018_v34 }
  0xe6   :  { %vm795_vm10 = vcmp.ge.f32.partialorder %v787_v47, 0.0  ;;  %v803_v53 = vmul.f32 0.01, %v787_v47 }
  0xe7   :  { %v670_v54 = vpop.f32.mrf.mxu2  ;;  %v760_v62 = vpop.f32.mrf.mxu3  ;;  %2373 = vmatpush.msrb.mxu3 %v5724_v56 }
  0xe8   :  { %v690_v9 = vadd.f32 %v670_v54, %v589_v48  ;;  %v526_v10 = vpop.f32.mrf.mxu0  ;;  %v591_v11 = vpop.f32.mrf.mxu1  ;;  %v811_v17 = vsel %vm795_vm10, %v787_v47, %v803_v53  ;;  %v6027_v47 = vld [vmem:[%s7864_s0 + $0x1c0] sm:$0xff] }
  0xe9   :  { %824 = vrot.lane.b32.xlu0 %v811_v17, %s4995_s16  ;;  %v592_v23 = vadd.f32 %v591_v11, %v526_v10  ;;  %2374 = vmatpush.msrb.mxu3 %v5763_v14  ;;  %v6036_v53 = vld [vmem:[%s7863_s1 + $0x40] sm:$0xff]  ;;  %v6062_v17 = vld [vmem:[%s7864_s0 + $0x1c8] sm:$0xff] }
  0xea   :  { %v5988_v22 = vadd.f32 %v760_v62, %v690_v9  ;;  %v6041_v54 = vld [vmem:[%s7863_s1] sm:$0xff]  ;;  %1744 = vmatpush.msra.mxu0 %v6036_v53 }
  0xeb   :  { %4386 = vmatmul.msk.f32.gmra.mxu0 %vm70_vm0, %v5689_v40  ;;  %4394 = vmatmul.msk.f32.gmra.mxu1 %vm70_vm0, %v5684_v39  ;;  %v6011_v39 = vld [vmem:[%s7863_s1 + $0x80] sm:$0xff] }
  0xec   :  { %4418 = vmatmul.msk.f32.gmra.mxu2 %vm70_vm0, %v5981_v18  ;;  %4442 = vmatmul.msk.f32.gmra.mxu3 %vm70_vm0, %v5986_v21 }
  0xed   :  { %1891 = vmatpush.msra.mxu2 %v6011_v39  ;;  %1809 = vmatpush.msra.mxu1 %v6041_v54 }
  0xee   :  { %2136 = vmatpush.msrb.mxu0 %v5746_v13  ;;  %2375 = vmatpush.msrb.mxu3 %v5802_v31 }
  0xef   :  { %v673_v35 = vpop.f32.mrf.mxu2  ;;  %v763_v36 = vpop.f32.mrf.mxu3  ;;  %2283 = vmatpush.msrb.mxu2 %v5719_v55  ;;  %2201 = vmatpush.msrb.mxu1 %v5751_v1 }
  0xf0   :  { %v691_v37 = vadd.f32 %v673_v35, %v592_v23  ;;  %v529_v38 = vpop.f32.mrf.mxu0  ;;  %v594_v44 = vpop.f32.mrf.mxu1  ;;  %2137 = vmatpush.msrb.mxu0 %v5785_v30  ;;  %2376 = vmatpush.msrb.mxu3 %v5841_v46 }
  0xf1   :  { %2284 = vmatpush.msrb.mxu2 %v5756_v59  ;;  %v595_v62 = vadd.f32 %v594_v44, %v529_v38  ;;  %2202 = vmatpush.msrb.mxu1 %v5790_v2 }
  0xf2   :  { %v6031_v48 = vadd.f32 %v763_v36, %v691_v37  ;;  %2138 = vmatpush.msrb.mxu0 %v5824_v45  ;;  %2377 = vmatpush.msrb.mxu3 %v5886_v5 }
  0xf3   :  { %4387 = vmatmul.msk.f32.gmra.mxu0 %vm70_vm0, %v5704_v51  ;;  %4395 = vmatmul.msk.f32.gmra.mxu1 %vm70_vm0, %v5627_v7 }
  0xf4   :  { %4419 = vmatmul.msk.f32.gmra.mxu2 %vm70_vm0, %v5854_v58  ;;  %4443 = vmatmul.msk.f32.gmra.mxu3 %vm70_vm0, %v6027_v47 }
  0xf5   :  { %2285 = vmatpush.msrb.mxu2 %v5795_v61  ;;  %2203 = vmatpush.msrb.mxu1 %v5829_v3 }
  0xf6   :  { %2139 = vmatpush.msrb.mxu0 %v5869_v0  ;;  %2378 = vmatpush.msrb.mxu3 %v5929_v29 }
  0xf7   :  { %v676_v9 = vpop.f32.mrf.mxu2  ;;  %v766_v51 = vpop.f32.mrf.mxu3  ;;  %2286 = vmatpush.msrb.mxu2 %v5834_v63  ;;  %2204 = vmatpush.msrb.mxu1 %v5874_v4 }
  0xf8   :  { %v692_v7 = vadd.f32 %v676_v9, %v595_v62  ;;  %v532_v10 = vpop.f32.mrf.mxu0  ;;  %v597_v11 = vpop.f32.mrf.mxu1  ;;  %2140 = vmatpush.msrb.mxu0 %v5912_v25  ;;  %2379 = vmatpush.msrb.mxu3 %v5973_v52 }
  0xf9   :  { %v598_v36 = vadd.f32 %v597_v11, %v532_v10  ;;  %2287 = vmatpush.msrb.mxu2 %v5879_v6  ;;  %2205 = vmatpush.msrb.mxu1 %v5917_v26 }
  0xfa   :  { %v782_v23 = vadd.f32 %v766_v51, %v692_v7  ;;  %v6089_v51 = vld [vmem:[%s7864_s0 + $0x1d0] sm:$0xff]  ;;  %2141 = vmatpush.msrb.mxu0 %v5956_v49  ;;  %2380 = vmatpush.msrb.mxu3 %v6018_v34 }
  0xfb   :  { %4388 = vmatmul.msk.f32.gmra.mxu0 %vm70_vm0, %v5731_v8  ;;  %4396 = vmatmul.msk.f32.gmra.mxu1 %vm70_vm0, %v5650_v16 }
  0xfc   :  { %v790_v35 = vadd.f32 %v5640_v12, %v782_v23  ;;  %4420 = vmatmul.msk.f32.gmra.mxu2 %vm70_vm0, %v5898_v20  ;;  %4444 = vmatmul.msk.f32.gmra.mxu3 %vm70_vm0, %v6062_v17 }
  0xfd   :  { %2288 = vmatpush.msrb.mxu2 %v5922_v15  ;;  %2206 = vmatpush.msrb.mxu1 %v5961_v50 }
  0xfe   :  { %vm798_vm11 = vcmp.ge.f32.partialorder %v790_v35, 0.0  ;;  %v806_v37 = vmul.f32 0.01, %v790_v35  ;;  %2142 = vmatpush.msrb.mxu0 %v6001_v32 }
  0xff   :  { %v679_v16 = vpop.f32.mrf.mxu2  ;;  %v769_v8 = vpop.f32.mrf.mxu3  ;;  %2289 = vmatpush.msrb.mxu2 %v5966_v27  ;;  %2207 = vmatpush.msrb.mxu1 %v6006_v33 }
 0x100   :  { %v693_v38 = vadd.f32 %v679_v16, %v598_v36  ;;  %v535_v44 = vpop.f32.mrf.mxu0  ;;  %v600_v62 = vpop.f32.mrf.mxu1  ;;  %v814_v9 = vsel %vm798_vm11, %v790_v35, %v806_v37  ;;  %2143 = vmatpush.msrb.mxu0 %v6036_v53 }
 0x101   :  { %843 = vrot.lane.b32.xlu1 %v814_v9, %s4996_s30  ;;  %v601_v11 = vadd.f32 %v600_v62, %v535_v44  ;;  %2290 = vmatpush.msrb.mxu2 %v6011_v39 }
 0x102   :  { %v783_v7 = vadd.f32 %v769_v8, %v693_v38  ;;  %2208 = vmatpush.msrb.mxu1 %v6041_v54  ;;  %v6114_v8 = vld [vmem:[%s7864_s0 + $0x1d8] sm:$0xff] }
 0x103   :  { %4389 = vmatmul.msk.f32.gmra.mxu0 %vm70_vm0, %v5771_v24  ;;  %4397 = vmatmul.msk.f32.gmra.mxu1 %vm70_vm0, %v5669_v28 }
 0x104   :  { %v791_v10 = vadd.f32 %v5640_v12, %v783_v7  ;;  %4421 = vmatmul.msk.f32.gmra.mxu2 %vm70_vm0, %v5942_v43  ;;  %4445 = vmatmul.msk.f32.gmra.mxu3 %vm70_vm0, %v6089_v51 }
 0x106   :  { %vm799_vm12 = vcmp.ge.f32.partialorder %v791_v10, 0.0  ;;  %v807_v23 = vmul.f32 0.01, %v791_v10 }
 0x107   :  { %v682_v28 = vpop.f32.mrf.mxu2  ;;  %v772_v24 = vpop.f32.mrf.mxu3 }
 0x108   :  { %v694_v35 = vadd.f32 %v682_v28, %v601_v11  ;;  %v538_v36 = vpop.f32.mrf.mxu0  ;;  %v603_v37 = vpop.f32.mrf.mxu1  ;;  %v815_v16 = vsel %vm799_vm12, %v791_v10, %v807_v23  ;;  %v6129_v23 = vld [vmem:[%s7864_s0 + $0x1e0] sm:$0xff] }
 0x109   :  { %845 = vrot.lane.b32.xlu2 %v815_v16, %s4996_s30  ;;  %v604_v44 = vadd.f32 %v603_v37, %v538_v36 }
 0x10a   :  { %v6116_v38 = vadd.f32 %v772_v24, %v694_v35 }
 0x10b   :  { %4390 = vmatmul.msk.f32.gmra.mxu0 %vm70_vm0, %v5810_v41  ;;  %4398 = vmatmul.msk.f32.gmra.mxu1 %vm70_vm0, %v5689_v40  ;;  %v6134_v40 = vld [vmem:[%s7864_s0 + $0x200] sm:$0xff] }
 0x10c   :  { %4422 = vmatmul.msk.f32.gmra.mxu2 %vm70_vm0, %v5986_v21  ;;  %4446 = vmatmul.msk.f32.gmra.mxu3 %vm70_vm0, %v6114_v8 }
 0x10f   :  { %v685_v62 = vpop.f32.mrf.mxu2  ;;  %v775_v9 = vpop.f32.mrf.mxu3 }
 0x110   :  { %v695_v7 = vadd.f32 %v685_v62, %v604_v44  ;;  %v933_v10 = vpop.f32.mrf.mxu0  ;;  %v998_v11 = vpop.f32.mrf.mxu1 }
 0x111   :  { %v999_v28 = vadd.f32 %v998_v11, %v933_v10 }
 0x112   :  { %v6136_v41 = vadd.f32 %v775_v9, %v695_v7 }
 0x113   :  { %4471 = vmatmul.msk.f32.vlgmr.msra.gmra.mxu0 %vm70_vm0, %v5854_v58  ;;  %4479 = vmatmul.msk.f32.vlgmr.msra.gmra.mxu1 %vm70_vm0, %v5849_v57 }
 0x114   :  { %4503 = vmatmul.msk.f32.vlgmr.msra.gmra.mxu2 %vm70_vm0, %v6129_v23  ;;  %4527 = vmatmul.msk.f32.vlgmr.msra.gmra.mxu3 %vm70_vm0, %v6134_v40 }
 0x115   :  { %2697 = vmatpush.msra.mxu2 %v5719_v55  ;;  %2787 = vmatpush.msra.mxu3 %v5724_v56  ;;  %v6157_v55 = vld [vmem:[%s7864_s0 + $0x1e8] sm:$0xff] }
 0x116   :  { %2550 = vmatpush.msra.mxu0 %v5746_v13  ;;  %2615 = vmatpush.msra.mxu1 %v5751_v1  ;;  %v6162_v56 = vld [vmem:[%s7864_s0 + $0x208] sm:$0xff] }
 0x117   :  { %v1080_v24 = vpop.f32.mrf.mxu2  ;;  %v1170_v35 = vpop.f32.mrf.mxu3  ;;  %2698 = vmatpush.msra.mxu2 %v5756_v59  ;;  %2788 = vmatpush.msra.mxu3 %v5763_v14 }
 0x118   :  { %v1104_v57 = vadd.f32 %v1080_v24, %v999_v28  ;;  %v936_v36 = vpop.f32.mrf.mxu0  ;;  %v1001_v37 = vpop.f32.mrf.mxu1  ;;  %2551 = vmatpush.msra.mxu0 %v5785_v30  ;;  %2616 = vmatpush.msra.mxu1 %v5790_v2 }
 0x119   :  { %2699 = vmatpush.msra.mxu2 %v5795_v61  ;;  %2789 = vmatpush.msra.mxu3 %v5802_v31  ;;  %v1002_v14 = vadd.f32 %v1001_v37, %v936_v36 }
 0x11a   :  { %v1194_v13 = vadd.f32 %v1170_v35, %v1104_v57  ;;  %2552 = vmatpush.msra.mxu0 %v5824_v45  ;;  %2617 = vmatpush.msra.mxu1 %v5829_v3 }
 0x11b   :  { %v428_v1 = vpop.permute.xlu2 %427  ;;  %4472 = vmatmul.msk.f32.gmra.mxu0 %vm70_vm0, %v5898_v20  ;;  %4480 = vmatmul.msk.f32.gmra.mxu1 %vm70_vm0, %v5893_v19 }
 0x11c   :  { %v1202_v59 = vadd.f32 %v5640_v12, %v1194_v13  ;;  %440 = vst.msk [vmem:[#allocation2] sm:$0xff] %vm439_vm13, %v428_v1  ;;  %4504 = vmatmul.msk.f32.gmra.mxu2 %vm70_vm0, %v6157_v55  ;;  %4528 = vmatmul.msk.f32.gmra.mxu3 %vm70_vm0, %v6162_v56 }
 0x11d   :  { %2700 = vmatpush.msra.mxu2 %v5834_v63  ;;  %2790 = vmatpush.msra.mxu3 %v5841_v46  ;;  %v6189_v46 = vld [vmem:[%s7864_s0 + $0x1f0] sm:$0xff] }
 0x11e   :  { %v1218_v30 = vmul.f32 0.01, %v1202_v59  ;;  %2553 = vmatpush.msra.mxu0 %v5869_v0  ;;  %2618 = vmatpush.msra.mxu1 %v5874_v4  ;;  %vm1210_vm14 = vcmp.ge.f32.partialorder %v1202_v59, 0.0  ;;  %v6194_v0 = vld [vmem:[%s7864_s0 + $0x210] sm:$0xff] }
 0x11f   :  { %v1083_v2 = vpop.f32.mrf.mxu2  ;;  %v1173_v61 = vpop.f32.mrf.mxu3  ;;  %2701 = vmatpush.msra.mxu2 %v5879_v6  ;;  %2791 = vmatpush.msra.mxu3 %v5886_v5 }
 0x120   :  { %v1105_v31 = vadd.f32 %v1083_v2, %v1002_v14  ;;  %v939_v45 = vpop.f32.mrf.mxu0  ;;  %v1004_v3 = vpop.f32.mrf.mxu1  ;;  %2554 = vmatpush.msra.mxu0 %v5912_v25  ;;  %2619 = vmatpush.msra.mxu1 %v5917_v26  ;;  %v1226_v63 = vsel %vm1210_vm14, %v1202_v59, %v1218_v30 }
 0x121   :  { %2702 = vmatpush.msra.mxu2 %v5922_v15  ;;  %2792 = vmatpush.msra.mxu3 %v5929_v29  ;;  %1235 = vst.msk [vmem:[#allocation2 + $0x20] sm:$0xff] %vm418_vm1, %v1226_v63  ;;  %v1005_v5 = vadd.f32 %v1004_v3, %v939_v45  ;;  %v6275_v63 = vld [vmem:[%s7864_s0 + $0x230] sm:$0xff] }
 0x122   :  { %v1195_v4 = vadd.f32 %v1173_v61, %v1105_v31  ;;  %2555 = vmatpush.msra.mxu0 %v5956_v49  ;;  %2620 = vmatpush.msra.mxu1 %v5961_v50  ;;  %v6221_v50 = vld [vmem:[%s7864_s0 + $0x1f8] sm:$0xff] }
 0x123   :  { %4473 = vmatmul.msk.f32.gmra.mxu0 %vm70_vm0, %v5942_v43  ;;  %4481 = vmatmul.msk.f32.gmra.mxu1 %vm70_vm0, %v5937_v42 }
 0x124   :  { %v1203_v6 = vadd.f32 %v5640_v12, %v1195_v4  ;;  %4505 = vmatmul.msk.f32.gmra.mxu2 %vm70_vm0, %v6189_v46  ;;  %4529 = vmatmul.msk.f32.gmra.mxu3 %vm70_vm0, %v6194_v0 }
 0x125   :  { %2703 = vmatpush.msra.mxu2 %v5966_v27  ;;  %2793 = vmatpush.msra.mxu3 %v5973_v52  ;;  %v6226_v27 = vld [vmem:[%s7864_s0 + $0x218] sm:$0xff] }
 0x126   :  { %v1219_v19 = vmul.f32 0.01, %v1203_v6  ;;  %2556 = vmatpush.msra.mxu0 %v6001_v32  ;;  %2621 = vmatpush.msra.mxu1 %v6006_v33  ;;  %vm1211_vm15 = vcmp.ge.f32.partialorder %v1203_v6, 0.0 }
 0x127   :  { %v1086_v25 = vpop.f32.mrf.mxu2  ;;  %v1176_v26 = vpop.f32.mrf.mxu3  ;;  %2704 = vmatpush.msra.mxu2 %v6011_v39  ;;  %2794 = vmatpush.msra.mxu3 %v6018_v34 }
 0x128   :  { %v1106_v15 = vadd.f32 %v1086_v25, %v1005_v5  ;;  %v942_v29 = vpop.f32.mrf.mxu0  ;;  %v1007_v42 = vpop.f32.mrf.mxu1  ;;  %2557 = vmatpush.msra.mxu0 %v6036_v53  ;;  %2622 = vmatpush.msra.mxu1 %v6041_v54  ;;  %v1227_v49 = vsel %vm1211_vm15, %v1203_v6, %v1219_v19 }
 0x129   :  { %1236 = vst.msk [vmem:[#allocation2 + $0x28] sm:$0xff] %vm418_vm1, %v1227_v49  ;;  %v1008_v39 = vadd.f32 %v1007_v42, %v942_v29 }
 0x12a   :  { %v1196_v52 = vadd.f32 %v1176_v26, %v1106_v15 }
 0x12b   :  { %v432_v32 = vpop.permute.xlu2 %431  ;;  %4474 = vmatmul.msk.f32.gmra.mxu0 %vm70_vm0, %v5986_v21  ;;  %4482 = vmatmul.msk.f32.gmra.mxu1 %vm70_vm0, %v5981_v18  ;;  %v6242_v18 = vld [vmem:[%s7864_s0 + $0x220] sm:$0xff] }
 0x12c   :  { %v1204_v33 = vadd.f32 %v5640_v12, %v1196_v52  ;;  %442 = vst.msk [vmem:[#allocation2 + $0x10] sm:$0xff] %vm439_vm13, %v432_v32  ;;  %4506 = vmatmul.msk.f32.gmra.mxu2 %vm70_vm0, %v6221_v50  ;;  %4530 = vmatmul.msk.f32.gmra.mxu3 %vm70_vm0, %v6226_v27 }
 0x12e   :  { %v1220_v34 = vmul.f32 0.01, %v1204_v33  ;;  %vm1212_vm2 = vcmp.ge.f32.partialorder %v1204_v33, 0.0 }
 0x12f   :  { %v1089_v53 = vpop.f32.mrf.mxu2  ;;  %v1179_v54 = vpop.f32.mrf.mxu3 }
 0x130   :  { %v1107_v16 = vadd.f32 %v1089_v53, %v1008_v39  ;;  %v945_v44 = vpop.f32.mrf.mxu0  ;;  %v1010_v62 = vpop.f32.mrf.mxu1  ;;  %v1228_v9 = vsel %vm1212_vm2, %v1204_v33, %v1220_v34 }
 0x131   :  { %1237 = vst.msk [vmem:[#allocation2 + $0x30] sm:$0xff] %vm418_vm1, %v1228_v9  ;;  %v1011_v11 = vadd.f32 %v1010_v62, %v945_v44 }
 0x132   :  { %v1197_v7 = vadd.f32 %v1179_v54, %v1107_v16 }
 0x133   :  { %4475 = vmatmul.msk.f32.gmra.mxu0 %vm70_vm0, %v6027_v47  ;;  %4483 = vmatmul.msk.f32.gmra.mxu1 %vm70_vm0, %v5854_v58  ;;  %v6257_v58 = vld [vmem:[%s7864_s0 + $0x228] sm:$0xff] }
 0x134   :  { %v1205_v10 = vadd.f32 %v5640_v12, %v1197_v7  ;;  %4507 = vmatmul.msk.f32.gmra.mxu2 %vm70_vm0, %v6134_v40  ;;  %4531 = vmatmul.msk.f32.gmra.mxu3 %vm70_vm0, %v6242_v18 }
 0x136   :  { %v1221_v28 = vmul.f32 0.01, %v1205_v10  ;;  %vm1213_vm3 = vcmp.ge.f32.partialorder %v1205_v10, 0.0 }
 0x137   :  { %v1092_v24 = vpop.f32.mrf.mxu2  ;;  %v1182_v35 = vpop.f32.mrf.mxu3 }
 0x138   :  { %v1108_v57 = vadd.f32 %v1092_v24, %v1011_v11  ;;  %v948_v36 = vpop.f32.mrf.mxu0  ;;  %v1013_v37 = vpop.f32.mrf.mxu1  ;;  %v1229_v47 = vsel %vm1213_vm3, %v1205_v10, %v1221_v28  ;;  %v6323_v28 = vld [vmem:[%s7864_s0 + $0x248] sm:$0xff] }
 0x139   :  { %1238 = vst.msk [vmem:[#allocation2 + $0x38] sm:$0xff] %vm418_vm1, %v1229_v47  ;;  %v1014_v30 = vadd.f32 %v1013_v37, %v948_v36  ;;  %v6337_v36 = vld [vmem:[%s7865_s2] ss:$0 sm:$0xff] }
 0x13a   :  { %v1198_v13 = vadd.f32 %v1182_v35, %v1108_v57 }
 0x13b   :  { %v430_v1 = vpop.permute.xlu0 %429  ;;  %v823_v59 = vpop.permute.xlu2 %822  ;;  %4476 = vmatmul.msk.f32.gmra.mxu0 %vm70_vm0, %v6062_v17  ;;  %4484 = vmatmul.msk.f32.gmra.mxu1 %vm70_vm0, %v5898_v20 }
 0x13c   :  { %v1206_v14 = vadd.f32 %v5640_v12, %v1198_v13  ;;  %441 = vst.msk [vmem:[#allocation2 + $0x8] sm:$0xff] %vm439_vm13, %v430_v1  ;;  %4508 = vmatmul.msk.f32.gmra.mxu2 %vm70_vm0, %v6162_v56  ;;  %4532 = vmatmul.msk.f32.gmra.mxu3 %vm70_vm0, %v6257_v58 }
 0x13d   :  { %835 = vst.msk [vmem:[#allocation2] sm:$0xff] %vm834_vm4, %v823_v59 }
 0x13e   :  { %vm1214_vm5 = vcmp.ge.f32.partialorder %v1206_v14, 0.0  ;;  %v1222_v2 = vmul.f32 0.01, %v1206_v14 }
 0x13f   :  { %v1095_v61 = vpop.f32.mrf.mxu2  ;;  %v1185_v17 = vpop.f32.mrf.mxu3 }
 0x140   :  { %v1109_v31 = vadd.f32 %v1095_v61, %v1014_v30  ;;  %v951_v45 = vpop.f32.mrf.mxu0  ;;  %v1016_v20 = vpop.f32.mrf.mxu1  ;;  %v1230_v3 = vsel %vm1214_vm5, %v1206_v14, %v1222_v2 }
 0x141   :  { %1243 = vrot.lane.b32.xlu0 %v1230_v3, %s4994_s11  ;;  %v1017_v5 = vadd.f32 %v1016_v20, %v951_v45 }
 0x142   :  { %v1199_v4 = vadd.f32 %v1185_v17, %v1109_v31  ;;  %v6350_v17 = vld [vmem:[%s7864_s0 + $0x250] sm:$0xff] }
 0x143   :  { %4477 = vmatmul.msk.f32.gmra.mxu0 %vm70_vm0, %v6089_v51  ;;  %4485 = vmatmul.msk.f32.gmra.mxu1 %vm70_vm0, %v5942_v43  ;;  %v6290_v43 = vld [vmem:[%s7864_s0 + $0x238] sm:$0xff]  ;;  %v6355_v31 = vld [vmem:[%s7864_s0 + $0x270] sm:$0xff] }
 0x144   :  { %v1207_v6 = vadd.f32 %v5640_v12, %v1199_v4  ;;  %4509 = vmatmul.msk.f32.gmra.mxu2 %vm70_vm0, %v6194_v0  ;;  %4533 = vmatmul.msk.f32.gmra.mxu3 %vm70_vm0, %v6275_v63 }
 0x146   :  { %vm1215_vm6 = vcmp.ge.f32.partialorder %v1207_v6, 0.0  ;;  %v1223_v19 = vmul.f32 0.01, %v1207_v6 }
 0x147   :  { %v1098_v25 = vpop.f32.mrf.mxu2  ;;  %v1188_v26 = vpop.f32.mrf.mxu3 }
 0x148   :  { %v1110_v15 = vadd.f32 %v1098_v25, %v1017_v5  ;;  %v954_v29 = vpop.f32.mrf.mxu0  ;;  %v1019_v42 = vpop.f32.mrf.mxu1  ;;  %v1231_v51 = vsel %vm1215_vm6, %v1207_v6, %v1223_v19 }
 0x149   :  { %1245 = vrot.lane.b32.xlu1 %v1231_v51, %s4994_s11 }
 0x14a   :  { %v1200_v49 = vadd.f32 %v1188_v26, %v1110_v15 }
 0x14b   :  { %4478 = vmatmul.msk.f32.gmra.mxu0 %vm70_vm0, %v6114_v8  ;;  %4486 = vmatmul.msk.f32.gmra.mxu1 %vm70_vm0, %v5986_v21  ;;  %v6305_v21 = vld [vmem:[%s7864_s0 + $0x240] sm:$0xff]  ;;  %v1020_v8 = vadd.f32 %v1019_v42, %v954_v29 }
 0x14c   :  { %v1208_v52 = vadd.f32 %v5640_v12, %v1200_v49  ;;  %4510 = vmatmul.msk.f32.gmra.mxu2 %vm70_vm0, %v6226_v27  ;;  %4534 = vmatmul.msk.f32.gmra.mxu3 %vm70_vm0, %v6290_v43  ;;  %v6310_v12 = vld [vmem:[%s7864_s0 + $0x260] sm:$0xff]  ;;  %v6378_v49 = vld [vmem:[%s7864_s0 + $0x258] sm:$0xff] }
 0x14e   :  { %vm1216_vm7 = vcmp.ge.f32.partialorder %v1208_v52, 0.0  ;;  %v1224_v32 = vmul.f32 0.01, %v1208_v52 }
 0x14f   :  { %v1101_v33 = vpop.f32.mrf.mxu2  ;;  %v1191_v39 = vpop.f32.mrf.mxu3 }
 0x150   :  { %v1332_v34 = vpop.f32.mrf.mxu0  ;;  %v1397_v53 = vpop.f32.mrf.mxu1  ;;  %v1232_v54 = vsel %vm1216_vm7, %v1208_v52, %v1224_v32  ;;  %v1111_v9 = vadd.f32 %v1101_v33, %v1020_v8 }
 0x151   :  { %1247 = vrot.lane.b32.xlu0 %v1232_v54, %s4994_s11  ;;  %v1398_v16 = vadd.f32 %v1397_v53, %v1332_v34  ;;  %v393_v54 = vadd.f32 %v6337_v36, %v5856_v60 }
 0x152   :  { %v1201_v57 = vadd.f32 %v1191_v39, %v1111_v9 }
 0x153   :  { %4559 = vmatmul.msk.f32.vlgmr.msrb.gmra.mxu0 %vm70_vm0, %v6134_v40  ;;  %4567 = vmatmul.msk.f32.vlgmr.msrb.gmra.mxu1 %vm70_vm0, %v6129_v23  ;;  %v6328_v23 = vld [vmem:[%s7864_s0 + $0x268] sm:$0xff]  ;;  %vm401_vm15 = vcmp.ge.f32.partialorder %v393_v54, 0.0 }
 0x154   :  { %4591 = vmatmul.msk.f32.vlgmr.msrb.gmra.mxu2 %vm70_vm0, %v6305_v21  ;;  %4615 = vmatmul.msk.f32.vlgmr.msrb.gmra.mxu3 %vm70_vm0, %v6310_v12  ;;  %v1209_v59 = vadd.f32 %v6337_v36, %v1201_v57 }
 0x156   :  { %v1225_v6 = vmul.f32 0.01, %v1209_v59  ;;  %vm1217_vm10 = vcmp.ge.f32.partialorder %v1209_v59, 0.0 }
 0x157   :  { %v1479_v44 = vpop.f32.mrf.mxu2  ;;  %v1569_v62 = vpop.f32.mrf.mxu3 }
 0x158   :  { %v1503_v7 = vadd.f32 %v1479_v44, %v1398_v16  ;;  %v1335_v10 = vpop.f32.mrf.mxu0  ;;  %v1400_v11 = vpop.f32.mrf.mxu1  ;;  %v1233_v42 = vsel %vm1217_vm10, %v1209_v59, %v1225_v6 }
 0x159   :  { %v1401_v47 = vadd.f32 %v1400_v11, %v1335_v10  ;;  %v4766_v10 = vld [vmem:[%s7863_s1 + $0xb8] sm:$0xff] }
 0x15a   :  { %v1593_v24 = vadd.f32 %v1569_v62, %v1503_v7  ;;  %v6405_v62 = vld [vmem:[%s7864_s0 + $0x280] sm:$0xff]  ;;  %v409_v7 = vmul.f32 0.01, %v393_v54  ;;  %3096 = vmatpush.msrb.mxu2 %v4766_v10 }
 0x15b   :  { %v825_v35 = vpop.permute.xlu0 %824  ;;  %4560 = vmatmul.msk.f32.gmra.mxu0 %vm70_vm0, %v6162_v56  ;;  %4568 = vmatmul.msk.f32.gmra.mxu1 %vm70_vm0, %v6157_v55 }
 0x15c   :  { %v1601_v37 = vadd.f32 %v6337_v36, %v1593_v24  ;;  %836 = vst.msk [vmem:[#allocation2 + $0x8] sm:$0xff] %vm834_vm4, %v825_v35  ;;  %4592 = vmatmul.msk.f32.gmra.mxu2 %vm70_vm0, %v6323_v28  ;;  %4616 = vmatmul.msk.f32.gmra.mxu3 %vm70_vm0, %v6328_v23  ;;  %v793_v24 = vadd.f32 %v6337_v36, %v6136_v41 }
 0x15e   :  { %vm1609_vm8 = vcmp.ge.f32.partialorder %v1601_v37, 0.0  ;;  %v1617_v13 = vmul.f32 0.01, %v1601_v37  ;;  %v809_v59 = vmul.f32 0.01, %v793_v24  ;;  %vm801_vm2 = vcmp.ge.f32.partialorder %v793_v24, 0.0 }
 0x15f   :  { %v1482_v55 = vpop.f32.mrf.mxu2  ;;  %v1572_v1 = vpop.f32.mrf.mxu3 }
 0x160   :  { %v1504_v14 = vadd.f32 %v1482_v55, %v1401_v47  ;;  %v1338_v30 = vpop.f32.mrf.mxu0  ;;  %v1403_v2 = vpop.f32.mrf.mxu1  ;;  %v1625_v61 = vsel %vm1609_vm8, %v1601_v37, %v1617_v13  ;;  %v417_v47 = vsel %vm401_vm15, %v393_v54, %v409_v7  ;;  %v6428_v13 = vld [vmem:[%s7864_s0 + $0x288] sm:$0xff] }
 0x161   :  { %1637 = vrot.lane.b32.xlu0 %v1625_v61, %s4995_s16  ;;  %v1404_v4 = vadd.f32 %v1403_v2, %v1338_v30  ;;  %v4765_v30 = vld [vmem:[%s7863_s1 + $0xb0] sm:$0xff] }
 0x162   :  { %v1594_v45 = vadd.f32 %v1572_v1, %v1504_v14  ;;  %3097 = vmatpush.msrb.mxu2 %v4765_v30 }
 0x163   :  { %v846_v20 = vpop.permute.xlu2 %845  ;;  %4561 = vmatmul.msk.f32.gmra.mxu0 %vm70_vm0, %v6194_v0  ;;  %4569 = vmatmul.msk.f32.gmra.mxu1 %vm70_vm0, %v6189_v46  ;;  %v792_v46 = vadd.f32 %v6337_v36, %v6116_v38  ;;  %v6383_v38 = vld [vmem:[%s7864_s0 + $0x278] sm:$0xff] }
 0x164   :  { %v1602_v3 = vadd.f32 %v6337_v36, %v1594_v45  ;;  %857 = vst.msk [vmem:[#allocation2 + $0x8] sm:$0xff] %vm855_vm9, %v846_v20  ;;  %4593 = vmatmul.msk.f32.gmra.mxu2 %vm70_vm0, %v6350_v17  ;;  %4617 = vmatmul.msk.f32.gmra.mxu3 %vm70_vm0, %v6355_v31  ;;  %v4789_v45 = vld [vmem:[%s7863_s1 + $0xf0] sm:$0xff] }
 0x165   :  { %v808_v33 = vmul.f32 0.01, %v792_v46  ;;  %vm800_vm12 = vcmp.ge.f32.partialorder %v792_v46, 0.0 }
 0x166   :  { %vm1610_vm11 = vcmp.ge.f32.partialorder %v1602_v3, 0.0  ;;  %v1618_v5 = vmul.f32 0.01, %v1602_v3 }
 0x167   :  { %v1485_v19 = vpop.f32.mrf.mxu2  ;;  %v1575_v25 = vpop.f32.mrf.mxu3  ;;  %v816_v44 = vsel %vm800_vm12, %v792_v46, %v808_v33  ;;  %v4788_v33 = vld [vmem:[%s7863_s1 + $0xe8] sm:$0xff] }
 0x168   :  { %v1505_v26 = vadd.f32 %v1485_v19, %v1404_v4  ;;  %v6369_v15 = vpop.f32.mrf.mxu0  ;;  %v6371_v29 = vpop.f32.mrf.mxu1  ;;  %v1626_v51 = vsel %vm1610_vm11, %v1602_v3, %v1618_v5  ;;  %v817_v5 = vsel %vm801_vm2, %v793_v24, %v809_v59  ;;  %v6456_v19 = vld [vmem:[%s7864_s0 + $0x290] sm:$0xff]  ;;  %v4787_v24 = vld [vmem:[%s7863_s1 + $0xe0] sm:$0xff] }
 0x169   :  { %1249 = vrot.lane.b32.xlu0 %v1233_v42, %s4994_s11  ;;  %1639 = vrot.lane.b32.xlu2 %v1626_v51, %s4995_s16  ;;  %v1407_v46 = vadd.f32 %v6371_v29, %v6369_v15  ;;  %v4764_v15 = vld [vmem:[%s7863_s1 + $0xa8] sm:$0xff]  ;;  %v788_v29 = vadd.f32 %v6337_v36, %v5988_v22  ;;  %v6488_v22 = vld [vmem:[%s7864_s0 + $0x298] sm:$0xff] }
 0x16a   :  { %v1595_v52 = vadd.f32 %v1575_v25, %v1505_v26  ;;  %3098 = vmatpush.msrb.mxu2 %v4764_v15 }
 0x16b   :  { %4562 = vmatmul.msk.f32.gmra.mxu0 %vm70_vm0, %v6226_v27  ;;  %4570 = vmatmul.msk.f32.gmra.mxu1 %vm70_vm0, %v6221_v50  ;;  %vm796_vm6 = vcmp.ge.f32.partialorder %v788_v29, 0.0 }
 0x16c   :  { %v1603_v32 = vadd.f32 %v6337_v36, %v1595_v52  ;;  %4594 = vmatmul.msk.f32.gmra.mxu2 %vm70_vm0, %v6378_v49  ;;  %4618 = vmatmul.msk.f32.gmra.mxu3 %vm70_vm0, %v6383_v38 }
 0x16e   :  { %vm1611_vm14 = vcmp.ge.f32.partialorder %v1603_v32, 0.0  ;;  %v1619_v39 = vmul.f32 0.01, %v1603_v32 }
 0x16f   :  { %v6394_v34 = vpop.f32.mrf.mxu2  ;;  %v6396_v53 = vpop.f32.mrf.mxu3 }
 0x170   :  { %v1344_v50 = vpop.f32.mrf.mxu0  ;;  %v1409_v8 = vpop.f32.mrf.mxu1  ;;  %v1627_v16 = vsel %vm1611_vm14, %v1603_v32, %v1619_v39  ;;  %v1506_v39 = vadd.f32 %v6394_v34, %v1407_v46  ;;  %v804_v34 = vmul.f32 0.01, %v788_v29 }
 0x171   :  { %1641 = vrot.lane.b32.xlu1 %v1627_v16, %s4995_s16  ;;  %847 = vrot.lane.b32.xlu2 %v816_v44, %s4996_s30  ;;  %v1410_v60 = vadd.f32 %v1409_v8, %v1344_v50 }
 0x173   :  { %v844_v9 = vpop.permute.xlu1 %843  ;;  %4563 = vmatmul.msk.f32.gmra.mxu0 %vm70_vm0, %v6242_v18  ;;  %4571 = vmatmul.msk.f32.gmra.mxu1 %vm70_vm0, %v6134_v40  ;;  %v4790_v40 = vld [vmem:[%s7863_s1 + $0xf8] sm:$0xff] }
 0x174   :  { %856 = vst.msk [vmem:[#allocation2] sm:$0xff] %vm855_vm9, %v844_v9  ;;  %4595 = vmatmul.msk.f32.gmra.mxu2 %vm70_vm0, %v6310_v12  ;;  %4619 = vmatmul.msk.f32.gmra.mxu3 %vm70_vm0, %v6405_v62  ;;  %v1596_v9 = vadd.f32 %v6396_v53, %v1506_v39  ;;  %v4763_v53 = vld [vmem:[%s7863_s1 + $0xa0] sm:$0xff] }
 0x175   :  { %3186 = vmatpush.msrb.mxu3 %v4790_v40  ;;  %3099 = vmatpush.msrb.mxu2 %v4763_v53  ;;  %v2895_v53 = vld [vmem:[%s7863_s1 + $0x10] sm:$0xff] }
 0x177   :  { %v1491_v18 = vpop.f32.mrf.mxu2  ;;  %v1581_v11 = vpop.f32.mrf.mxu3  ;;  %3187 = vmatpush.msrb.mxu3 %v4789_v45  ;;  %v789_v45 = vadd.f32 %v6337_v36, %v6031_v48  ;;  %v6553_v48 = vld [vmem:[%s7864_s0 + $0x2a8] sm:$0xff] }
 0x178   :  { %v1507_v35 = vadd.f32 %v1491_v18, %v1410_v60  ;;  %v1347_v57 = vpop.f32.mrf.mxu0  ;;  %v1412_v37 = vpop.f32.mrf.mxu1 }
 0x179   :  { %433 = vrot.lane.b32.xlu2 %v417_v47, %s4994_s11  ;;  %v1413_v1 = vadd.f32 %v1412_v37, %v1347_v57  ;;  %3188 = vmatpush.msrb.mxu3 %v4788_v33  ;;  %v805_v15 = vmul.f32 0.01, %v789_v45  ;;  %vm797_vm11 = vcmp.ge.f32.partialorder %v789_v45, 0.0 }
 0x17a   :  { %v1597_v55 = vadd.f32 %v1581_v11, %v1507_v35  ;;  %v812_v11 = vsel %vm796_vm6, %v788_v29, %v804_v34  ;;  %v1604_v35 = vadd.f32 %v6337_v36, %v1596_v9  ;;  %v4730_v29 = vld [vmem:[%s7863_s1 + $0x58] sm:$0xff]  ;;  %v6585_v9 = vld [vmem:[%s7864_s0 + $0x2b0] sm:$0xff] }
 0x17b   :  { %4564 = vmatmul.msk.f32.gmra.mxu0 %vm70_vm0, %v6257_v58  ;;  %4572 = vmatmul.msk.f32.gmra.mxu1 %vm70_vm0, %v6162_v56  ;;  %v4734_v58 = vld [vmem:[%s7863_s1 + $0x78] sm:$0xff] }
 0x17c   :  { %v1605_v41 = vadd.f32 %v6337_v36, %v1597_v55  ;;  %4596 = vmatmul.msk.f32.gmra.mxu2 %vm70_vm0, %v6328_v23  ;;  %4620 = vmatmul.msk.f32.gmra.mxu3 %vm70_vm0, %v6428_v13  ;;  %v2900_v56 = vld [vmem:[%s7863_s1 + $0x38] sm:$0xff]  ;;  %vm1612_vm8 = vcmp.ge.f32.partialorder %v1604_v35, 0.0 }
 0x17d   :  { %2949 = vmatpush.msrb.mxu0 %v4734_v58  ;;  %3014 = vmatpush.msrb.mxu1 %v2900_v56  ;;  %v1620_v56 = vmul.f32 0.01, %v1604_v35 }
 0x17e   :  { %vm1613_vm3 = vcmp.ge.f32.partialorder %v1605_v41, 0.0  ;;  %v1621_v14 = vmul.f32 0.01, %v1605_v41  ;;  %3189 = vmatpush.msrb.mxu3 %v4787_v24 }
 0x17f   :  { %v1494_v2 = vpop.f32.mrf.mxu2  ;;  %v1584_v61 = vpop.f32.mrf.mxu3  ;;  %v1628_v46 = vsel %vm1612_vm8, %v1604_v35, %v1620_v56 }
 0x180   :  { %v1508_v20 = vadd.f32 %v1494_v2, %v1413_v1  ;;  %v1350_v3 = vpop.f32.mrf.mxu0  ;;  %v1415_v4 = vpop.f32.mrf.mxu1  ;;  %v1629_v6 = vsel %vm1613_vm3, %v1605_v41, %v1621_v14  ;;  %v6518_v41 = vld [vmem:[%s7864_s0 + $0x2a0] sm:$0xff] }
 0x181   :  { %1657 = vrot.lane.b32.xlu1 %v1629_v6, %s4996_s30  ;;  %849 = vrot.lane.b32.xlu2 %v817_v5, %s4996_s30  ;;  %v1416_v42 = vadd.f32 %v1415_v4, %v1350_v3  ;;  %v6523_v1 = vld [vmem:[%s7864_s0 + $0x2c0] sm:$0xff]  ;;  %v4786_v4 = vld [vmem:[%s7863_s1 + $0xd8] sm:$0xff] }
 0x182   :  { %v1598_v25 = vadd.f32 %v1584_v61, %v1508_v20  ;;  %v4731_v2 = vld [vmem:[%s7863_s1 + $0x60] sm:$0xff]  ;;  %v4762_v61 = vld [vmem:[%s7863_s1 + $0x98] sm:$0xff]  ;;  %3190 = vmatpush.msrb.mxu3 %v4786_v4 }
 0x183   :  { %4565 = vmatmul.msk.f32.gmra.mxu0 %vm70_vm0, %v6275_v63  ;;  %4573 = vmatmul.msk.f32.gmra.mxu1 %vm70_vm0, %v6194_v0  ;;  %v4733_v63 = vld [vmem:[%s7863_s1 + $0x70] sm:$0xff] }
 0x184   :  { %v1606_v26 = vadd.f32 %v6337_v36, %v1598_v25  ;;  %4597 = vmatmul.msk.f32.gmra.mxu2 %vm70_vm0, %v6355_v31  ;;  %4621 = vmatmul.msk.f32.gmra.mxu3 %vm70_vm0, %v6456_v19  ;;  %v2899_v0 = vld [vmem:[%s7863_s1 + $0x30] sm:$0xff] }
 0x185   :  { %2950 = vmatpush.msrb.mxu0 %v4733_v63  ;;  %3015 = vmatpush.msrb.mxu1 %v2899_v0 }
 0x186   :  { %vm1614_vm5 = vcmp.ge.f32.partialorder %v1606_v26, 0.0  ;;  %v1622_v51 = vmul.f32 0.01, %v1606_v26  ;;  %3100 = vmatpush.msrb.mxu2 %v4762_v61 }
 0x187   :  { %v1497_v52 = vpop.f32.mrf.mxu2  ;;  %v1587_v32 = vpop.f32.mrf.mxu3 }
 0x188   :  { %v1509_v54 = vadd.f32 %v1497_v52, %v1416_v42  ;;  %v1353_v50 = vpop.f32.mrf.mxu0  ;;  %v1418_v8 = vpop.f32.mrf.mxu1  ;;  %v1630_v16 = vsel %vm1614_vm5, %v1606_v26, %v1622_v51  ;;  %v6558_v42 = vld [vmem:[%s7864_s0 + $0x2c8] sm:$0xff]  ;;  %v2896_v52 = vld [vmem:[%s7863_s1 + $0x18] sm:$0xff] }
 0x189   :  { %1659 = vrot.lane.b32.xlu1 %v1630_v16, %s4996_s30  ;;  %v1419_v7 = vadd.f32 %v1418_v8, %v1353_v50 }
 0x18a   :  { %v1599_v44 = vadd.f32 %v1587_v32, %v1509_v54  ;;  %v4785_v32 = vld [vmem:[%s7863_s1 + $0xd0] sm:$0xff] }
 0x18b   :  { %4566 = vmatmul.msk.f32.gmra.mxu0 %vm70_vm0, %v6290_v43  ;;  %4574 = vmatmul.msk.f32.gmra.mxu1 %vm70_vm0, %v6226_v27  ;;  %v4732_v43 = vld [vmem:[%s7863_s1 + $0x68] sm:$0xff] }
 0x18c   :  { %v1607_v60 = vadd.f32 %v6337_v36, %v1599_v44  ;;  %4598 = vmatmul.msk.f32.gmra.mxu2 %vm70_vm0, %v6383_v38  ;;  %4622 = vmatmul.msk.f32.gmra.mxu3 %vm70_vm0, %v6488_v22  ;;  %v2898_v27 = vld [vmem:[%s7863_s1 + $0x28] sm:$0xff]  ;;  %v813_v44 = vsel %vm797_vm11, %v789_v45, %v805_v15 }
 0x18d   :  { %2951 = vmatpush.msrb.mxu0 %v4732_v43  ;;  %3016 = vmatpush.msrb.mxu1 %v2898_v27  ;;  %v4729_v27 = vld [vmem:[%s7863_s1 + $0x50] sm:$0xff] }
 0x18e   :  { %vm1615_vm7 = vcmp.ge.f32.partialorder %v1607_v60, 0.0  ;;  %v1623_v10 = vmul.f32 0.01, %v1607_v60  ;;  %3191 = vmatpush.msrb.mxu3 %v4785_v32 }
 0x18f   :  { %v1500_v40 = vpop.f32.mrf.mxu2  ;;  %v1590_v18 = vpop.f32.mrf.mxu3  ;;  %2952 = vmatpush.msrb.mxu0 %v4731_v2  ;;  %v2894_v2 = vld [vmem:[%s7863_s1 + $0x8] sm:$0xff] }
 0x190   :  { %v1510_v57 = vadd.f32 %v1500_v40, %v1419_v7  ;;  %v1746_v37 = vpop.f32.mrf.mxu0  ;;  %v1811_v47 = vpop.f32.mrf.mxu1  ;;  %v1631_v55 = vsel %vm1615_vm7, %v1607_v60, %v1623_v10  ;;  %v6590_v60 = vld [vmem:[%s7864_s0 + $0x2d0] sm:$0xff]  ;;  %v4784_v40 = vld [vmem:[%s7863_s1 + $0xc8] sm:$0xff] }
 0x191   :  { %826 = vrot.lane.b32.xlu1 %v812_v11, %s4995_s16  ;;  %1661 = vrot.lane.b32.xlu0 %v1631_v55, %s4996_s30  ;;  %v1812_v58 = vadd.f32 %v1811_v47, %v1746_v37  ;;  %v6617_v55 = vld [vmem:[%s7864_s0 + $0x2b8] sm:$0xff] }
 0x192   :  { %v1600_v59 = vadd.f32 %v1590_v18, %v1510_v57  ;;  %2953 = vmatpush.msrb.mxu0 %v4730_v29  ;;  %3192 = vmatpush.msrb.mxu3 %v4784_v40 }
 0x193   :  { %4647 = vmatmul.msk.f32.vlgmr.msra.gmra.mxu0 %vm70_vm0, %v6310_v12  ;;  %4655 = vmatmul.msk.f32.vlgmr.msra.gmra.mxu1 %vm70_vm0, %v6305_v21  ;;  %v2897_v21 = vld [vmem:[%s7863_s1 + $0x20] sm:$0xff] }
 0x194   :  { %v1608_v14 = vadd.f32 %v6337_v36, %v1600_v59  ;;  %4679 = vmatmul.msk.f32.vlgmr.msra.gmra.mxu2 %vm70_vm0, %v6518_v41  ;;  %4703 = vmatmul.msk.f32.vlgmr.msra.gmra.mxu3 %vm70_vm0, %v6523_v1  ;;  %v6622_v59 = vld [vmem:[%s7864_s0 + $0x2d8] sm:$0xff] }
 0x195   :  { %3017 = vmatpush.msrb.mxu1 %v2897_v21  ;;  %2954 = vmatpush.msrb.mxu0 %v4729_v27  ;;  %v4783_v21 = vld [vmem:[%s7863_s1 + $0xc0] sm:$0xff] }
 0x196   :  { %vm1616_vm10 = vcmp.ge.f32.partialorder %v1608_v14, 0.0  ;;  %v1624_v30 = vmul.f32 0.01, %v1608_v14  ;;  %3193 = vmatpush.msrb.mxu3 %v4783_v21  ;;  %v3314_v21 = vld [vmem:[%s7866_s3 + $0x60] sm:$0xff] }
 0x197   :  { %v1893_v20 = vpop.f32.mrf.mxu2  ;;  %v1983_v3 = vpop.f32.mrf.mxu3  ;;  %3018 = vmatpush.msrb.mxu1 %v2896_v52 }
 0x198   :  { %v1917_v6 = vadd.f32 %v1893_v20, %v1812_v58  ;;  %v1749_v5 = vpop.f32.mrf.mxu0  ;;  %v1814_v25 = vpop.f32.mrf.mxu1  ;;  %v1632_v26 = vsel %vm1616_vm10, %v1608_v14, %v1624_v30  ;;  %v4728_v30 = vld [vmem:[%s7863_s1 + $0x48] sm:$0xff] }
 0x199   :  { %1643 = vrot.lane.b32.xlu1 %v1628_v46, %s4995_s16  ;;  %1663 = vrot.lane.b32.xlu0 %v1632_v26, %s4996_s30  ;;  %v1815_v0 = vadd.f32 %v1814_v25, %v1749_v5  ;;  %v6649_v25 = vld [vmem:[%s7864_s0 + $0x2e0] sm:$0xff] }
 0x19a   :  { %v2007_v51 = vadd.f32 %v1983_v3, %v1917_v6  ;;  %3019 = vmatpush.msrb.mxu1 %v2895_v53  ;;  %2955 = vmatpush.msrb.mxu0 %v4728_v30  ;;  %v4844_v53 = vld [vmem:[%s7866_s3 + $0x1e8] sm:$0xff]  ;;  %v4843_v30 = vld [vmem:[%s7866_s3 + $0x1e0] sm:$0xff] }
 0x19b   :  { %4648 = vmatmul.msk.f32.gmra.mxu0 %vm70_vm0, %v6328_v23  ;;  %4656 = vmatmul.msk.f32.gmra.mxu1 %vm70_vm0, %v6323_v28  ;;  %v4761_v28 = vld [vmem:[%s7863_s1 + $0x90] sm:$0xff] }
 0x19c   :  { %v2015_v63 = vadd.f32 %v6337_v36, %v2007_v51  ;;  %4680 = vmatmul.msk.f32.gmra.mxu2 %vm70_vm0, %v6553_v48  ;;  %4704 = vmatmul.msk.f32.gmra.mxu3 %vm70_vm0, %v6558_v42  ;;  %v4727_v51 = vld [vmem:[%s7863_s1 + $0x40] sm:$0xff] }
 0x19d   :  { %3101 = vmatpush.msrb.mxu2 %v4761_v28  ;;  %3020 = vmatpush.msrb.mxu1 %v2894_v2 }
 0x19e   :  { %v2031_v33 = vmul.f32 0.01, %v2015_v63  ;;  %vm2023_vm12 = vcmp.ge.f32.partialorder %v2015_v63, 0.0  ;;  %2956 = vmatpush.msrb.mxu0 %v4727_v51  ;;  %v6771_v51 = vld [vmem:[%s7864_s0 + $0x2f8] sm:$0xff] }
 0x19f   :  { %v1896_v39 = vpop.f32.mrf.mxu2  ;;  %v1986_v54 = vpop.f32.mrf.mxu3 }
 0x1a0   :  { %v1918_v50 = vadd.f32 %v1896_v39, %v1815_v0  ;;  %v1752_v8 = vpop.f32.mrf.mxu0  ;;  %v1817_v16 = vpop.f32.mrf.mxu1  ;;  %v2039_v34 = vsel %vm2023_vm12, %v2015_v63, %v2031_v33  ;;  %v2893_v63 = vld [vmem:[%s7863_s1] sm:$0xff]  ;;  %v6677_v39 = vld [vmem:[%s7864_s0 + $0x2e8] sm:$0xff] }
 0x1a1   :  { %828 = vrot.lane.b32.xlu1 %v813_v44, %s4995_s16  ;;  %2048 = vst.msk [vmem:[#allocation2 + $0x40] sm:$0xff] %vm418_vm1, %v2039_v34  ;;  %v1818_v43 = vadd.f32 %v1817_v16, %v1752_v8  ;;  %3021 = vmatpush.msrb.mxu1 %v2893_v63  ;;  %v6692_v16 = vld [vmem:[%s7866_s3 + $0xf8] sm:$0xff]  ;;  %v4845_v44 = vld [vmem:[%s7866_s3 + $0x1f0] sm:$0xff] }
 0x1a2   :  { %v2008_v7 = vadd.f32 %v1986_v54, %v1918_v50  ;;  %3339 = vmatpush.msra.mxu0 %v6692_v16  ;;  %v6707_v34 = vld [vmem:[%s7866_s3 + $0xf0] sm:$0xff] }
 0x1a3   :  { %4649 = vmatmul.msk.f32.gmra.mxu0 %vm70_vm0, %v6355_v31  ;;  %4657 = vmatmul.msk.f32.gmra.mxu1 %vm70_vm0, %v6350_v17  ;;  %v4760_v17 = vld [vmem:[%s7863_s1 + $0x88] sm:$0xff] }
 0x1a4   :  { %v2016_v10 = vadd.f32 %v6337_v36, %v2008_v7  ;;  %4681 = vmatmul.msk.f32.gmra.mxu2 %vm70_vm0, %v6585_v9  ;;  %4705 = vmatmul.msk.f32.gmra.mxu3 %vm70_vm0, %v6590_v60  ;;  %v3316_v7 = vld [vmem:[%s7866_s3 + $0x70] sm:$0xff] }
 0x1a5   :  { %3102 = vmatpush.msrb.mxu2 %v4760_v17  ;;  %3340 = vmatpush.msra.mxu0 %v6707_v34 }
 0x1a6   :  { %v2032_v18 = vmul.f32 0.01, %v2016_v10  ;;  %vm2024_vm14 = vcmp.ge.f32.partialorder %v2016_v10, 0.0 }
 0x1a7   :  { %v1899_v11 = vpop.f32.mrf.mxu2  ;;  %v1989_v24 = vpop.f32.mrf.mxu3 }
 0x1a8   :  { %v1919_v35 = vadd.f32 %v1899_v11, %v1818_v43  ;;  %v1755_v57 = vpop.f32.mrf.mxu0  ;;  %v1820_v37 = vpop.f32.mrf.mxu1  ;;  %v2040_v47 = vsel %vm2024_vm14, %v2016_v10, %v2032_v18  ;;  %v4828_v10 = vld [vmem:[%s7866_s3 + $0x168] sm:$0xff] }
 0x1a9   :  { %2049 = vst.msk [vmem:[#allocation2 + $0x48] sm:$0xff] %vm418_vm1, %v2040_v47  ;;  %v1821_v56 = vadd.f32 %v1820_v37, %v1755_v57 }
 0x1aa   :  { %v2009_v14 = vadd.f32 %v1989_v24, %v1919_v35  ;;  %v6722_v24 = vld [vmem:[%s7864_s0 + $0x2f0] sm:$0xff] }
 0x1ab   :  { %4650 = vmatmul.msk.f32.gmra.mxu0 %vm70_vm0, %v6383_v38  ;;  %4658 = vmatmul.msk.f32.gmra.mxu1 %vm70_vm0, %v6378_v49  ;;  %v4759_v49 = vld [vmem:[%s7863_s1 + $0x80] sm:$0xff] }
 0x1ac   :  { %v2017_v58 = vadd.f32 %v6337_v36, %v2009_v14  ;;  %4682 = vmatmul.msk.f32.gmra.mxu2 %vm70_vm0, %v6617_v55  ;;  %4706 = vmatmul.msk.f32.gmra.mxu3 %vm70_vm0, %v6622_v59 }
 0x1ad   :  { %3103 = vmatpush.msrb.mxu2 %v4759_v49  ;;  %v6753_v49 = vld [vmem:[%s7866_s3 + $0xe0] sm:$0xff] }
 0x1ae   :  { %v2033_v61 = vmul.f32 0.01, %v2017_v58  ;;  %vm2025_vm15 = vcmp.ge.f32.partialorder %v2017_v58, 0.0 }
 0x1af   :  { %v1902_v45 = vpop.f32.mrf.mxu2  ;;  %v1992_v20 = vpop.f32.mrf.mxu3 }
 0x1b0   :  { %v1920_v3 = vadd.f32 %v1902_v45, %v1821_v56  ;;  %v1758_v4 = vpop.f32.mrf.mxu0  ;;  %v1823_v6 = vpop.f32.mrf.mxu1  ;;  %v2041_v5 = vsel %vm2025_vm15, %v2017_v58, %v2033_v61  ;;  %v6737_v56 = vld [vmem:[%s7866_s3 + $0xe8] sm:$0xff]  ;;  %v4826_v61 = vld [vmem:[%s7866_s3 + $0x158] sm:$0xff] }
 0x1b1   :  { %2050 = vst.msk [vmem:[#allocation2 + $0x50] sm:$0xff] %vm418_vm1, %v2041_v5  ;;  %v1824_v50 = vadd.f32 %v1823_v6, %v1758_v4  ;;  %3341 = vmatpush.msra.mxu0 %v6737_v56 }
 0x1b2   :  { %v2010_v46 = vadd.f32 %v1992_v20, %v1920_v3  ;;  %v4842_v3 = vld [vmem:[%s7866_s3 + $0x1d8] sm:$0xff] }
 0x1b3   :  { %v1244_v26 = vpop.permute.xlu0 %1243  ;;  %4651 = vmatmul.msk.f32.gmra.mxu0 %vm70_vm0, %v6405_v62  ;;  %4659 = vmatmul.msk.f32.gmra.mxu1 %vm70_vm0, %v6310_v12  ;;  %v4830_v12 = vld [vmem:[%s7866_s3 + $0x178] sm:$0xff] }
 0x1b4   :  { %v2018_v0 = vadd.f32 %v6337_v36, %v2010_v46  ;;  %1255 = vst.msk [vmem:[#allocation2 + $0x20] sm:$0xff] %vm439_vm13, %v1244_v26  ;;  %4683 = vmatmul.msk.f32.gmra.mxu2 %vm70_vm0, %v6523_v1  ;;  %4707 = vmatmul.msk.f32.gmra.mxu3 %vm70_vm0, %v6649_v25  ;;  %v4846_v62 = vld [vmem:[%s7866_s3 + $0x1f8] sm:$0xff] }
 0x1b5   :  { %3411 = vmatpush.msra.mxu2 %v4830_v12  ;;  %3461 = vmatpush.msra.mxu3 %v4846_v62 }
 0x1b6   :  { %v2034_v15 = vmul.f32 0.01, %v2018_v0  ;;  %vm2026_vm2 = vcmp.ge.f32.partialorder %v2018_v0, 0.0  ;;  %3342 = vmatpush.msra.mxu0 %v6753_v49 }
 0x1b7   :  { %v1905_v29 = vpop.f32.mrf.mxu2  ;;  %v1995_v52 = vpop.f32.mrf.mxu3  ;;  %3462 = vmatpush.msra.mxu3 %v4845_v44 }
 0x1b8   :  { %v1761_v28 = vpop.f32.mrf.mxu0  ;;  %v1826_v32 = vpop.f32.mrf.mxu1  ;;  %v2042_v33 = vsel %vm2026_vm2, %v2018_v0, %v2034_v15  ;;  %v1921_v17 = vadd.f32 %v1905_v29, %v1824_v50  ;;  %v6786_v15 = vld [vmem:[%s7866_s3 + $0xd8] sm:$0xff]  ;;  %v4841_v29 = vld [vmem:[%s7866_s3 + $0x1d0] sm:$0xff]  ;;  %v4840_v50 = vld [vmem:[%s7866_s3 + $0x1c8] sm:$0xff] }
 0x1b9   :  { %2051 = vst.msk [vmem:[#allocation2 + $0x58] sm:$0xff] %vm418_vm1, %v2042_v33  ;;  %v1827_v8 = vadd.f32 %v1826_v32, %v1761_v28  ;;  %3463 = vmatpush.msra.mxu3 %v4844_v53  ;;  %3343 = vmatpush.msra.mxu0 %v6786_v15  ;;  %v3312_v28 = vld [vmem:[%s7866_s3 + $0x50] sm:$0xff]  ;;  %v4824_v32 = vld [vmem:[%s7866_s3 + $0x148] sm:$0xff] }
 0x1ba   :  { %v2011_v47 = vadd.f32 %v1995_v52, %v1921_v17  ;;  %v6801_v52 = vld [vmem:[%s7866_s3 + $0xd0] sm:$0xff] }
 0x1bb   :  { %v1246_v54 = vpop.permute.xlu1 %1245  ;;  %4652 = vmatmul.msk.f32.gmra.mxu0 %vm70_vm0, %v6428_v13  ;;  %4660 = vmatmul.msk.f32.gmra.mxu1 %vm70_vm0, %v6328_v23  ;;  %v3317_v13 = vld [vmem:[%s7866_s3 + $0x78] sm:$0xff]  ;;  %v4829_v23 = vld [vmem:[%s7866_s3 + $0x170] sm:$0xff] }
 0x1bc   :  { %1256 = vst.msk [vmem:[#allocation2 + $0x28] sm:$0xff] %vm439_vm13, %v1246_v54  ;;  %4684 = vmatmul.msk.f32.gmra.mxu2 %vm70_vm0, %v6558_v42  ;;  %4708 = vmatmul.msk.f32.gmra.mxu3 %vm70_vm0, %v6677_v39  ;;  %v2019_v4 = vadd.f32 %v6337_v36, %v2011_v47  ;;  %v6862_v47 = vld [vmem:[%s7866_s3 + $0x138] sm:$0xff] }
 0x1bd   :  { %3365 = vmatpush.msra.mxu1 %v3317_v13  ;;  %3412 = vmatpush.msra.mxu2 %v4829_v23 }
 0x1be   :  { %3464 = vmatpush.msra.mxu3 %v4843_v30  ;;  %v2035_v62 = vmul.f32 0.01, %v2019_v4  ;;  %vm2027_vm5 = vcmp.ge.f32.partialorder %v2019_v4, 0.0  ;;  %3344 = vmatpush.msra.mxu0 %v6801_v52 }
 0x1bf   :  { %v1908_v43 = vpop.f32.mrf.mxu2  ;;  %v1998_v27 = vpop.f32.mrf.mxu3  ;;  %3366 = vmatpush.msra.mxu1 %v3316_v7  ;;  %3413 = vmatpush.msra.mxu2 %v4828_v10  ;;  %v4751_v10 = vld [vmem:[%s7864_s0 + $0x300] sm:$0xff] }
 0x1c0   :  { %v1922_v40 = vadd.f32 %v1908_v43, %v1827_v8  ;;  %v1764_v18 = vpop.f32.mrf.mxu0  ;;  %v1829_v11 = vpop.f32.mrf.mxu1  ;;  %3465 = vmatpush.msra.mxu3 %v4842_v3  ;;  %v2043_v7 = vsel %vm2027_vm5, %v2019_v4, %v2035_v62  ;;  %v6822_v43 = vld [vmem:[%s7864_s0 + $0x320] sm:$0xff]  ;;  %v6919_v62 = vld [vmem:[%s7866_s3 + $0x128] sm:$0xff] }
 0x1c1   :  { %v1830_v58 = vadd.f32 %v1829_v11, %v1764_v18  ;;  %v6835_v18 = vld [vmem:[%s7866_s3 + $0xc8] sm:$0xff] }
 0x1c2   :  { %v2012_v35 = vadd.f32 %v1998_v27, %v1922_v40  ;;  %3466 = vmatpush.msra.mxu3 %v4841_v29  ;;  %v3311_v11 = vld [vmem:[%s7866_s3 + $0x48] sm:$0xff]  ;;  %3345 = vmatpush.msra.mxu0 %v6835_v18 }
 0x1c3   :  { %v1248_v57 = vpop.permute.xlu0 %1247  ;;  %v1640_v37 = vpop.permute.xlu2 %1639  ;;  %4653 = vmatmul.msk.f32.gmra.mxu0 %vm70_vm0, %v6456_v19  ;;  %4661 = vmatmul.msk.f32.gmra.mxu1 %vm70_vm0, %v6355_v31  ;;  %v3315_v31 = vld [vmem:[%s7866_s3 + $0x68] sm:$0xff]  ;;  %v4827_v19 = vld [vmem:[%s7866_s3 + $0x160] sm:$0xff] }
 0x1c4   :  { %v2020_v14 = vadd.f32 %v6337_v36, %v2012_v35  ;;  %1257 = vst.msk [vmem:[#allocation2 + $0x30] sm:$0xff] %vm439_vm13, %v1248_v57  ;;  %4685 = vmatmul.msk.f32.gmra.mxu2 %vm70_vm0, %v6590_v60  ;;  %4709 = vmatmul.msk.f32.gmra.mxu3 %vm70_vm0, %v6722_v24  ;;  %v4839_v35 = vld [vmem:[%s7866_s3 + $0x1c0] sm:$0xff] }
 0x1c5   :  { %1650 = vst.msk [vmem:[#allocation2 + $0x28] sm:$0xff] %vm834_vm4, %v1640_v37  ;;  %3367 = vmatpush.msra.mxu1 %v3315_v31  ;;  %3414 = vmatpush.msra.mxu2 %v4827_v19  ;;  %v6853_v57 = vld [vmem:[%s7866_s3 + $0xc0] sm:$0xff] }
 0x1c6   :  { %vm2028_vm3 = vcmp.ge.f32.partialorder %v2020_v14, 0.0  ;;  %v2036_v2 = vmul.f32 0.01, %v2020_v14  ;;  %3467 = vmatpush.msra.mxu3 %v4840_v50  ;;  %v3310_v37 = vld [vmem:[%s7866_s3 + $0x40] sm:$0xff]  ;;  %3346 = vmatpush.msra.mxu0 %v6853_v57 }
 0x1c7   :  { %v1911_v45 = vpop.f32.mrf.mxu2  ;;  %v2001_v20 = vpop.f32.mrf.mxu3  ;;  %3368 = vmatpush.msra.mxu1 %v3314_v21  ;;  %3415 = vmatpush.msra.mxu2 %v4826_v61  ;;  %v4752_v61 = vld [vmem:[%s7864_s0 + $0x308] sm:$0xff] }
 0x1c8   :  { %v1923_v6 = vadd.f32 %v1911_v45, %v1830_v58  ;;  %v1767_v5 = vpop.f32.mrf.mxu0  ;;  %v1832_v46 = vpop.f32.mrf.mxu1  ;;  %v2044_v26 = vsel %vm2028_vm3, %v2020_v14, %v2036_v2  ;;  %3468 = vmatpush.msra.mxu3 %v4839_v35  ;;  %v4838_v14 = vld [vmem:[%s7866_s3 + $0x1b8] sm:$0xff]  ;;  %v6878_v45 = vld [vmem:[%s7864_s0 + $0x328] sm:$0xff]  ;;  %v6978_v35 = vld [vmem:[%s7866_s3 + $0x20] sm:$0xff] }
 0x1c9   :  { %2058 = vrot.lane.b32.xlu0 %v2044_v26, %s4994_s11  ;;  %v1833_v12 = vadd.f32 %v1832_v46, %v1767_v5  ;;  %v6891_v5 = vld [vmem:[%s7866_s3 + $0xb8] sm:$0xff]  ;;  %v4837_v26 = vld [vmem:[%s7866_s3 + $0x1b0] sm:$0xff] }
 0x1ca   :  { %v2013_v0 = vadd.f32 %v2001_v20, %v1923_v6  ;;  %3469 = vmatpush.msra.mxu3 %v4838_v14  ;;  %v3309_v46 = vld [vmem:[%s7866_s3 + $0x38] sm:$0xff]  ;;  %3347 = vmatpush.msra.mxu0 %v6891_v5 }
 0x1cb   :  { %v6773_v63 = vpop.permute.xlu2 %847  ;;  %4654 = vmatmul.msk.f32.gmra.mxu0 %vm70_vm0, %v6488_v22  ;;  %4662 = vmatmul.msk.f32.gmra.mxu1 %vm70_vm0, %v6383_v38  ;;  %v3313_v22 = vld [vmem:[%s7866_s3 + $0x58] sm:$0xff]  ;;  %v4825_v38 = vld [vmem:[%s7866_s3 + $0x150] sm:$0xff] }
 0x1cc   :  { %4686 = vmatmul.msk.f32.gmra.mxu2 %vm70_vm0, %v6622_v59  ;;  %4710 = vmatmul.msk.f32.gmra.mxu3 %vm70_vm0, %v6771_v51  ;;  %v2021_v8 = vadd.f32 %v6337_v36, %v2013_v0  ;;  %v6908_v0 = vld [vmem:[%s7866_s3 + $0xb0] sm:$0xff] }
 0x1cd   :  { %3369 = vmatpush.msra.mxu1 %v3313_v22  ;;  %3416 = vmatpush.msra.mxu2 %v4825_v38  ;;  %v4836_v22 = vld [vmem:[%s7866_s3 + $0x1a8] sm:$0xff] }
 0x1ce   :  { %v2037_v40 = vmul.f32 0.01, %v2021_v8  ;;  %vm2029_vm6 = vcmp.ge.f32.partialorder %v2021_v8, 0.0  ;;  %3470 = vmatpush.msra.mxu3 %v4837_v26  ;;  %3348 = vmatpush.msra.mxu0 %v6908_v0 }
 0x1cf   :  { %v1914_v33 = vpop.f32.mrf.mxu2  ;;  %v2004_v54 = vpop.f32.mrf.mxu3  ;;  %3370 = vmatpush.msra.mxu1 %v3312_v28  ;;  %3417 = vmatpush.msra.mxu2 %v4824_v32 }
 0x1d0   :  { %v1924_v13 = vadd.f32 %v1914_v33, %v1833_v12  ;;  %v2145_v23 = vpop.f32.mrf.mxu0  ;;  %v2210_v44 = vpop.f32.mrf.mxu1  ;;  %v2045_v21 = vsel %vm2029_vm6, %v2021_v8, %v2037_v40  ;;  %v6914_v12 = vld [vmem:[%s7866_s3 + $0x30] sm:$0xff]  ;;  %3471 = vmatpush.msra.mxu3 %v4836_v22 }
 0x1d1   :  { %2056 = vrot.lane.b32.xlu0 %v2043_v7, %s4994_s11  ;;  %3371 = vmatpush.msra.mxu1 %v3311_v11  ;;  %v2211_v3 = vadd.f32 %v2210_v44, %v2145_v23  ;;  %v4753_v8 = vld [vmem:[%s7864_s0 + $0x310] sm:$0xff]  ;;  %v6973_v11 = vld [vmem:[%s7866_s3 + $0xa0] sm:$0xff] }
 0x1d2   :  { %v2014_v17 = vadd.f32 %v2004_v54, %v1924_v13  ;;  %v6935_v13 = vld [vmem:[%s7864_s0 + $0x330] sm:$0xff] }
 0x1d3   :  { %v1638_v27 = vpop.permute.xlu0 %1637  ;;  %v434_v53 = vpop.permute.xlu2 %433  ;;  %4735 = vmatmul.msk.f32.vlgmr.msrb.gmra.mxu0 %vm70_vm0, %v6523_v1  ;;  %4743 = vmatmul.msk.f32.vlgmr.msrb.gmra.mxu1 %vm70_vm0, %v6518_v41  ;;  %v6843_v41 = vld [vmem:[%s7866_s3 + $0x140] sm:$0xff] }
 0x1d4   :  { %1649 = vst.msk [vmem:[#allocation2 + $0x20] sm:$0xff] %vm834_vm4, %v1638_v27  ;;  %4767 = vmatmul.msk.f32.vlgmr.msrb.gmra.mxu2 %vm70_vm0, %v4751_v10  ;;  %4791 = vmatmul.msk.f32.vlgmr.msrb.gmra.mxu3 %vm70_vm0, %v6822_v43  ;;  %v2022_v19 = vadd.f32 %v6337_v36, %v2014_v17  ;;  %v6966_v17 = vld [vmem:[%s7866_s3 + $0x1a0] sm:$0xff] }
 0x1d5   :  { %443 = vst.msk [vmem:[#allocation2 + $0x18] sm:$0xff] %vm439_vm13, %v434_v53  ;;  %3418 = vmatpush.msra.mxu2 %v6843_v41  ;;  %3372 = vmatpush.msra.mxu1 %v3310_v37  ;;  %v6949_v53 = vld [vmem:[%s7866_s3 + $0xa8] sm:$0xff]  ;;  %v6983_v37 = vld [vmem:[%s7866_s3 + $0x118] sm:$0xff] }
 0x1d6   :  { %v2038_v6 = vmul.f32 0.01, %v2022_v19  ;;  %vm2030_vm7 = vcmp.ge.f32.partialorder %v2022_v19, 0.0  ;;  %3349 = vmatpush.msra.mxu0 %v6949_v53  ;;  %3472 = vmatpush.msra.mxu3 %v6966_v17 }
 0x1d7   :  { %v2292_v58 = vpop.f32.mrf.mxu2  ;;  %v2382_v31 = vpop.f32.mrf.mxu3  ;;  %3419 = vmatpush.msra.mxu2 %v6862_v47  ;;  %3373 = vmatpush.msra.mxu1 %v3309_v46  ;;  %v7023_v46 = vld [vmem:[%s7866_s3 + $0x188] sm:$0xff] }
 0x1d8   :  { %v2148_v30 = vpop.f32.mrf.mxu0  ;;  %v2213_v2 = vpop.f32.mrf.mxu1  ;;  %v2316_v28 = vadd.f32 %v2292_v58, %v2211_v3  ;;  %v2046_v50 = vsel %vm2030_vm7, %v2022_v19, %v2038_v6  ;;  %3350 = vmatpush.msra.mxu0 %v6973_v11  ;;  %v6995_v19 = vld [vmem:[%s7865_s2] ss:$0 sm:$0xff]  ;;  %v4754_v3 = vld [vmem:[%s7864_s0 + $0x318] sm:$0xff]  ;;  %v7013_v6 = vld [vmem:[%s7866_s3 + $0x190] sm:$0xff] }
 0x1d9   :  { %2060 = vrot.lane.b32.xlu0 %v2045_v21, %s4994_s11  ;;  %v2214_v4 = vadd.f32 %v2213_v2, %v2148_v30  ;;  %3374 = vmatpush.msra.mxu1 %v6914_v12 }
 0x1da   :  { %v2406_v7 = vadd.f32 %v2382_v31, %v2316_v28  ;;  %v6990_v31 = vld [vmem:[%s7866_s3 + $0x198] sm:$0xff]  ;;  %v7041_v28 = vld [vmem:[%s7866_s3 + $0x110] sm:$0xff] }
 0x1db   :  { %v1250_v20 = vpop.permute.xlu0 %1249  ;;  %4736 = vmatmul.msk.f32.gmra.mxu0 %vm70_vm0, %v6558_v42  ;;  %4744 = vmatmul.msk.f32.gmra.mxu1 %vm70_vm0, %v6553_v48  ;;  %v6899_v48 = vld [vmem:[%s7866_s3 + $0x130] sm:$0xff] }
 0x1dc   :  { %1258 = vst.msk [vmem:[#allocation2 + $0x38] sm:$0xff] %vm439_vm13, %v1250_v20  ;;  %4768 = vmatmul.msk.f32.gmra.mxu2 %vm70_vm0, %v4752_v61  ;;  %4792 = vmatmul.msk.f32.gmra.mxu3 %vm70_vm0, %v6878_v45  ;;  %v2414_v30 = vadd.f32 %v6995_v19, %v2406_v7 }
 0x1dd   :  { %3420 = vmatpush.msra.mxu2 %v6899_v48  ;;  %3473 = vmatpush.msra.mxu3 %v6990_v31 }
 0x1de   :  { %vm2422_vm10 = vcmp.ge.f32.partialorder %v2414_v30, 0.0 }
 0x1df   :  { %v2295_v38 = vpop.f32.mrf.mxu2  ;;  %v2385_v29 = vpop.f32.mrf.mxu3  ;;  %3421 = vmatpush.msra.mxu2 %v6919_v62  ;;  %3474 = vmatpush.msra.mxu3 %v7013_v6 }
 0x1e0   :  { %v2317_v32 = vadd.f32 %v2295_v38, %v2214_v4  ;;  %v2151_v33 = vpop.f32.mrf.mxu0  ;;  %v2216_v54 = vpop.f32.mrf.mxu1  ;;  %v7008_v4 = vld [vmem:[%s7864_s0 + $0x338] sm:$0xff]  ;;  %v2430_v38 = vmul.f32 0.01, %v2414_v30 }
 0x1e1   :  { %2062 = vrot.lane.b32.xlu0 %v2046_v50, %s4994_s11  ;;  %v2217_v27 = vadd.f32 %v2216_v54, %v2151_v33  ;;  %v7053_v33 = vld [vmem:[%s7866_s3 + $0x10] sm:$0xff]  ;;  %3475 = vmatpush.msra.mxu3 %v7023_v46  ;;  %v7060_v54 = vld [vmem:[%s7866_s3 + $0x108] sm:$0xff]  ;;  %v7065_v50 = vld [vmem:[%s7866_s3 + $0x180] sm:$0xff] }
 0x1e2   :  { %v2407_v23 = vadd.f32 %v2385_v29, %v2317_v32  ;;  %v7031_v29 = vld [vmem:[%s7866_s3 + $0x98] sm:$0xff]  ;;  %v7048_v32 = vld [vmem:[%s7866_s3 + $0x90] sm:$0xff] }
 0x1e3   :  { %v1642_v44 = vpop.permute.xlu1 %1641  ;;  %4737 = vmatmul.msk.f32.gmra.mxu0 %vm70_vm0, %v6590_v60  ;;  %4745 = vmatmul.msk.f32.gmra.mxu1 %vm70_vm0, %v6585_v9  ;;  %v6954_v9 = vld [vmem:[%s7866_s3 + $0x28] sm:$0xff] }
 0x1e4   :  { %v2415_v10 = vadd.f32 %v6337_v36, %v2407_v23  ;;  %1651 = vst.msk [vmem:[#allocation2 + $0x30] sm:$0xff] %vm834_vm4, %v1642_v44  ;;  %4769 = vmatmul.msk.f32.gmra.mxu2 %vm70_vm0, %v4753_v8  ;;  %4793 = vmatmul.msk.f32.gmra.mxu3 %vm70_vm0, %v6935_v13  ;;  %v6959_v36 = vld [vmem:[%s7866_s3 + $0x120] sm:$0xff] }
 0x1e5   :  { %3375 = vmatpush.msra.mxu1 %v6954_v9  ;;  %3422 = vmatpush.msra.mxu2 %v6959_v36 }
 0x1e6   :  { %vm2423_vm8 = vcmp.ge.f32.partialorder %v2415_v10, 0.0  ;;  %v2431_v40 = vmul.f32 0.01, %v2415_v10  ;;  %3351 = vmatpush.msra.mxu0 %v7031_v29  ;;  %3476 = vmatpush.msra.mxu3 %v7065_v50 }
 0x1e7   :  { %v2298_v14 = vpop.f32.mrf.mxu2  ;;  %v2388_v58 = vpop.f32.mrf.mxu3  ;;  %3376 = vmatpush.msra.mxu1 %v6978_v35  ;;  %3423 = vmatpush.msra.mxu2 %v6983_v37 }
 0x1e8   :  { %v2318_v2 = vadd.f32 %v2298_v14, %v2217_v27  ;;  %v2154_v21 = vpop.f32.mrf.mxu0  ;;  %v2219_v61 = vpop.f32.mrf.mxu1  ;;  %v2439_v20 = vsel %vm2423_vm8, %v2415_v10, %v2431_v40  ;;  %3352 = vmatpush.msra.mxu0 %v7048_v32  ;;  %v2438_v40 = vsel %vm2422_vm10, %v2414_v30, %v2430_v38  ;;  %v4779_v14 = vld [vmem:[%s7864_s0 + $0x340] sm:$0xff]  ;;  %3601 = vmatpush.msrb.mxu3 %v6692_v16  ;;  %v7090_v30 = vld [vmem:[%s7866_s3 + $0x8] sm:$0xff] }
 0x1e9   :  { %2452 = vrot.lane.b32.xlu1 %v2439_v20, %s4995_s16  ;;  %v2220_v22 = vadd.f32 %v2219_v61, %v2154_v21  ;;  %3424 = vmatpush.msra.mxu2 %v7041_v28  ;;  %v4780_v38 = vld [vmem:[%s7864_s0 + $0x348] sm:$0xff] }
 0x1ea   :  { %v2408_v26 = vadd.f32 %v2388_v58, %v2318_v2  ;;  %v7081_v58 = vld [vmem:[%s7866_s3 + $0x88] sm:$0xff]  ;;  %3602 = vmatpush.msrb.mxu3 %v6707_v34 }
 0x1eb   :  { %4738 = vmatmul.msk.f32.gmra.mxu0 %vm70_vm0, %v6622_v59  ;;  %4746 = vmatmul.msk.f32.gmra.mxu1 %vm70_vm0, %v6617_v55  ;;  %v7036_v55 = vld [vmem:[%s7866_s3 + $0x18] sm:$0xff] }
 0x1ec   :  { %4770 = vmatmul.msk.f32.gmra.mxu2 %vm70_vm0, %v4754_v3  ;;  %4794 = vmatmul.msk.f32.gmra.mxu3 %vm70_vm0, %v7008_v4  ;;  %v2416_v44 = vadd.f32 %v6995_v19, %v2408_v26 }
 0x1ed   :  { %3377 = vmatpush.msra.mxu1 %v7036_v55  ;;  %3425 = vmatpush.msra.mxu2 %v7060_v54 }
 0x1ee   :  { %v2432_v16 = vmul.f32 0.01, %v2416_v44  ;;  %vm2424_vm11 = vcmp.ge.f32.partialorder %v2416_v44, 0.0  ;;  %3353 = vmatpush.msra.mxu0 %v7081_v58  ;;  %3603 = vmatpush.msrb.mxu3 %v6737_v56 }
 0x1ef   :  { %v2301_v8 = vpop.f32.mrf.mxu2  ;;  %v2391_v23 = vpop.f32.mrf.mxu3  ;;  %3378 = vmatpush.msra.mxu1 %v7053_v33 }
 0x1f0   :  { %v2319_v7 = vadd.f32 %v2301_v8, %v2220_v22  ;;  %v2157_v10 = vpop.f32.mrf.mxu0  ;;  %v2222_v27 = vpop.f32.mrf.mxu1  ;;  %v2440_v22 = vsel %vm2424_vm11, %v2416_v44, %v2432_v16  ;;  %3604 = vmatpush.msrb.mxu3 %v6753_v49 }
 0x1f1   :  { %2450 = vrot.lane.b32.xlu1 %v2438_v40, %s4995_s16  ;;  %3379 = vmatpush.msra.mxu1 %v7090_v30  ;;  %v2223_v56 = vadd.f32 %v2222_v27, %v2157_v10 }
 0x1f2   :  { %v2409_v21 = vadd.f32 %v2391_v23, %v2319_v7  ;;  %3605 = vmatpush.msrb.mxu3 %v6786_v15 }
 0x1f3   :  { %v1658_v2 = vpop.permute.xlu1 %1657  ;;  %4739 = vmatmul.msk.f32.gmra.mxu0 %vm70_vm0, %v6649_v25  ;;  %4747 = vmatmul.msk.f32.gmra.mxu1 %vm70_vm0, %v6523_v1  ;;  %v7099_v25 = vld [vmem:[%s7866_s3 + $0x100] sm:$0xff] }
 0x1f4   :  { %1669 = vst.msk [vmem:[#allocation2 + $0x20] sm:$0xff] %vm855_vm9, %v1658_v2  ;;  %4771 = vmatmul.msk.f32.gmra.mxu2 %vm70_vm0, %v6822_v43  ;;  %4795 = vmatmul.msk.f32.gmra.mxu3 %vm70_vm0, %v4779_v14  ;;  %v7104_v1 = vld [vmem:[%s7866_s3 + $0x80] sm:$0xff]  ;;  %v2417_v3 = vadd.f32 %v6995_v19, %v2409_v21 }
 0x1f5   :  { %v7111_v43 = vld [vmem:[%s7866_s3] sm:$0xff]  ;;  %3426 = vmatpush.msra.mxu2 %v7099_v25  ;;  %3354 = vmatpush.msra.mxu0 %v7104_v1 }
 0x1f6   :  { %3380 = vmatpush.msra.mxu1 %v7111_v43  ;;  %v2433_v44 = vmul.f32 0.01, %v2417_v3  ;;  %vm2425_vm12 = vcmp.ge.f32.partialorder %v2417_v3, 0.0  ;;  %3606 = vmatpush.msrb.mxu3 %v6801_v52 }
 0x1f7   :  { %v2304_v61 = vpop.f32.mrf.mxu2  ;;  %v2394_v20 = vpop.f32.mrf.mxu3 }
 0x1f8   :  { %v2160_v34 = vpop.f32.mrf.mxu0  ;;  %v2225_v26 = vpop.f32.mrf.mxu1  ;;  %v2441_v27 = vsel %vm2425_vm12, %v2417_v3, %v2433_v44  ;;  %3607 = vmatpush.msrb.mxu3 %v6835_v18 }
 0x1f9   :  { %2454 = vrot.lane.b32.xlu1 %v2440_v22, %s4995_s16  ;;  %v2226_v23 = vadd.f32 %v2225_v26, %v2160_v34 }
 0x1fa   :  { %3608 = vmatpush.msrb.mxu3 %v6853_v57 }
 0x1fb   :  { %v1660_v8 = vpop.permute.xlu1 %1659  ;;  %4740 = vmatmul.msk.f32.gmra.mxu0 %vm70_vm0, %v6677_v39  ;;  %4748 = vmatmul.msk.f32.gmra.mxu1 %vm70_vm0, %v6558_v42  ;;  %v2320_v39 = vadd.f32 %v2304_v61, %v2223_v56 }
 0x1fc   :  { %1670 = vst.msk [vmem:[#allocation2 + $0x28] sm:$0xff] %vm855_vm9, %v1660_v8  ;;  %4772 = vmatmul.msk.f32.gmra.mxu2 %vm70_vm0, %v6878_v45  ;;  %4796 = vmatmul.msk.f32.gmra.mxu3 %vm70_vm0, %v4780_v38  ;;  %v4781_v45 = vld [vmem:[%s7864_s0 + $0x350] sm:$0xff] }
 0x1fd   :  { %v2410_v52 = vadd.f32 %v2394_v20, %v2320_v39  ;;  %3609 = vmatpush.msrb.mxu3 %v6891_v5 }
 0x1ff   :  { %v2307_v49 = vpop.f32.mrf.mxu2  ;;  %v2397_v7 = vpop.f32.mrf.mxu3  ;;  %v2418_v61 = vadd.f32 %v6995_v19, %v2410_v52  ;;  %3610 = vmatpush.msrb.mxu3 %v6908_v0 }
 0x200   :  { %v2321_v40 = vadd.f32 %v2307_v49, %v2226_v23  ;;  %v2163_v42 = vpop.f32.mrf.mxu0  ;;  %v2228_v10 = vpop.f32.mrf.mxu1  ;;  %v3299_v49 = vld [vmem:[#allocation2] sm:$0xff] }
 0x201   :  { %2456 = vrot.lane.b32.xlu1 %v2441_v27, %s4995_s16  ;;  %v2229_v16 = vadd.f32 %v2228_v10, %v2163_v42  ;;  %v2434_v38 = vmul.f32 0.01, %v2418_v61  ;;  %vm2426_vm15 = vcmp.ge.f32.partialorder %v2418_v61, 0.0  ;;  %3611 = vmatpush.msrb.mxu3 %v6949_v53  ;;  %v7173_v53 = vld [vmem:[#allocation2 + $0x20] sm:$0xff] }
 0x202   :  { %v2411_v14 = vadd.f32 %v2397_v7, %v2321_v40 }
 0x203   :  { %v827_v2 = vpop.permute.xlu1 %826  ;;  %v1662_v15 = vpop.permute.xlu0 %1661  ;;  %4741 = vmatmul.msk.f32.gmra.mxu0 %vm70_vm0, %v6722_v24  ;;  %4749 = vmatmul.msk.f32.gmra.mxu1 %vm70_vm0, %v6590_v60  ;;  %v2442_v44 = vsel %vm2426_vm15, %v2418_v61, %v2434_v38  ;;  %v7175_v39 = vld [vmem:[#allocation2 + $0x28] sm:$0xff] }
 0x204   :  { %v2419_v21 = vadd.f32 %v6995_v19, %v2411_v14  ;;  %837 = vst.msk [vmem:[#allocation2 + $0x10] sm:$0xff] %vm834_vm4, %v827_v2  ;;  %4773 = vmatmul.msk.f32.gmra.mxu2 %vm70_vm0, %v6935_v13  ;;  %4797 = vmatmul.msk.f32.gmra.mxu3 %vm70_vm0, %v4781_v45 }
 0x205   :  { %858 = vst.msk [vmem:[#allocation2 + $0x10] sm:$0xff] %vm855_vm9, %v6773_v63  ;;  %v4782_v63 = vld [vmem:[%s7864_s0 + $0x358] sm:$0xff]  ;;  %3612 = vmatpush.msrb.mxu3 %v6973_v11  ;;  %v850_v11 = vpop.permute.xlu2 %849 }
 0x206   :  { %1671 = vst.msk [vmem:[#allocation2 + $0x30] sm:$0xff] %vm855_vm9, %v1662_v15  ;;  %vm2427_vm14 = vcmp.ge.f32.partialorder %v2419_v21, 0.0  ;;  %v2435_v60 = vmul.f32 0.01, %v2419_v21 }
 0x207   :  { %v2310_v24 = vpop.f32.mrf.mxu2  ;;  %v2400_v18 = vpop.f32.mrf.mxu3  ;;  %3613 = vmatpush.msrb.mxu3 %v7031_v29 }
 0x208   :  { %v2322_v20 = vadd.f32 %v2310_v24, %v2229_v16  ;;  %v2166_v3 = vpop.f32.mrf.mxu0  ;;  %v2231_v13 = vpop.f32.mrf.mxu1  ;;  %v2443_v34 = vsel %vm2427_vm14, %v2419_v21, %v2435_v60 }
 0x209   :  { %2472 = vrot.lane.b32.xlu2 %v2443_v34, %s4996_s30  ;;  %v2232_v22 = vadd.f32 %v2231_v13, %v2166_v3  ;;  %3614 = vmatpush.msrb.mxu3 %v7048_v32 }
 0x20a   :  { %v2412_v5 = vadd.f32 %v2400_v18, %v2322_v20 }
 0x20b   :  { %v1644_v57 = vpop.permute.xlu1 %1643  ;;  %v1664_v26 = vpop.permute.xlu0 %1663  ;;  %4742 = vmatmul.msk.f32.gmra.mxu0 %vm70_vm0, %v6771_v51  ;;  %4750 = vmatmul.msk.f32.gmra.mxu1 %vm70_vm0, %v6622_v59 }
 0x20c   :  { %1652 = vst.msk [vmem:[#allocation2 + $0x38] sm:$0xff] %vm834_vm4, %v1644_v57  ;;  %4774 = vmatmul.msk.f32.gmra.mxu2 %vm70_vm0, %v7008_v4  ;;  %4798 = vmatmul.msk.f32.gmra.mxu3 %vm70_vm0, %v4782_v63  ;;  %v2420_v59 = vadd.f32 %v6995_v19, %v2412_v5  ;;  %v3319_v4 = vld [vmem:[#allocation2 + $0x8] sm:$0xff]  ;;  %v3320_v16 = vld [vmem:[#allocation2 + $0x10] sm:$0xff] }
 0x20d   :  { %1672 = vst.msk [vmem:[#allocation2 + $0x38] sm:$0xff] %vm855_vm9, %v1664_v26  ;;  %3615 = vmatpush.msrb.mxu3 %v7081_v58  ;;  %v7186_v60 = vld [vmem:[#allocation2 + $0x30] sm:$0xff] }
 0x20e   :  { %v2436_v10 = vmul.f32 0.01, %v2420_v59  ;;  %vm2428_vm2 = vcmp.ge.f32.partialorder %v2420_v59, 0.0 }
 0x20f   :  { %v2313_v0 = vpop.f32.mrf.mxu2  ;;  %v2403_v51 = vpop.f32.mrf.mxu3  ;;  %3616 = vmatpush.msrb.mxu3 %v7104_v1 }
 0x210   :  { %v2323_v8 = vadd.f32 %v2313_v0, %v2232_v22  ;;  %v2559_v56 = vpop.f32.mrf.mxu0  ;;  %v2624_v23 = vpop.f32.mrf.mxu1  ;;  %v2444_v52 = vsel %vm2428_vm2, %v2420_v59, %v2436_v10 }
 0x211   :  { %2470 = vrot.lane.b32.xlu2 %v2442_v44, %s4996_s30  ;;  %v2625_v42 = vadd.f32 %v2624_v23, %v2559_v56 }
 0x212   :  { %v2413_v40 = vadd.f32 %v2403_v51, %v2323_v8 }
 0x213   :  { %v829_v7 = vpop.permute.xlu1 %828  ;;  %3355 = vmatmul.f32.vlgmr.msra.gmra.mxu0 %v3319_v4  ;;  %3381 = vmatmul.f32.vlgmr.msra.gmra.mxu1 %v3299_v49 }
 0x214   :  { %838 = vst.msk [vmem:[#allocation2 + $0x18] sm:$0xff] %vm834_vm4, %v829_v7  ;;  %3427 = vmatmul.f32.vlgmr.msra.gmra.mxu2 %v7173_v53  ;;  %3477 = vmatmul.f32.vlgmr.msra.gmra.mxu3 %v7175_v39  ;;  %v2421_v45 = vadd.f32 %v6995_v19, %v2413_v40  ;;  %v3443_v5 = vld [vmem:[#allocation2 + $0x38] sm:$0xff] }
 0x215   :  { %859 = vst.msk [vmem:[#allocation2 + $0x18] sm:$0xff] %vm855_vm9, %v850_v11 }
 0x216   :  { %v2437_v58 = vmul.f32 0.01, %v2421_v45  ;;  %vm2429_vm3 = vcmp.ge.f32.partialorder %v2421_v45, 0.0 }
 0x217   :  { %v2706_v29 = vpop.f32.mrf.mxu2  ;;  %v2796_v27 = vpop.f32.mrf.mxu3 }
 0x218   :  { %v2730_v14 = vadd.f32 %v2706_v29, %v2625_v42  ;;  %v2562_v2 = vpop.f32.mrf.mxu0  ;;  %v2627_v15 = vpop.f32.mrf.mxu1  ;;  %v2445_v34 = vsel %vm2429_vm3, %v2421_v45, %v2437_v58 }
 0x219   :  { %2474 = vrot.lane.b32.xlu2 %v2444_v52, %s4996_s30  ;;  %v2628_v24 = vadd.f32 %v2627_v15, %v2562_v2 }
 0x21a   :  { %v2820_v21 = vadd.f32 %v2796_v27, %v2730_v14 }
 0x21b   :  { %3358 = vmatmul.f32.gmra.mxu0 %v3320_v16  ;;  %3384 = vmatmul.f32.gmra.mxu1 %v3319_v4 }
 0x21c   :  { %v2828_v32 = vadd.f32 %v6995_v19, %v2820_v21  ;;  %3430 = vmatmul.f32.gmra.mxu2 %v7175_v39  ;;  %3480 = vmatmul.f32.gmra.mxu3 %v7186_v60  ;;  %v3321_v26 = vld [vmem:[#allocation2 + $0x18] sm:$0xff] }
 0x21e   :  { %v2844_v18 = vmul.f32 0.01, %v2828_v32  ;;  %vm2836_vm5 = vcmp.ge.f32.partialorder %v2828_v32, 0.0 }
 0x21f   :  { %v2709_v61 = vpop.f32.mrf.mxu2  ;;  %v2799_v20 = vpop.f32.mrf.mxu3 }
 0x220   :  { %v2731_v1 = vadd.f32 %v2709_v61, %v2628_v24  ;;  %v2565_v3 = vpop.f32.mrf.mxu0  ;;  %v2630_v13 = vpop.f32.mrf.mxu1  ;;  %v2852_v63 = vsel %vm2836_vm5, %v2828_v32, %v2844_v18 }
 0x221   :  { %2476 = vrot.lane.b32.xlu2 %v2445_v34, %s4996_s30  ;;  %2861 = vst.msk [vmem:[#allocation2 + $0x60] sm:$0xff] %vm418_vm1, %v2852_v63  ;;  %v2631_v38 = vadd.f32 %v2630_v13, %v2565_v3 }
 0x222   :  { %v2821_v57 = vadd.f32 %v2799_v20, %v2731_v1 }
 0x223   :  { %3361 = vmatmul.f32.gmra.mxu0 %v3321_v26  ;;  %3387 = vmatmul.f32.gmra.mxu1 %v3320_v16 }
 0x224   :  { %v2829_v22 = vadd.f32 %v6995_v19, %v2821_v57  ;;  %3433 = vmatmul.f32.gmra.mxu2 %v7186_v60  ;;  %3483 = vmatmul.f32.gmra.mxu3 %v3443_v5 }
 0x226   :  { %v2845_v0 = vmul.f32 0.01, %v2829_v22  ;;  %vm2837_vm6 = vcmp.ge.f32.partialorder %v2829_v22, 0.0 }
 0x227   :  { %v2712_v51 = vpop.f32.mrf.mxu2  ;;  %v2802_v59 = vpop.f32.mrf.mxu3 }
 0x228   :  { %v2732_v8 = vadd.f32 %v2712_v51, %v2631_v38  ;;  %v2568_v56 = vpop.f32.mrf.mxu0  ;;  %v2633_v23 = vpop.f32.mrf.mxu1  ;;  %v2853_v44 = vsel %vm2837_vm6, %v2829_v22, %v2845_v0 }
 0x229   :  { %2862 = vst.msk [vmem:[#allocation2 + $0x68] sm:$0xff] %vm418_vm1, %v2853_v44  ;;  %v2634_v7 = vadd.f32 %v2633_v23, %v2568_v56 }
 0x22a   :  { %v2822_v4 = vadd.f32 %v2802_v59, %v2732_v8 }
 0x22c   :  { %v2830_v49 = vadd.f32 %v6995_v19, %v2822_v4  ;;  %3617 = vmatmul.f32.vlgmr.msrb.gmra.mxu3 %v7175_v39 }
 0x22e   :  { %v2846_v11 = vmul.f32 0.01, %v2830_v49  ;;  %vm2838_vm7 = vcmp.ge.f32.partialorder %v2830_v49, 0.0 }
 0x22f   :  { %v2715_v40 = vpop.f32.mrf.mxu2  ;;  %v2805_v42 = vpop.f32.mrf.mxu3 }
 0x230   :  { %v2733_v10 = vadd.f32 %v2715_v40, %v2634_v7  ;;  %v2571_v29 = vpop.f32.mrf.mxu0  ;;  %v2636_v27 = vpop.f32.mrf.mxu1  ;;  %v2854_v45 = vsel %vm2838_vm7, %v2830_v49, %v2846_v11 }
 0x231   :  { %2863 = vst.msk [vmem:[#allocation2 + $0x70] sm:$0xff] %vm418_vm1, %v2854_v45  ;;  %v2637_v15 = vadd.f32 %v2636_v27, %v2571_v29 }
 0x232   :  { %v2823_v14 = vadd.f32 %v2805_v42, %v2733_v10 }
 0x234   :  { %v2831_v2 = vadd.f32 %v6995_v19, %v2823_v14  ;;  %3620 = vmatmul.f32.gmra.mxu3 %v7186_v60 }
 0x236   :  { %vm2839_vm8 = vcmp.ge.f32.partialorder %v2831_v2, 0.0  ;;  %v2847_v52 = vmul.f32 0.01, %v2831_v2 }
 0x237   :  { %v2718_v21 = vpop.f32.mrf.mxu2  ;;  %v2808_v16 = vpop.f32.mrf.mxu3 }
 0x238   :  { %v2734_v32 = vadd.f32 %v2718_v21, %v2637_v15  ;;  %v2574_v24 = vpop.f32.mrf.mxu0  ;;  %v2639_v58 = vpop.f32.mrf.mxu1  ;;  %v2855_v18 = vsel %vm2839_vm8, %v2831_v2, %v2847_v52 }
 0x239   :  { %2864 = vst.msk [vmem:[#allocation2 + $0x78] sm:$0xff] %vm418_vm1, %v2855_v18  ;;  %v2640_v3 = vadd.f32 %v2639_v58, %v2574_v24  ;;  %v3512_v58 = vld [vmem:[%s7868_s5 + $0x38] sm:$0xff]  ;;  %v3511_v18 = vld [vmem:[%s7868_s5 + $0x30] sm:$0xff] }
 0x23a   :  { %v2824_v61 = vadd.f32 %v2808_v16, %v2734_v32  ;;  %3556 = vmatpush.msrb.mxu1 %v3512_v58  ;;  %v7265_v58 = vld [vmem:[%s7866_s3 + $0x170] sm:$0xff] }
 0x23b   :  { %v2059_v20 = vpop.permute.xlu0 %2058 }
 0x23c   :  { %v2832_v1 = vadd.f32 %v6995_v19, %v2824_v61  ;;  %2069 = vst.msk [vmem:[#allocation2 + $0x48] sm:$0xff] %vm439_vm13, %v2059_v20  ;;  %3623 = vmatmul.f32.gmra.mxu3 %v3443_v5  ;;  %3557 = vmatpush.msrb.mxu1 %v3511_v18 }
 0x23e   :  { %vm2840_vm10 = vcmp.ge.f32.partialorder %v2832_v1, 0.0  ;;  %v2848_v13 = vmul.f32 0.01, %v2832_v1 }
 0x23f   :  { %v2721_v34 = vpop.f32.mrf.mxu2  ;;  %v2811_v63 = vpop.f32.mrf.mxu3 }
 0x240   :  { %v2735_v57 = vadd.f32 %v2721_v34, %v2640_v3  ;;  %v2577_v26 = vpop.f32.mrf.mxu0  ;;  %v2642_v22 = vpop.f32.mrf.mxu1  ;;  %v2856_v38 = vsel %vm2840_vm10, %v2832_v1, %v2848_v13 }
 0x241   :  { %2869 = vrot.lane.b32.xlu0 %v2856_v38, %s4994_s11  ;;  %v2643_v8 = vadd.f32 %v2642_v22, %v2577_v26  ;;  %v3509_v38 = vld [vmem:[%s7868_s5 + $0x20] sm:$0xff] }
 0x242   :  { %v2825_v0 = vadd.f32 %v2811_v63, %v2735_v57  ;;  %v3510_v57 = vld [vmem:[%s7868_s5 + $0x28] sm:$0xff] }
 0x243   :  { %v2057_v51 = vpop.permute.xlu0 %2056  ;;  %3558 = vmatpush.msrb.mxu1 %v3510_v57  ;;  %v4851_v57 = vld [vmem:[%s7868_s5 + $0x60] sm:$0xff] }
 0x244   :  { %v2833_v59 = vadd.f32 %v6995_v19, %v2825_v0  ;;  %2068 = vst.msk [vmem:[#allocation2 + $0x40] sm:$0xff] %vm439_vm13, %v2057_v51 }
 0x245   :  { %3559 = vmatpush.msrb.mxu1 %v3509_v38  ;;  %v4861_v38 = vld [vmem:[%s7868_s5 + $0xa0] sm:$0xff] }
 0x246   :  { %vm2841_vm1 = vcmp.ge.f32.partialorder %v2833_v59, 0.0  ;;  %v2849_v56 = vmul.f32 0.01, %v2833_v59 }
 0x247   :  { %v2724_v5 = vpop.f32.mrf.mxu2  ;;  %v2814_v23 = vpop.f32.mrf.mxu3 }
 0x248   :  { %v2736_v44 = vadd.f32 %v2724_v5, %v2643_v8  ;;  %v2580_v4 = vpop.f32.mrf.mxu0  ;;  %v2645_v49 = vpop.f32.mrf.mxu1  ;;  %v2857_v7 = vsel %vm2841_vm1, %v2833_v59, %v2849_v56  ;;  %v3508_v59 = vld [vmem:[%s7868_s5 + $0x18] sm:$0xff]  ;;  %v3507_v8 = vld [vmem:[%s7868_s5 + $0x10] sm:$0xff] }
 0x249   :  { %2871 = vrot.lane.b32.xlu0 %v2857_v7, %s4994_s11  ;;  %v2646_v10 = vadd.f32 %v2645_v49, %v2580_v4  ;;  %3560 = vmatpush.msrb.mxu1 %v3508_v59  ;;  %v7292_v59 = vld [vmem:[%s7866_s3 + $0x160] sm:$0xff] }
 0x24a   :  { %v2826_v11 = vadd.f32 %v2814_v23, %v2736_v44 }
 0x24b   :  { %v2061_v40 = vpop.permute.xlu0 %2060  ;;  %3561 = vmatpush.msrb.mxu1 %v3507_v8  ;;  %v4850_v8 = vld [vmem:[%s7868_s5 + $0x58] sm:$0xff] }
 0x24c   :  { %v2834_v42 = vadd.f32 %v6995_v19, %v2826_v11  ;;  %2070 = vst.msk [vmem:[#allocation2 + $0x50] sm:$0xff] %vm439_vm13, %v2061_v40  ;;  %v3506_v11 = vld [vmem:[%s7868_s5 + $0x8] sm:$0xff] }
 0x24d   :  { %3562 = vmatpush.msrb.mxu1 %v3506_v11 }
 0x24e   :  { %vm2842_vm11 = vcmp.ge.f32.partialorder %v2834_v42, 0.0  ;;  %v2850_v29 = vmul.f32 0.01, %v2834_v42 }
 0x24f   :  { %v2727_v27 = vpop.f32.mrf.mxu2  ;;  %v2817_v45 = vpop.f32.mrf.mxu3 }
 0x250   :  { %v2737_v14 = vadd.f32 %v2727_v27, %v2646_v10  ;;  %v2958_v2 = vpop.f32.mrf.mxu0  ;;  %v3023_v15 = vpop.f32.mrf.mxu1  ;;  %v2858_v52 = vsel %vm2842_vm11, %v2834_v42, %v2850_v29  ;;  %v3505_v29 = vld [vmem:[%s7868_s5] sm:$0xff] }
 0x251   :  { %2873 = vrot.lane.b32.xlu0 %v2858_v52, %s4994_s11  ;;  %v3024_v24 = vadd.f32 %v3023_v15, %v2958_v2  ;;  %3563 = vmatpush.msrb.mxu1 %v3505_v29  ;;  %v4864_v2 = vld [vmem:[%s7868_s5 + $0xb8] sm:$0xff]  ;;  %v4853_v15 = vld [vmem:[%s7868_s5 + $0x70] sm:$0xff] }
 0x252   :  { %v2827_v21 = vadd.f32 %v2817_v45, %v2737_v14  ;;  %v4854_v14 = vld [vmem:[%s7868_s5 + $0x78] sm:$0xff]  ;;  %3588 = vmatpush.msrb.mxu2 %v4864_v2  ;;  %v7317_v29 = vld [vmem:[%s7866_s3 + $0x150] sm:$0xff]  ;;  %v7330_v2 = vld [vmem:[%s7866_s3 + $0x148] sm:$0xff] }
 0x253   :  { %v2063_v16 = vpop.permute.xlu0 %2062  ;;  %3533 = vmatpush.msrb.mxu0 %v4854_v14  ;;  %v7256_v52 = vld [vmem:[%s7866_s3 + $0x178] sm:$0xff] }
 0x254   :  { %v2835_v32 = vadd.f32 %v6995_v19, %v2827_v21  ;;  %2071 = vst.msk [vmem:[#allocation2 + $0x58] sm:$0xff] %vm439_vm13, %v2063_v16  ;;  %3656 = vmatpush.msra.mxu1 %v7256_v52  ;;  %v4863_v21 = vld [vmem:[%s7868_s5 + $0xb0] sm:$0xff] }
 0x255   :  { %3534 = vmatpush.msrb.mxu0 %v4853_v15  ;;  %3589 = vmatpush.msrb.mxu2 %v4863_v21  ;;  %v4847_v15 = vld [vmem:[%s7868_s5 + $0x40] sm:$0xff] }
 0x256   :  { %vm2843_vm12 = vcmp.ge.f32.partialorder %v2835_v32, 0.0  ;;  %v2851_v61 = vmul.f32 0.01, %v2835_v32  ;;  %3657 = vmatpush.msra.mxu1 %v7265_v58 }
 0x257   :  { %v3105_v20 = vpop.f32.mrf.mxu2  ;;  %v3195_v1 = vpop.f32.mrf.mxu3 }
 0x258   :  { %v3129_v3 = vadd.f32 %v3105_v20, %v3024_v24  ;;  %v2961_v13 = vpop.f32.mrf.mxu0  ;;  %v3026_v34 = vpop.f32.mrf.mxu1  ;;  %v2859_v63 = vsel %vm2843_vm12, %v2835_v32, %v2851_v61 }
 0x259   :  { %2875 = vrot.lane.b32.xlu0 %v2859_v63, %s4994_s11  ;;  %v3027_v51 = vadd.f32 %v3026_v34, %v2961_v13  ;;  %v4862_v13 = vld [vmem:[%s7868_s5 + $0xa8] sm:$0xff] }
 0x25a   :  { %v3219_v26 = vadd.f32 %v3195_v1, %v3129_v3  ;;  %v4852_v3 = vld [vmem:[%s7868_s5 + $0x68] sm:$0xff]  ;;  %3590 = vmatpush.msrb.mxu2 %v4862_v13  ;;  %v7359_v13 = vld [vmem:[%s7866_s3 + $0x70] sm:$0xff] }
 0x25b   :  { %v2453_v22 = vpop.permute.xlu1 %2452  ;;  %3535 = vmatpush.msrb.mxu0 %v4852_v3  ;;  %v7278_v63 = vld [vmem:[%s7866_s3 + $0x168] sm:$0xff] }
 0x25c   :  { %v3227_v0 = vadd.f32 %v6995_v19, %v3219_v26  ;;  %2463 = vst.msk [vmem:[#allocation2 + $0x48] sm:$0xff] %vm834_vm4, %v2453_v22  ;;  %3658 = vmatpush.msra.mxu1 %v7278_v63  ;;  %3591 = vmatpush.msrb.mxu2 %v4861_v38  ;;  %v7373_v38 = vld [vmem:[%s7866_s3 + $0x68] sm:$0xff] }
 0x25d   :  { %3536 = vmatpush.msrb.mxu0 %v4851_v57 }
 0x25e   :  { %vm3235_vm14 = vcmp.ge.f32.partialorder %v3227_v0, 0.0  ;;  %v3243_v56 = vmul.f32 0.01, %v3227_v0  ;;  %3659 = vmatpush.msra.mxu1 %v7292_v59 }
 0x25f   :  { %v3108_v5 = vpop.f32.mrf.mxu2  ;;  %v3198_v23 = vpop.f32.mrf.mxu3  ;;  %3537 = vmatpush.msrb.mxu0 %v4850_v8  ;;  %v7386_v8 = vld [vmem:[%s7866_s3 + $0x60] sm:$0xff] }
 0x260   :  { %v3130_v44 = vadd.f32 %v3108_v5, %v3027_v51  ;;  %v2964_v4 = vpop.f32.mrf.mxu0  ;;  %v3029_v49 = vpop.f32.mrf.mxu1  ;;  %v3251_v7 = vsel %vm3235_vm14, %v3227_v0, %v3243_v56  ;;  %v4860_v56 = vld [vmem:[%s7868_s5 + $0x98] sm:$0xff]  ;;  %v4849_v5 = vld [vmem:[%s7868_s5 + $0x50] sm:$0xff] }
 0x261   :  { %3263 = vrot.lane.b32.xlu1 %v3251_v7, %s4995_s16  ;;  %v3030_v45 = vadd.f32 %v3029_v49, %v2964_v4  ;;  %v7311_v4 = vld [vmem:[%s7866_s3 + $0x158] sm:$0xff]  ;;  %3592 = vmatpush.msrb.mxu2 %v4860_v56 }
 0x262   :  { %v3220_v40 = vadd.f32 %v3198_v23, %v3130_v44  ;;  %v4859_v23 = vld [vmem:[%s7868_s5 + $0x90] sm:$0xff]  ;;  %3660 = vmatpush.msra.mxu1 %v7311_v4  ;;  %3538 = vmatpush.msrb.mxu0 %v4849_v5 }
 0x263   :  { %v2451_v42 = vpop.permute.xlu1 %2450  ;;  %v2473_v10 = vpop.permute.xlu2 %2472  ;;  %3593 = vmatpush.msrb.mxu2 %v4859_v23  ;;  %v7401_v23 = vld [vmem:[%s7866_s3 + $0x58] sm:$0xff] }
 0x264   :  { %v3228_v27 = vadd.f32 %v6995_v19, %v3220_v40  ;;  %2462 = vst.msk [vmem:[#allocation2 + $0x40] sm:$0xff] %vm834_vm4, %v2451_v42  ;;  %3661 = vmatpush.msra.mxu1 %v7317_v29 }
 0x265   :  { %2483 = vst.msk [vmem:[#allocation2 + $0x48] sm:$0xff] %vm855_vm9, %v2473_v10 }
 0x266   :  { %vm3236_vm15 = vcmp.ge.f32.partialorder %v3228_v27, 0.0  ;;  %v3244_v16 = vmul.f32 0.01, %v3228_v27  ;;  %3662 = vmatpush.msra.mxu1 %v7330_v2 }
 0x267   :  { %v3111_v32 = vpop.f32.mrf.mxu2  ;;  %v3201_v24 = vpop.f32.mrf.mxu3 }
 0x268   :  { %v3131_v18 = vadd.f32 %v3111_v32, %v3030_v45  ;;  %v2967_v61 = vpop.f32.mrf.mxu0  ;;  %v3032_v20 = vpop.f32.mrf.mxu1  ;;  %v3252_v1 = vsel %vm3236_vm15, %v3228_v27, %v3244_v16  ;;  %v4848_v27 = vld [vmem:[%s7868_s5 + $0x48] sm:$0xff]  ;;  %v4857_v32 = vld [vmem:[%s7868_s5 + $0x80] sm:$0xff]  ;;  %3663 = vmatpush.msra.mxu1 %v6843_v41 }
 0x269   :  { %3265 = vrot.lane.b32.xlu1 %v3252_v1, %s4995_s16  ;;  %v3033_v51 = vadd.f32 %v3032_v20, %v2967_v61  ;;  %3539 = vmatpush.msrb.mxu0 %v4848_v27  ;;  %v4858_v45 = vld [vmem:[%s7868_s5 + $0x88] sm:$0xff]  ;;  %v7346_v61 = vld [vmem:[%s7866_s3 + $0x78] sm:$0xff]  ;;  %v7421_v27 = vld [vmem:[%s7866_s3 + $0x1d0] sm:$0xff] }
 0x26a   :  { %v3221_v34 = vadd.f32 %v3201_v24, %v3131_v18  ;;  %3594 = vmatpush.msrb.mxu2 %v4858_v45  ;;  %v7352_v20 = vld [vmem:[%s7866_s3 + $0x1f8] sm:$0xff]  ;;  %3664 = vmatpush.msra.mxu1 %v6862_v47  ;;  %v7428_v45 = vld [vmem:[%s7866_s3 + $0x48] sm:$0xff] }
 0x26b   :  { %v2455_v26 = vpop.permute.xlu1 %2454  ;;  %v2471_v22 = vpop.permute.xlu2 %2470  ;;  %3540 = vmatpush.msrb.mxu0 %v4847_v15  ;;  %v7441_v15 = vld [vmem:[%s7866_s3 + $0x40] sm:$0xff] }
 0x26c   :  { %v3229_v0 = vadd.f32 %v6995_v19, %v3221_v34  ;;  %2464 = vst.msk [vmem:[#allocation2 + $0x50] sm:$0xff] %vm834_vm4, %v2455_v26  ;;  %3595 = vmatpush.msrb.mxu2 %v4857_v32  ;;  %v7365_v34 = vld [vmem:[%s7866_s3 + $0x1f0] sm:$0xff]  ;;  %3665 = vmatpush.msra.mxu1 %v6899_v48  ;;  %v7455_v32 = vld [vmem:[%s7866_s3 + $0x38] sm:$0xff] }
 0x26d   :  { %2482 = vst.msk [vmem:[#allocation2 + $0x40] sm:$0xff] %vm855_vm9, %v2471_v22  ;;  %3627 = vmatpush.msra.mxu0 %v7346_v61 }
 0x26e   :  { %vm3237_vm2 = vcmp.ge.f32.partialorder %v3229_v0, 0.0  ;;  %v3245_v44 = vmul.f32 0.01, %v3229_v0  ;;  %3689 = vmatpush.msra.mxu2 %v7352_v20  ;;  %3666 = vmatpush.msra.mxu1 %v6919_v62  ;;  %v7394_v62 = vld [vmem:[%s7866_s3 + $0x1e0] sm:$0xff] }
 0x26f   :  { %v3114_v49 = vpop.f32.mrf.mxu2  ;;  %v3204_v7 = vpop.f32.mrf.mxu3  ;;  %3628 = vmatpush.msra.mxu0 %v7359_v13 }
 0x270   :  { %v3132_v11 = vadd.f32 %v3114_v49, %v3033_v51  ;;  %v2970_v40 = vpop.f32.mrf.mxu0  ;;  %v3035_v42 = vpop.f32.mrf.mxu1  ;;  %v3253_v10 = vsel %vm3237_vm2, %v3229_v0, %v3245_v44  ;;  %3690 = vmatpush.msra.mxu2 %v7365_v34  ;;  %v7380_v51 = vld [vmem:[%s7866_s3 + $0x1e8] sm:$0xff]  ;;  %3667 = vmatpush.msra.mxu1 %v6959_v36  ;;  %v7408_v49 = vld [vmem:[%s7866_s3 + $0x1d8] sm:$0xff] }
 0x271   :  { %3267 = vrot.lane.b32.xlu1 %v3253_v10, %s4995_s16  ;;  %v3036_v18 = vadd.f32 %v3035_v42, %v2970_v40  ;;  %3629 = vmatpush.msra.mxu0 %v7373_v38 }
 0x272   :  { %v3222_v14 = vadd.f32 %v3204_v7, %v3132_v11  ;;  %3691 = vmatpush.msra.mxu2 %v7380_v51  ;;  %3668 = vmatpush.msra.mxu1 %v6983_v37  ;;  %v7414_v11 = vld [vmem:[%s7866_s3 + $0x50] sm:$0xff] }
 0x273   :  { %v2457_v21 = vpop.permute.xlu1 %2456  ;;  %v2475_v16 = vpop.permute.xlu2 %2474  ;;  %3630 = vmatpush.msra.mxu0 %v7386_v8 }
 0x274   :  { %v3230_v24 = vadd.f32 %v6995_v19, %v3222_v14  ;;  %2465 = vst.msk [vmem:[#allocation2 + $0x58] sm:$0xff] %vm834_vm4, %v2457_v21  ;;  %3692 = vmatpush.msra.mxu2 %v7394_v62  ;;  %3669 = vmatpush.msra.mxu1 %v7041_v28  ;;  %v7435_v28 = vld [vmem:[%s7866_s3 + $0x1c8] sm:$0xff] }
 0x275   :  { %2484 = vst.msk [vmem:[#allocation2 + $0x50] sm:$0xff] %vm855_vm9, %v2475_v16  ;;  %3631 = vmatpush.msra.mxu0 %v7401_v23 }
 0x276   :  { %vm3238_vm3 = vcmp.ge.f32.partialorder %v3230_v24, 0.0  ;;  %v3246_v1 = vmul.f32 0.01, %v3230_v24  ;;  %3693 = vmatpush.msra.mxu2 %v7408_v49  ;;  %3670 = vmatpush.msra.mxu1 %v7060_v54  ;;  %v7449_v54 = vld [vmem:[%s7866_s3 + $0x1c0] sm:$0xff] }
 0x277   :  { %v3117_v41 = vpop.f32.mrf.mxu2  ;;  %v3207_v3 = vpop.f32.mrf.mxu3  ;;  %3632 = vmatpush.msra.mxu0 %v7414_v11 }
 0x278   :  { %v3133_v57 = vadd.f32 %v3117_v41, %v3036_v18  ;;  %v2973_v26 = vpop.f32.mrf.mxu0  ;;  %v3038_v22 = vpop.f32.mrf.mxu1  ;;  %v3254_v47 = vsel %vm3238_vm3, %v3230_v24, %v3246_v1  ;;  %3694 = vmatpush.msra.mxu2 %v7421_v27  ;;  %3671 = vmatpush.msra.mxu1 %v7099_v25  ;;  %v7461_v25 = vld [vmem:[%s7866_s3 + $0x1b8] sm:$0xff] }
 0x279   :  { %3269 = vrot.lane.b32.xlu1 %v3254_v47, %s4995_s16  ;;  %v3039_v5 = vadd.f32 %v3038_v22, %v2973_v26  ;;  %3633 = vmatpush.msra.mxu0 %v7428_v45  ;;  %v7468_v22 = vld [vmem:[%s7866_s3 + $0x1b0] sm:$0xff] }
 0x27a   :  { %v3223_v0 = vadd.f32 %v3207_v3, %v3133_v57  ;;  %3695 = vmatpush.msra.mxu2 %v7435_v28 }
 0x27b   :  { %v2477_v48 = vpop.permute.xlu2 %2476  ;;  %3634 = vmatpush.msra.mxu0 %v7441_v15 }
 0x27c   :  { %v3231_v56 = vadd.f32 %v6995_v19, %v3223_v0  ;;  %2485 = vst.msk [vmem:[#allocation2 + $0x58] sm:$0xff] %vm855_vm9, %v2477_v48  ;;  %3696 = vmatpush.msra.mxu2 %v7449_v54 }
 0x27d   :  { %3635 = vmatpush.msra.mxu0 %v7455_v32 }
 0x27e   :  { %vm3239_vm5 = vcmp.ge.f32.partialorder %v3231_v56, 0.0  ;;  %v3247_v44 = vmul.f32 0.01, %v3231_v56  ;;  %3697 = vmatpush.msra.mxu2 %v7461_v25 }
 0x27f   :  { %v3120_v7 = vpop.f32.mrf.mxu2  ;;  %v3210_v36 = vpop.f32.mrf.mxu3  ;;  %3636 = vmatpush.msra.mxu0 %v6914_v12  ;;  %v7476_v12 = vld [vmem:[%s7866_s3 + $0x1a8] sm:$0xff] }
 0x280   :  { %v3134_v40 = vadd.f32 %v3120_v7, %v3039_v5  ;;  %v2976_v42 = vpop.f32.mrf.mxu0  ;;  %v3041_v10 = vpop.f32.mrf.mxu1  ;;  %v3255_v37 = vsel %vm3239_vm5, %v3231_v56, %v3247_v44  ;;  %3698 = vmatpush.msra.mxu2 %v7468_v22 }
 0x281   :  { %3283 = vrot.lane.b32.xlu2 %v3255_v37, %s4996_s30  ;;  %v3042_v16 = vadd.f32 %v3041_v10, %v2976_v42  ;;  %3637 = vmatpush.msra.mxu0 %v6954_v9 }
 0x282   :  { %v3224_v14 = vadd.f32 %v3210_v36, %v3134_v40  ;;  %3699 = vmatpush.msra.mxu2 %v7476_v12 }
 0x283   :  { %3638 = vmatpush.msra.mxu0 %v6978_v35 }
 0x284   :  { %v3232_v21 = vadd.f32 %v6995_v19, %v3224_v14  ;;  %3700 = vmatpush.msra.mxu2 %v6966_v17 }
 0x285   :  { %3639 = vmatpush.msra.mxu0 %v7036_v55 }
 0x286   :  { %vm3240_vm6 = vcmp.ge.f32.partialorder %v3232_v21, 0.0  ;;  %v3248_v24 = vmul.f32 0.01, %v3232_v21  ;;  %3701 = vmatpush.msra.mxu2 %v6990_v31 }
 0x287   :  { %v3123_v18 = vpop.f32.mrf.mxu2  ;;  %v3213_v1 = vpop.f32.mrf.mxu3  ;;  %3640 = vmatpush.msra.mxu0 %v7053_v33 }
 0x288   :  { %v3135_v41 = vadd.f32 %v3123_v18, %v3042_v16  ;;  %v2979_v3 = vpop.f32.mrf.mxu0  ;;  %v3044_v57 = vpop.f32.mrf.mxu1  ;;  %v3256_v26 = vsel %vm3240_vm6, %v3232_v21, %v3248_v24  ;;  %3702 = vmatpush.msra.mxu2 %v7013_v6  ;;  %v7495_v6 = vld [vmem:[%s7867_s4] ss:$0 sm:$0xff] }
 0x289   :  { %3285 = vrot.lane.b32.xlu2 %v3256_v26, %s4996_s30  ;;  %v3045_v48 = vadd.f32 %v3044_v57, %v2979_v3  ;;  %3641 = vmatpush.msra.mxu0 %v7090_v30 }
 0x28a   :  { %v3225_v47 = vadd.f32 %v3213_v1, %v3135_v41  ;;  %3703 = vmatpush.msra.mxu2 %v7023_v46  ;;  %v4957_v41 = vld [vmem:[%s7866_s3 + $0xf8] sm:$0xff] }
 0x28b   :  { %3642 = vmatpush.msra.mxu0 %v7111_v43 }
 0x28c   :  { %v3233_v0 = vadd.f32 %v6995_v19, %v3225_v47  ;;  %3704 = vmatpush.msra.mxu2 %v7065_v50  ;;  %v4958_v47 = vld [vmem:[%s7866_s3 + $0xf0] sm:$0xff] }
 0x28e   :  { %vm3241_vm7 = vcmp.ge.f32.partialorder %v3233_v0, 0.0  ;;  %v3249_v56 = vmul.f32 0.01, %v3233_v0 }
 0x28f   :  { %v3126_v9 = vpop.f32.mrf.mxu2  ;;  %v3216_v5 = vpop.f32.mrf.mxu3 }
 0x290   :  { %v3136_v44 = vadd.f32 %v3126_v9, %v3045_v48  ;;  %v3257_v7 = vsel %vm3241_vm7, %v3233_v0, %v3249_v56  ;;  %v3356_v36 = vpop.f32.mrf.mxu0  ;;  %v3382_v40 = vpop.f32.mrf.mxu1  ;;  %v4959_v56 = vld [vmem:[%s7866_s3 + $0xe8] sm:$0xff] }
 0x291   :  { %3287 = vrot.lane.b32.xlu2 %v3257_v7, %s4996_s30  ;;  %v3383_v31 = vadd.f32 %v3382_v40, %v3356_v36  ;;  %v4960_v7 = vld [vmem:[%s7866_s3 + $0xe0] sm:$0xff] }
 0x292   :  { %v3226_v17 = vadd.f32 %v3216_v5, %v3136_v44  ;;  %v7513_v36 = vld [vmem:[#allocation2 + $0x40] sm:$0xff] }
 0x294   :  { %v3234_v35 = vadd.f32 %v6995_v19, %v3226_v17 }
 0x296   :  { %vm3242_vm8 = vcmp.ge.f32.partialorder %v3234_v35, 0.0  ;;  %v3250_v55 = vmul.f32 0.01, %v3234_v35 }
 0x297   :  { %v3428_v33 = vpop.f32.mrf.mxu2  ;;  %v3478_v42 = vpop.f32.mrf.mxu3 }
 0x298   :  { %v3437_v10 = vadd.f32 %v3428_v33, %v3383_v31  ;;  %v3258_v30 = vsel %vm3242_vm8, %v3234_v35, %v3250_v55  ;;  %v3359_v46 = vpop.f32.mrf.mxu0  ;;  %v3385_v43 = vpop.f32.mrf.mxu1  ;;  %v4961_v35 = vld [vmem:[%s7866_s3 + $0xd8] sm:$0xff]  ;;  %v4962_v55 = vld [vmem:[%s7866_s3 + $0xd0] sm:$0xff] }
 0x299   :  { %3289 = vrot.lane.b32.xlu2 %v3258_v30, %s4996_s30  ;;  %v3386_v14 = vadd.f32 %v3385_v43, %v3359_v46  ;;  %v4964_v30 = vld [vmem:[%s7866_s3 + $0xc0] sm:$0xff]  ;;  %v7532_v46 = vld [vmem:[#allocation2 + $0x48] sm:$0xff]  ;;  %v4965_v43 = vld [vmem:[%s7866_s3 + $0xb8] sm:$0xff] }
 0x29a   :  { %v3487_v37 = vadd.f32 %v3478_v42, %v3437_v10  ;;  %v4963_v42 = vld [vmem:[%s7866_s3 + $0xc8] sm:$0xff] }
 0x29c   :  { %v3493_v19 = vadd.f32 %v7495_v6, %v3487_v37 }
 0x29e   :  { %vm3496_vm10 = vcmp.ge.f32.partialorder %v3493_v19, 0.0  ;;  %v3499_v50 = vmul.f32 0.01, %v3493_v19 }
 0x29f   :  { %v3431_v21 = vpop.f32.mrf.mxu2  ;;  %v3481_v16 = vpop.f32.mrf.mxu3 }
 0x2a0   :  { %v3502_v24 = vsel %vm3496_vm10, %v3493_v19, %v3499_v50  ;;  %v3438_v18 = vadd.f32 %v3431_v21, %v3386_v14  ;;  %v3362_v3 = vpop.f32.mrf.mxu0  ;;  %v3388_v57 = vpop.f32.mrf.mxu1  ;;  %v4968_v19 = vld [vmem:[%s7866_s3 + $0xa0] sm:$0xff]  ;;  %v4974_v14 = vld [vmem:[%s7866_s3 + $0x28] sm:$0xff] }
 0x2a1   :  { %4856 = vmatmul.msk.f32.vlgmr.msrb.gmra.mxu1 %vm70_vm0, %v3502_v24  ;;  %v3389_v48 = vadd.f32 %v3388_v57, %v3362_v3  ;;  %v4978_v24 = vld [vmem:[%s7866_s3 + $0x8] sm:$0xff] }
 0x2a2   :  { %v3488_v1 = vadd.f32 %v3481_v16, %v3438_v18  ;;  %3829 = vmatpush.msrb.mxu1 %v4957_v41  ;;  %v4977_v16 = vld [vmem:[%s7866_s3 + $0x10] sm:$0xff]  ;;  %v4979_v18 = vld [vmem:[%s7866_s3] sm:$0xff] }
 0x2a4   :  { %v3494_v26 = vadd.f32 %v7495_v6, %v3488_v1  ;;  %3830 = vmatpush.msrb.mxu1 %v4958_v47 }
 0x2a6   :  { %vm3497_vm1 = vcmp.ge.f32.partialorder %v3494_v26, 0.0  ;;  %v3500_v0 = vmul.f32 0.01, %v3494_v26  ;;  %3831 = vmatpush.msrb.mxu1 %v4959_v56  ;;  %v4873_v56 = vld [vmem:[%s7868_s5 + $0xf8] sm:$0xff] }
 0x2a7   :  { %v3434_v9 = vpop.f32.mrf.mxu2  ;;  %v3484_v40 = vpop.f32.mrf.mxu3  ;;  %3750 = vmatpush.msra.mxu3 %v4873_v56 }
 0x2a8   :  { %v3503_v5 = vsel %vm3497_vm1, %v3494_v26, %v3500_v0  ;;  %v3439_v44 = vadd.f32 %v3434_v9, %v3389_v48  ;;  %3832 = vmatpush.msrb.mxu1 %v4960_v7  ;;  %v4872_v9 = vld [vmem:[%s7868_s5 + $0xf0] sm:$0xff]  ;;  %v4869_v7 = vld [vmem:[%s7868_s5 + $0xd8] sm:$0xff] }
 0x2a9   :  { %4855 = vmatmul.msk.f32.vlgmr.msrb.gmra.mxu0 %vm70_vm0, %v3503_v5  ;;  %3672 = vmatmul.f32.vlgmr.msra.gmra.mxu1 %v7513_v36  ;;  %v4871_v5 = vld [vmem:[%s7868_s5 + $0xe8] sm:$0xff] }
 0x2aa   :  { %v3489_v17 = vadd.f32 %v3484_v40, %v3439_v44  ;;  %3833 = vmatpush.msrb.mxu1 %v4961_v35  ;;  %3751 = vmatpush.msra.mxu3 %v4872_v9  ;;  %v4870_v44 = vld [vmem:[%s7868_s5 + $0xe0] sm:$0xff]  ;;  %v4868_v40 = vld [vmem:[%s7868_s5 + $0xd0] sm:$0xff]  ;;  %v4867_v35 = vld [vmem:[%s7868_s5 + $0xc8] sm:$0xff] }
 0x2ac   :  { %v3495_v31 = vadd.f32 %v7495_v6, %v3489_v17  ;;  %3834 = vmatpush.msrb.mxu1 %v4962_v55  ;;  %3752 = vmatpush.msra.mxu3 %v4871_v5  ;;  %v4890_v17 = vld [vmem:[%s7868_s5 + $0x170] sm:$0xff]  ;;  %v4866_v55 = vld [vmem:[%s7868_s5 + $0xc0] sm:$0xff] }
 0x2ae   :  { %vm3498_vm11 = vcmp.ge.f32.partialorder %v3495_v31, 0.0  ;;  %v3501_v33 = vmul.f32 0.01, %v3495_v31  ;;  %3835 = vmatpush.msrb.mxu1 %v4963_v42  ;;  %3753 = vmatpush.msra.mxu3 %v4870_v44  ;;  %v4882_v42 = vld [vmem:[%s7868_s5 + $0x138] sm:$0xff] }
 0x2b0   :  { %v3504_v10 = vsel %vm3498_vm11, %v3495_v31, %v3501_v33  ;;  %3836 = vmatpush.msrb.mxu1 %v4964_v30  ;;  %3754 = vmatpush.msra.mxu3 %v4869_v7  ;;  %v4889_v31 = vld [vmem:[%s7868_s5 + $0x168] sm:$0xff]  ;;  %v4888_v33 = vld [vmem:[%s7868_s5 + $0x160] sm:$0xff]  ;;  %v4881_v30 = vld [vmem:[%s7868_s5 + $0x130] sm:$0xff] }
 0x2b1   :  { %4865 = vmatmul.msk.f32.vlgmr.msrb.gmra.mxu2 %vm70_vm0, %v3504_v10  ;;  %3643 = vmatmul.f32.vlgmr.msra.gmra.mxu0 %v7173_v53  ;;  %v4966_v53 = vld [vmem:[%s7866_s3 + $0xb0] sm:$0xff]  ;;  %v4887_v10 = vld [vmem:[%s7868_s5 + $0x158] sm:$0xff] }
 0x2b2   :  { %3675 = vmatmul.f32.gmra.mxu1 %v7532_v46  ;;  %3855 = vmatpush.msrb.mxu2 %v7346_v61  ;;  %v4967_v61 = vld [vmem:[%s7866_s3 + $0xa8] sm:$0xff] }
 0x2b3   :  { %3837 = vmatpush.msrb.mxu1 %v4965_v43  ;;  %v2870_v37 = vpop.permute.xlu0 %2869  ;;  %3755 = vmatpush.msra.mxu3 %v4868_v40  ;;  %v4880_v43 = vld [vmem:[%s7868_s5 + $0x128] sm:$0xff] }
 0x2b4   :  { %2881 = vst.msk [vmem:[#allocation2 + $0x60] sm:$0xff] %vm439_vm13, %v2870_v37  ;;  %3856 = vmatpush.msrb.mxu2 %v7359_v13  ;;  %v3655_v13 = vld [vmem:[#allocation2 + $0x50] sm:$0xff]  ;;  %v4885_v37 = vld [vmem:[%s7868_s5 + $0x148] sm:$0xff] }
 0x2b5   :  { %3838 = vmatpush.msrb.mxu1 %v4966_v53  ;;  %3756 = vmatpush.msra.mxu3 %v4867_v35  ;;  %v4879_v53 = vld [vmem:[%s7868_s5 + $0x120] sm:$0xff]  ;;  %v4991_v35 = vld [vmem:[%s7866_s3 + $0x110] sm:$0xff] }
 0x2b6   :  { %3857 = vmatpush.msrb.mxu2 %v7373_v38  ;;  %v4969_v38 = vld [vmem:[%s7866_s3 + $0x98] sm:$0xff] }
 0x2b7   :  { %3839 = vmatpush.msrb.mxu1 %v4967_v61  ;;  %3757 = vmatpush.msra.mxu3 %v4866_v55  ;;  %v4884_v61 = vld [vmem:[%s7868_s5 + $0x140] sm:$0xff] }
 0x2b8   :  { %3858 = vmatpush.msrb.mxu2 %v7386_v8  ;;  %v4970_v8 = vld [vmem:[%s7866_s3 + $0x90] sm:$0xff]  ;;  %v4993_v55 = vld [vmem:[%s7866_s3 + $0x100] sm:$0xff] }
 0x2b9   :  { %3840 = vmatpush.msrb.mxu1 %v4968_v19  ;;  %3646 = vmatmul.f32.gmra.mxu0 %v7175_v39  ;;  %v4971_v39 = vld [vmem:[%s7866_s3 + $0x88] sm:$0xff]  ;;  %v4878_v19 = vld [vmem:[%s7868_s5 + $0x118] sm:$0xff] }
 0x2ba   :  { %3678 = vmatmul.f32.gmra.mxu1 %v3655_v13  ;;  %3705 = vmatmul.f32.vlgmr.msra.gmra.mxu2 %v7532_v46 }
 0x2bb   :  { %3841 = vmatpush.msrb.mxu1 %v4969_v38  ;;  %3859 = vmatpush.msrb.mxu2 %v7401_v23  ;;  %v2872_v50 = vpop.permute.xlu0 %2871  ;;  %v4972_v23 = vld [vmem:[%s7866_s3 + $0x80] sm:$0xff]  ;;  %v4876_v38 = vld [vmem:[%s7868_s5 + $0x108] sm:$0xff] }
 0x2bc   :  { %2882 = vst.msk [vmem:[#allocation2 + $0x68] sm:$0xff] %vm439_vm13, %v2872_v50  ;;  %3783 = vmatpush.msrb.mxu3 %v4882_v42  ;;  %v4875_v50 = vld [vmem:[%s7868_s5 + $0x100] sm:$0xff] }
 0x2bd   :  { %3842 = vmatpush.msrb.mxu1 %v4970_v8  ;;  %3860 = vmatpush.msrb.mxu2 %v7414_v11 }
 0x2be   :  { %3784 = vmatpush.msrb.mxu3 %v4881_v30  ;;  %v4900_v30 = vld [vmem:[%s7868_s5 + $0x1b8] sm:$0xff] }
 0x2bf   :  { %3843 = vmatpush.msrb.mxu1 %v4971_v39  ;;  %3861 = vmatpush.msrb.mxu2 %v7428_v45  ;;  %v4973_v45 = vld [vmem:[%s7866_s3 + $0x30] sm:$0xff] }
 0x2c0   :  { %3785 = vmatpush.msrb.mxu3 %v4880_v43  ;;  %v4899_v43 = vld [vmem:[%s7868_s5 + $0x1b0] sm:$0xff] }
 0x2c1   :  { %3844 = vmatpush.msrb.mxu1 %v4972_v23  ;;  %3862 = vmatpush.msrb.mxu2 %v7441_v15  ;;  %v3688_v15 = vld [vmem:[#allocation2 + $0x58] sm:$0xff] }
 0x2c2   :  { %3649 = vmatmul.f32.gmra.mxu0 %v7186_v60  ;;  %3708 = vmatmul.f32.gmra.mxu2 %v3655_v13  ;;  %v4975_v60 = vld [vmem:[%s7866_s3 + $0x20] sm:$0xff] }
 0x2c3   :  { %3845 = vmatmul.f32.vlgmr.msrb.gmra.mxu1 %v7532_v46  ;;  %3863 = vmatpush.msrb.mxu2 %v7455_v32  ;;  %v2874_v11 = vpop.permute.xlu0 %2873  ;;  %v4976_v32 = vld [vmem:[%s7866_s3 + $0x18] sm:$0xff] }
 0x2c4   :  { %2883 = vst.msk [vmem:[#allocation2 + $0x70] sm:$0xff] %vm439_vm13, %v2874_v11  ;;  %3786 = vmatpush.msrb.mxu3 %v4879_v53  ;;  %3978 = vmatpush.msra.mxu1 %v4900_v30  ;;  %v4898_v53 = vld [vmem:[%s7868_s5 + $0x1a8] sm:$0xff]  ;;  %v4067_v30 = vld [vmem:[%s7871_s7 + $0x18] sm:$0xff] }
 0x2c5   :  { %3864 = vmatpush.msrb.mxu2 %v4973_v45 }
 0x2c6   :  { %3787 = vmatpush.msrb.mxu3 %v4878_v19  ;;  %3979 = vmatpush.msra.mxu1 %v4899_v43  ;;  %v4897_v19 = vld [vmem:[%s7868_s5 + $0x1a0] sm:$0xff]  ;;  %v4065_v43 = vld [vmem:[%s7871_s7 + $0x8] sm:$0xff] }
 0x2c7   :  { %3865 = vmatpush.msrb.mxu2 %v4974_v14 }
 0x2c8   :  { %3980 = vmatpush.msra.mxu1 %v4898_v53 }
 0x2c9   :  { %3866 = vmatpush.msrb.mxu2 %v4975_v60  ;;  %v4984_v60 = vld [vmem:[%s7866_s3 + $0x180] sm:$0xff] }
 0x2ca   :  { %3711 = vmatmul.f32.gmra.mxu2 %v3688_v15  ;;  %3981 = vmatpush.msra.mxu1 %v4897_v19 }
 0x2cb   :  { %3848 = vmatmul.f32.gmra.mxu1 %v3655_v13  ;;  %3867 = vmatpush.msrb.mxu2 %v4976_v32  ;;  %v2876_v21 = vpop.permute.xlu0 %2875 }
 0x2cc   :  { %2884 = vst.msk [vmem:[#allocation2 + $0x78] sm:$0xff] %vm439_vm13, %v2876_v21 }
 0x2cd   :  { %3868 = vmatpush.msrb.mxu2 %v4977_v16 }
 0x2cf   :  { %3869 = vmatpush.msrb.mxu2 %v4978_v24 }
 0x2d1   :  { %3870 = vmatpush.msrb.mxu2 %v4979_v18 }
 0x2d2   :  { %3871 = vmatmul.f32.vlgmr.msrb.gmra.mxu2 %v7513_v36  ;;  %v4891_v36 = vld [vmem:[%s7868_s5 + $0x178] sm:$0xff] }
 0x2d3   :  { %3851 = vmatmul.f32.gmra.mxu1 %v3688_v15  ;;  %v3264_v1 = vpop.permute.xlu1 %3263  ;;  %3816 = vmatpush.msrb.mxu0 %v4891_v36  ;;  %v4989_v36 = vld [vmem:[%s7866_s3 + $0x120] sm:$0xff] }
 0x2d4   :  { %3275 = vst.msk [vmem:[#allocation2 + $0x60] sm:$0xff] %vm834_vm4, %v3264_v1 }
 0x2d5   :  { %3817 = vmatpush.msrb.mxu0 %v4890_v17  ;;  %v4990_v17 = vld [vmem:[%s7866_s3 + $0x118] sm:$0xff] }
 0x2d7   :  { %3818 = vmatpush.msrb.mxu0 %v4889_v31  ;;  %v4992_v31 = vld [vmem:[%s7866_s3 + $0x108] sm:$0xff] }
 0x2d9   :  { %3819 = vmatpush.msrb.mxu0 %v4888_v33 }
 0x2da   :  { %3874 = vmatmul.f32.gmra.mxu2 %v7532_v46  ;;  %v4886_v46 = vld [vmem:[%s7868_s5 + $0x150] sm:$0xff] }
 0x2db   :  { %v3266_v41 = vpop.permute.xlu1 %3265  ;;  %v3284_v3 = vpop.permute.xlu2 %3283  ;;  %3820 = vmatpush.msrb.mxu0 %v4887_v10 }
 0x2dc   :  { %3276 = vst.msk [vmem:[#allocation2 + $0x68] sm:$0xff] %vm834_vm4, %v3266_v41 }
 0x2dd   :  { %3295 = vst.msk [vmem:[#allocation2 + $0x60] sm:$0xff] %vm855_vm9, %v3284_v3  ;;  %3821 = vmatpush.msrb.mxu0 %v4886_v46  ;;  %v4909_v46 = vld [vmem:[%s7868_s5 + $0x1f8] sm:$0xff] }
 0x2de   :  { %4011 = vmatpush.msra.mxu2 %v4909_v46  ;;  %v4066_v46 = vld [vmem:[%s7871_s7 + $0x10] sm:$0xff] }
 0x2df   :  { %3822 = vmatpush.msrb.mxu0 %v4885_v37  ;;  %v4908_v37 = vld [vmem:[%s7868_s5 + $0x1f0] sm:$0xff] }
 0x2e0   :  { %4012 = vmatpush.msra.mxu2 %v4908_v37  ;;  %v4064_v37 = vld [vmem:[%s7871_s7] sm:$0xff] }
 0x2e1   :  { %3823 = vmatpush.msrb.mxu0 %v4884_v61 }
 0x2e2   :  { %3877 = vmatmul.f32.gmra.mxu2 %v3655_v13  ;;  %v4877_v13 = vld [vmem:[%s7868_s5 + $0x110] sm:$0xff] }
 0x2e3   :  { %v3268_v57 = vpop.permute.xlu1 %3267  ;;  %v3286_v26 = vpop.permute.xlu2 %3285  ;;  %3917 = vmatpush.msra.mxu0 %v7352_v20  ;;  %3788 = vmatpush.msrb.mxu3 %v4877_v13 }
 0x2e4   :  { %3277 = vst.msk [vmem:[#allocation2 + $0x70] sm:$0xff] %vm834_vm4, %v3268_v57  ;;  %v3881_v33 = vld [vmem:[#allocation2 + $0x60] sm:$0xff] }
 0x2e5   :  { %3296 = vst.msk [vmem:[#allocation2 + $0x68] sm:$0xff] %vm855_vm9, %v3286_v26  ;;  %3918 = vmatpush.msra.mxu0 %v7365_v34  ;;  %3789 = vmatpush.msrb.mxu3 %v4876_v38  ;;  %v4896_v38 = vld [vmem:[%s7868_s5 + $0x198] sm:$0xff] }
 0x2e6   :  { %3982 = vmatpush.msra.mxu1 %v4896_v38  ;;  %v4926_v38 = vld [vmem:[%s7869_s6] ss:$0 sm:$0xff] }
 0x2e7   :  { %3919 = vmatpush.msra.mxu0 %v7380_v51  ;;  %3790 = vmatpush.msrb.mxu3 %v4875_v50  ;;  %v3618_v51 = vpop.f32.mrf.mxu3  ;;  %v4895_v50 = vld [vmem:[%s7868_s5 + $0x190] sm:$0xff] }
 0x2e8   :  { %3983 = vmatpush.msra.mxu1 %v4895_v50 }
 0x2e9   :  { %3920 = vmatpush.msra.mxu0 %v7394_v62 }
 0x2eb   :  { %v3270_v47 = vpop.permute.xlu1 %3269  ;;  %v3288_v0 = vpop.permute.xlu2 %3287  ;;  %3921 = vmatpush.msra.mxu0 %v7408_v49  ;;  %v4980_v49 = vld [vmem:[%s7866_s3 + $0x1a0] sm:$0xff] }
 0x2ec   :  { %3278 = vst.msk [vmem:[#allocation2 + $0x78] sm:$0xff] %vm834_vm4, %v3270_v47  ;;  %v3914_v40 = vld [vmem:[#allocation2 + $0x68] sm:$0xff] }
 0x2ed   :  { %3297 = vst.msk [vmem:[#allocation2 + $0x70] sm:$0xff] %vm855_vm9, %v3288_v0  ;;  %3922 = vmatpush.msra.mxu0 %v7421_v27 }
 0x2ef   :  { %3923 = vmatpush.msra.mxu0 %v7435_v28  ;;  %v4981_v28 = vld [vmem:[%s7866_s3 + $0x198] sm:$0xff]  ;;  %v3621_v45 = vpop.f32.mrf.mxu3 }
 0x2f1   :  { %3924 = vmatpush.msra.mxu0 %v7449_v54 }
 0x2f3   :  { %v3290_v48 = vpop.permute.xlu2 %3289  ;;  %3925 = vmatpush.msra.mxu0 %v7461_v25  ;;  %v4982_v25 = vld [vmem:[%s7866_s3 + $0x190] sm:$0xff] }
 0x2f4   :  { %3298 = vst.msk [vmem:[#allocation2 + $0x78] sm:$0xff] %vm855_vm9, %v3290_v48  ;;  %v3915_v42 = vld [vmem:[#allocation2 + $0x70] sm:$0xff] }
 0x2f5   :  { %3926 = vmatpush.msra.mxu0 %v7468_v22 }
 0x2f7   :  { %3927 = vmatpush.msra.mxu0 %v7476_v12  ;;  %v4983_v12 = vld [vmem:[%s7866_s3 + $0x188] sm:$0xff]  ;;  %v3624_v26 = vpop.f32.mrf.mxu3 }
 0x2f9   :  { %3928 = vmatpush.msra.mxu0 %v4980_v49 }
 0x2fb   :  { %3929 = vmatpush.msra.mxu0 %v4981_v28  ;;  %v3916_v10 = vld [vmem:[#allocation2 + $0x78] sm:$0xff] }
 0x2fd   :  { %3930 = vmatpush.msra.mxu0 %v4982_v25  ;;  %v4917_v25 = vld [vmem:[%s7868_s5 + $0x230] sm:$0xff] }
 0x2ff   :  { %3931 = vmatpush.msra.mxu0 %v4983_v12  ;;  %v4916_v12 = vld [vmem:[%s7868_s5 + $0x228] sm:$0xff] }
 0x301   :  { %3932 = vmatpush.msra.mxu0 %v4984_v60  ;;  %v4913_v60 = vld [vmem:[%s7868_s5 + $0x210] sm:$0xff] }
 0x31e   :  { %v3565_v20 = vpop.f32.mrf.mxu1 }
 0x326   :  { %v3542_v8 = vpop.f32.mrf.mxu0  ;;  %v3673_v27 = vpop.f32.mrf.mxu1 }
 0x327   :  { %v3566_v39 = vadd.f32 %v3565_v20, %v3542_v8  ;;  %v4907_v20 = vld [vmem:[%s7868_s5 + $0x1e8] sm:$0xff] }
 0x328   :  { %v4894_v8 = vld [vmem:[%s7868_s5 + $0x188] sm:$0xff]  ;;  %4013 = vmatpush.msra.mxu2 %v4907_v20 }
 0x329   :  { %3984 = vmatpush.msra.mxu1 %v4894_v8 }
 0x32e   :  { %v3644_v34 = vpop.f32.mrf.mxu0 }
 0x32f   :  { %v3645_v54 = vadd.f32 %v3644_v34, %v3618_v51  ;;  %v3676_v16 = vpop.f32.mrf.mxu1  ;;  %v4905_v51 = vld [vmem:[%s7868_s5 + $0x1d8] sm:$0xff] }
 0x331   :  { %v3682_v11 = vadd.f32 %v3673_v27, %v3645_v54  ;;  %v4918_v27 = vld [vmem:[%s7868_s5 + $0x238] sm:$0xff]  ;;  %v4904_v54 = vld [vmem:[%s7868_s5 + $0x1d0] sm:$0xff] }
 0x334   :  { %v3597_v62 = vpop.f32.mrf.mxu2 }
 0x335   :  { %v7690_v23 = vadd.f32 %v3597_v62, %v3566_v39  ;;  %v4906_v39 = vld [vmem:[%s7868_s5 + $0x1e0] sm:$0xff] }
 0x336   :  { %v3647_v22 = vpop.f32.mrf.mxu0  ;;  %v4893_v62 = vld [vmem:[%s7868_s5 + $0x180] sm:$0xff]  ;;  %4014 = vmatpush.msra.mxu2 %v4906_v39 }
 0x337   :  { %v3648_v32 = vadd.f32 %v3647_v22, %v3621_v45  ;;  %v3679_v56 = vpop.f32.mrf.mxu1  ;;  %3985 = vmatpush.msra.mxu1 %v4893_v62  ;;  %v4903_v22 = vld [vmem:[%s7868_s5 + $0x1c8] sm:$0xff]  ;;  %v4915_v45 = vld [vmem:[%s7868_s5 + $0x220] sm:$0xff] }
 0x338   :  { %4015 = vmatpush.msra.mxu2 %v4905_v51  ;;  %v4927_v51 = vld [vmem:[%s7870_s8] ss:$0 sm:$0xff] }
 0x339   :  { %v3683_v1 = vadd.f32 %v3676_v16, %v3648_v32  ;;  %4044 = vmatpush.msrb.mxu1 %v4918_v27  ;;  %v4911_v32 = vld [vmem:[%s7868_s5 + $0x200] sm:$0xff] }
 0x33a   :  { %4016 = vmatpush.msra.mxu2 %v4904_v54 }
 0x33b   :  { %4045 = vmatpush.msrb.mxu1 %v4917_v25 }
 0x33c   :  { %4017 = vmatpush.msra.mxu2 %v4903_v22 }
 0x33d   :  { %v3706_v14 = vpop.f32.mrf.mxu2  ;;  %4046 = vmatpush.msrb.mxu1 %v4916_v12 }
 0x33e   :  { %v3715_v15 = vadd.f32 %v3706_v14, %v3682_v11  ;;  %v4902_v11 = vld [vmem:[%s7868_s5 + $0x1c0] sm:$0xff]  ;;  %v4914_v14 = vld [vmem:[%s7868_s5 + $0x218] sm:$0xff] }
 0x33f   :  { %v3650_v41 = vpop.f32.mrf.mxu0  ;;  %4018 = vmatpush.msra.mxu2 %v4902_v11  ;;  %4047 = vmatpush.msrb.mxu1 %v4915_v45 }
 0x340   :  { %v3718_v21 = vadd.f32 %v7495_v6, %v3715_v15  ;;  %v3651_v47 = vadd.f32 %v3650_v41, %v3624_v26  ;;  %v4912_v15 = vld [vmem:[%s7868_s5 + $0x208] sm:$0xff]  ;;  %v3846_v16 = vpop.f32.mrf.mxu1 }
 0x341   :  { %4048 = vmatpush.msrb.mxu1 %v4914_v14 }
 0x342   :  { %vm3721_vm13 = vcmp.ge.f32.partialorder %v3718_v21, 0.0  ;;  %v3724_v24 = vmul.f32 0.01, %v3718_v21  ;;  %v3684_v5 = vadd.f32 %v3679_v56, %v3651_v47 }
 0x343   :  { %4049 = vmatpush.msrb.mxu1 %v4913_v60 }
 0x344   :  { %v3727_v18 = vsel %vm3721_vm13, %v3718_v21, %v3724_v24 }
 0x345   :  { %v3709_v3 = vpop.f32.mrf.mxu2  ;;  %4874 = vmatmul.msk.f32.vlgmr.msra.gmra.mxu3 %vm70_vm0, %v3727_v18  ;;  %4050 = vmatpush.msrb.mxu1 %v4912_v15 }
 0x346   :  { %v3716_v57 = vadd.f32 %v3709_v3, %v3683_v1  ;;  %3884 = vmatpush.msra.mxu3 %v7256_v52 }
 0x347   :  { %4051 = vmatpush.msrb.mxu1 %v4911_v32 }
 0x348   :  { %v3719_v0 = vadd.f32 %v7495_v6, %v3716_v57  ;;  %3885 = vmatpush.msra.mxu3 %v7265_v58  ;;  %v3849_v26 = vpop.f32.mrf.mxu1 }
 0x34a   :  { %vm3722_vm4 = vcmp.ge.f32.partialorder %v3719_v0, 0.0  ;;  %v3725_v48 = vmul.f32 0.01, %v3719_v0  ;;  %3886 = vmatpush.msra.mxu3 %v7278_v63 }
 0x34c   :  { %v3728_v9 = vsel %vm3722_vm4, %v3719_v0, %v3725_v48  ;;  %3887 = vmatpush.msra.mxu3 %v7292_v59  ;;  %v4985_v59 = vld [vmem:[%s7866_s3 + $0x140] sm:$0xff] }
 0x34d   :  { %v3712_v44 = vpop.f32.mrf.mxu2  ;;  %4883 = vmatmul.msk.f32.vlgmr.msrb.gmra.mxu3 %vm70_vm0, %v3728_v9 }
 0x34e   :  { %v3717_v7 = vadd.f32 %v3712_v44, %v3684_v5  ;;  %3888 = vmatpush.msra.mxu3 %v7311_v4  ;;  %v4986_v4 = vld [vmem:[%s7866_s3 + $0x138] sm:$0xff] }
 0x350   :  { %v3720_v52 = vadd.f32 %v7495_v6, %v3717_v7  ;;  %3889 = vmatpush.msra.mxu3 %v7317_v29  ;;  %v4987_v29 = vld [vmem:[%s7866_s3 + $0x130] sm:$0xff] }
 0x352   :  { %vm3723_vm9 = vcmp.ge.f32.partialorder %v3720_v52, 0.0  ;;  %v3726_v58 = vmul.f32 0.01, %v3720_v52  ;;  %3890 = vmatpush.msra.mxu3 %v7330_v2  ;;  %v4988_v2 = vld [vmem:[%s7866_s3 + $0x128] sm:$0xff] }
 0x354   :  { %v3729_v63 = vsel %vm3723_vm9, %v3720_v52, %v3726_v58  ;;  %3891 = vmatpush.msra.mxu3 %v4985_v59 }
 0x355   :  { %4892 = vmatmul.msk.f32.vlgmr.msrb.gmra.mxu0 %vm70_vm0, %v3729_v63  ;;  %v3872_v21 = vpop.f32.mrf.mxu2  ;;  %v3852_v63 = vpop.f32.mrf.mxu1 }
 0x356   :  { %3892 = vmatpush.msra.mxu3 %v4986_v4  ;;  %v3873_v18 = vadd.f32 %v3872_v21, %v3846_v16 }
 0x358   :  { %3893 = vmatpush.msra.mxu3 %v4987_v29 }
 0x35a   :  { %3894 = vmatpush.msra.mxu3 %v4988_v2 }
 0x35c   :  { %3895 = vmatpush.msra.mxu3 %v4989_v36 }
 0x35d   :  { %3933 = vmatmul.f32.vlgmr.msra.gmra.mxu0 %v3914_v40  ;;  %v3875_v3 = vpop.f32.mrf.mxu2 }
 0x35e   :  { %3896 = vmatpush.msra.mxu3 %v4990_v17  ;;  %v3876_v0 = vadd.f32 %v3875_v3, %v3849_v26 }
 0x360   :  { %3897 = vmatpush.msra.mxu3 %v4991_v35 }
 0x362   :  { %3898 = vmatpush.msra.mxu3 %v4992_v31 }
 0x364   :  { %3899 = vmatpush.msra.mxu3 %v4993_v55 }
 0x365   :  { %3900 = vmatmul.f32.vlgmr.msra.gmra.mxu3 %v3881_v33  ;;  %3936 = vmatmul.f32.gmra.mxu0 %v3915_v42  ;;  %v3878_v52 = vpop.f32.mrf.mxu2  ;;  %v4071_v33 = vld [vmem:[%s7871_s7 + $0x38] sm:$0xff] }
 0x366   :  { %v3879_v59 = vadd.f32 %v3878_v52, %v3852_v63  ;;  %4086 = vmatpush.msrb.mxu2 %v4071_v33 }
 0x36d   :  { %3903 = vmatmul.f32.gmra.mxu3 %v3914_v40  ;;  %3939 = vmatmul.f32.gmra.mxu0 %v3916_v10  ;;  %v4069_v10 = vld [vmem:[%s7871_s7 + $0x28] sm:$0xff] }
 0x375   :  { %3906 = vmatmul.f32.gmra.mxu3 %v3915_v42  ;;  %v4070_v42 = vld [vmem:[%s7871_s7 + $0x30] sm:$0xff] }
 0x376   :  { %4087 = vmatpush.msrb.mxu2 %v4070_v42 }
 0x378   :  { %4088 = vmatpush.msrb.mxu2 %v4069_v10 }
 0x3c8   :  { %v3759_v61 = vpop.f32.mrf.mxu3 }
 0x3c9   :  { %v3762_v13 = vadd.f32 %v3759_v61, %v7690_v23 }
 0x3d0   :  { %v3792_v34 = vpop.f32.mrf.mxu3 }
 0x3d1   :  { %v3795_v23 = vadd.f32 %v3792_v34, %v3762_v13 }
 0x3d2   :  { %v3825_v49 = vpop.f32.mrf.mxu0 }
 0x3d3   :  { %v7790_v28 = vadd.f32 %v3825_v49, %v3795_v23 }
 0x3da   :  { %v3934_v24 = vpop.f32.mrf.mxu0 }
 0x3e2   :  { %v3937_v56 = vpop.f32.mrf.mxu0 }
 0x3e8   :  { %v3901_v1 = vpop.f32.mrf.mxu3 }
 0x3e9   :  { %v3910_v41 = vadd.f32 %v3901_v1, %v3873_v18 }
 0x3ea   :  { %v3940_v40 = vpop.f32.mrf.mxu0 }
 0x3eb   :  { %v3943_v57 = vadd.f32 %v3934_v24, %v3910_v41 }
 0x3ed   :  { %v3946_v47 = vadd.f32 %v7495_v6, %v3943_v57 }
 0x3ef   :  { %vm3949_vm12 = vcmp.ge.f32.partialorder %v3946_v47, 0.0  ;;  %v3952_v48 = vmul.f32 0.01, %v3946_v47 }
 0x3f0   :  { %v3904_v9 = vpop.f32.mrf.mxu3 }
 0x3f1   :  { %v3911_v5 = vadd.f32 %v3904_v9, %v3876_v0  ;;  %v3955_v44 = vsel %vm3949_vm12, %v3946_v47, %v3952_v48 }
 0x3f2   :  { %4901 = vmatmul.msk.f32.vlgmr.msra.gmra.mxu1 %vm70_vm0, %v3955_v44 }
 0x3f3   :  { %v3944_v7 = vadd.f32 %v3937_v56, %v3911_v5 }
 0x3f5   :  { %v3947_v58 = vadd.f32 %v7495_v6, %v3944_v7 }
 0x3f7   :  { %vm3950_vm14 = vcmp.ge.f32.partialorder %v3947_v58, 0.0  ;;  %v3953_v4 = vmul.f32 0.01, %v3947_v58 }
 0x3f8   :  { %v3907_v29 = vpop.f32.mrf.mxu3 }
 0x3f9   :  { %v3912_v2 = vadd.f32 %v3907_v29, %v3879_v59  ;;  %v3956_v36 = vsel %vm3950_vm14, %v3947_v58, %v3953_v4 }
 0x3fa   :  { %4910 = vmatmul.msk.f32.vlgmr.msra.gmra.mxu2 %vm70_vm0, %v3956_v36 }
 0x3fb   :  { %v3945_v17 = vadd.f32 %v3940_v40, %v3912_v2 }
 0x3fd   :  { %v3948_v35 = vadd.f32 %v7495_v6, %v3945_v17  ;;  %v4068_v6 = vld [vmem:[%s7871_s7 + $0x20] sm:$0xff] }
 0x3fe   :  { %4089 = vmatpush.msrb.mxu2 %v4068_v6 }
 0x3ff   :  { %vm3951_vm15 = vcmp.ge.f32.partialorder %v3948_v35, 0.0  ;;  %v3954_v31 = vmul.f32 0.01, %v3948_v35 }
 0x400   :  { %4090 = vmatpush.msrb.mxu2 %v4067_v30 }
 0x401   :  { %v3957_v55 = vsel %vm3951_vm15, %v3948_v35, %v3954_v31 }
 0x402   :  { %4919 = vmatmul.msk.f32.vlgmr.msrb.gmra.mxu1 %vm70_vm0, %v3957_v55  ;;  %4091 = vmatpush.msrb.mxu2 %v4066_v46 }
 0x404   :  { %4092 = vmatpush.msrb.mxu2 %v4065_v43 }
 0x406   :  { %4093 = vmatpush.msrb.mxu2 %v4064_v37 }
 0x46f   :  { %v3987_v53 = vpop.f32.mrf.mxu1 }
 0x470   :  { %v3990_v61 = vadd.f32 %v3987_v53, %v7790_v28 }
 0x47d   :  { %v4020_v19 = vpop.f32.mrf.mxu2 }
 0x47e   :  { %v4023_v13 = vadd.f32 %v4020_v19, %v3990_v61 }
 0x47f   :  { %v4053_v50 = vpop.f32.mrf.mxu1 }
 0x480   :  { %v4056_v20 = vadd.f32 %v4053_v50, %v4023_v13 }
 0x482   :  { %v4060_v8 = vadd.f32 %v4926_v38, %v4056_v20 }
 0x484   :  { %vm4061_vm2 = vcmp.ge.f32.partialorder %v4060_v8, 0.0  ;;  %v4062_v39 = vmul.f32 0.01, %v4060_v8 }
 0x486   :  { %v4063_v34 = vsel %vm4061_vm2, %v4060_v8, %v4062_v39 }
 0x487   :  { %4920 = vmatmul.msk.f32.vlgmr.msrb.gmra.mxu2 %vm70_vm0, %v4063_v34 }
 0x50a   :  { %v4095_v62 = vpop.f32.mrf.mxu2 }
 0x50b   :  { %v4096_v23 = vadd.f32 %v4927_v51, %v4095_v62 }
 0x50d   :  { %4098 = vst [vmem:[%s7872_s9] sm:$0xff] %v4096_v23 }

</bundles_post_ra>
